<compile_context>
chip_gen: v6e
topology: v6e:2x2x1
jax: 0.10.0
libtpu: 0.0.40
codegen_flags: <defaults>
</compile_context>

<pallas_src>
import functools

import jax
import jax.numpy as jnp
from jax.experimental import pallas as pl
from jax.experimental.pallas import tpu as pltpu


_SUBLANE = 8
_LANE = 128


# -----------------------------------------------------------------------------
# Fused kernel: all GRU layers (wavefront) + FC head, one grid step, all VMEM.
# -----------------------------------------------------------------------------
def _fused_seq_predictor_kernel(num_layers, seq_len, batch_p, hidden, *refs):
    H = hidden
    Bp = batch_p
    f32 = jnp.float32
    bf16 = jnp.bfloat16

    xf_ref = refs[0]
    wih0_ref, whh0_ref, b_i0_ref, b_hn0_ref = refs[1:5]
    n_fused = num_layers - 1
    fused_refs = refs[5:5 + 2 * n_fused]
    (fc_w_ref, fc_b_ref, out_ref, g_ref, seq_ref) = refs[5 + 2 * n_fused:]

    # Layer-0 input projection hoisted off the serial path: ONE packed
    # (T*Bp, in) @ (in, 3H) matmul, gate columns [r|z|n]; r/z biases pre-merged
    # (b_ih + b_hh), n column carries the input-side b_ih_n.
    g_ref[...] = (
        jnp.dot(xf_ref[...], wih0_ref[...], preferred_element_type=f32)
        + b_i0_ref[...]
    )

    # Loop-invariant loads / broadcasts hoisted out of the unrolled recurrence.
    whh0 = whh0_ref[...]                                          # (H, 3H) bf16
    b_hn0_b = jnp.broadcast_to(b_hn0_ref[...], (Bp, H))           # (Bp, H) f32
    fused_w = [fused_refs[2 * l][...] for l in range(n_fused)]    # (2H, 4H) bf16
    fused_b = [jnp.broadcast_to(fused_refs[2 * l + 1][...], (Bp, 4 * H))
               for l in range(n_fused)]                           # (Bp, 4H) f32

    def gru_update(rz_pre, gi_n, gh_n_biased, h_old):
        # One packed sigmoid over the [r|z] slab, then static lane slices.
        rz = jax.nn.sigmoid(rz_pre)                               # (Bp, 2H) f32
        r = rz[:, 0:H]
        z = rz[:, H:2 * H]
        n = jnp.tanh(gi_n + r * gh_n_biased)
        return (1.0 - z) * n + z * h_old

    h = [jnp.zeros((Bp, H), f32) for _ in range(num_layers)]
    o_prev = [jnp.zeros((Bp, H), f32) for _ in range(num_layers)]
    last = num_layers - 1

    # Wavefront recurrence: at wave w, layer l runs time step t = w - l, so the
    # layer chains are mutually independent within a wave (layer l consumes the
    # layer-(l-1) output produced in the PREVIOUS wave).  Fully unrolled: T and
    # num_layers are small compile-time constants, all slices are static and
    # sublane-aligned (Bp is a multiple of 8).
    for w in range(seq_len + num_layers - 1):
        for l in range(num_layers - 1, -1, -1):   # high -> low: read-before-write
            t = w - l
            if t < 0 or t >= seq_len:
                continue
            if l == 0:
                gi = g_ref[pl.ds(t * Bp, Bp), :]                      # (Bp, 3H)
                gh = jnp.dot(h[0].astype(bf16), whh0,
                             preferred_element_type=f32)              # (Bp, 3H)
                h_new = gru_update(gi[:, 0:2 * H] + gh[:, 0:2 * H],
                                   gi[:, 2 * H:3 * H],
                                   gh[:, 2 * H:3 * H] + b_hn0_b,
                                   h[0])
            else:
                # One fused (Bp,2H)@(2H,4H) dot covering input AND hidden
                # projections; columns = [r_sum | z_sum | gi_n | gh_n] with all
                # biases folded into fused_b.
                xin = jnp.concatenate([o_prev[l - 1], h[l]],
                                      axis=1).astype(bf16)            # (Bp, 2H)
                g = (jnp.dot(xin, fused_w[l - 1],
                             preferred_element_type=f32)
                     + fused_b[l - 1])                                 # (Bp, 4H)
                h_new = gru_update(g[:, 0:2 * H],
                                   g[:, 2 * H:3 * H],
                                   g[:, 3 * H:4 * H],
                                   h[l])
            h[l] = h_new
            o_prev[l] = h_new
            if l == last:
                seq_ref[pl.ds(t * Bp, Bp), :] = h_new

    # FC head: ONE (T*Bp, H) @ (H, Cp=128) matmul; lane-dense (unmasked) store.
    out_ref[...] = (
        jnp.dot(seq_ref[...].astype(bf16), fc_w_ref[...],
                preferred_element_type=f32)
        + fc_b_ref[...]
    ).astype(out_ref.dtype)


# -----------------------------------------------------------------------------
# Forward wrapper
# -----------------------------------------------------------------------------
def sequence_predictor_forward(x_nchw, params, hidden_size):
    B = x_nchw.shape[0]
    input_size = x_nchw.shape[2]
    T = x_nchw.shape[3]
    Bp = max(_SUBLANE, ((B + _SUBLANE - 1) // _SUBLANE) * _SUBLANE)
    H = hidden_size
    Cp = params["fc_w_t"].shape[1]          # lane-padded class dim (multiple of 128)
    C = params["num_classes"]
    num_layers = 1 + len(params["fused_layers"])

    # __prepare_features: (B,1,Himg,W) -> (T=W, B, I=Himg); pad batch to a
    # sublane multiple, flatten to one aligned 2-D slab, cast to bf16 (MXU-native).
    feats = jnp.transpose(jnp.squeeze(x_nchw, axis=1), (2, 0, 1)).astype(jnp.float32)
    feats = jnp.pad(feats, ((0, 0), (0, Bp - B), (0, 0)))
    xf = feats.reshape(T * Bp, input_size).astype(jnp.bfloat16)

    kernel = functools.partial(_fused_seq_predictor_kernel, num_layers, T, Bp, H)

    inputs = [xf, params["wih0"], params["whh0"], params["b_i0"], params["b_hn0"]]
    for (w_fused, b_fused) in params["fused_layers"]:
        inputs.extend([w_fused, b_fused])
    inputs.extend([params["fc_w_t"], params["fc_b"]])

    in_specs = [pl.BlockSpec(a.shape, lambda i: (0, 0)) for a in inputs]

    out_flat = pl.pallas_call(
        kernel,
        out_shape=jax.ShapeDtypeStruct((T * Bp, Cp), jnp.float32),
        grid_spec=pltpu.PrefetchScalarGridSpec(
            num_scalar_prefetch=0,
            grid=(1,),
            in_specs=in_specs,
            out_specs=pl.BlockSpec((T * Bp, Cp), lambda i: (0, 0)),
            scratch_shapes=[
                pltpu.VMEM((T * Bp, 3 * H), jnp.float32),  # packed layer-0 gates
                pltpu.VMEM((T * Bp, H), jnp.float32),      # last-layer output seq
            ],
        ),
        compiler_params=pltpu.CompilerParams(
            dimension_semantics=("arbitrary",),
        ),
    )(*inputs)

    # Drop batch padding and lane padding, restore (T, B, C).
    return out_flat.reshape(T, Bp, Cp)[:, :B, :C]


# -----------------------------------------------------------------------------
# Parameter handling
# -----------------------------------------------------------------------------
def init_raw_params(key, input_size, hidden_size, num_layers, num_classes):
    """PyTorch-layout GRU/Linear params, U(-1/sqrt(H), 1/sqrt(H))."""
    bound = 1.0 / (hidden_size ** 0.5)
    raw = {"gru_layers": []}
    for layer in range(num_layers):
        in_f = input_size if layer == 0 else hidden_size
        key, k1, k2, k3, k4 = jax.random.split(key, 5)
        w_ih = jax.random.uniform(k1, (3 * hidden_size, in_f), jnp.float32, -bound, bound)
        w_hh = jax.random.uniform(k2, (3 * hidden_size, hidden_size), jnp.float32, -bound, bound)
        b_ih = jax.random.uniform(k3, (3 * hidden_size,), jnp.float32, -bound, bound)
        b_hh = jax.random.uniform(k4, (3 * hidden_size,), jnp.float32, -bound, bound)
        raw["gru_layers"].append((w_ih, w_hh, b_ih, b_hh))
    key, k5, k6 = jax.random.split(key, 3)
    raw["fc_w"] = jax.random.uniform(k5, (num_classes, hidden_size), jnp.float32, -bound, bound)
    raw["fc_b"] = jax.random.uniform(k6, (num_classes,), jnp.float32, -bound, bound)
    return raw


def prepare_kernel_params(raw, hidden_size):
    """Convert PyTorch-layout weights to the fused kernel's packed layout."""
    H = hidden_size
    C = raw["fc_w"].shape[0]
    Cp = ((C + _LANE - 1) // _LANE) * _LANE
    layers = raw["gru_layers"]

    # Layer 0: hoisted input projection -> packed (in, 3H) / (H, 3H) weights.
    # PyTorch stacks gates r, z, n along rows of w_ih/w_hh, so .T gives packed
    # column blocks [r|z|n] directly.
    w_ih0, w_hh0, b_ih0, b_hh0 = layers[0]
    wih0 = w_ih0.T.astype(jnp.bfloat16)                               # (in, 3H)
    whh0 = w_hh0.T.astype(jnp.bfloat16)                               # (H, 3H)
    b_i0 = jnp.concatenate(
        [b_ih0[:2 * H] + b_hh0[:2 * H], b_ih0[2 * H:]]).reshape(1, 3 * H).astype(jnp.float32)
    b_hn0 = b_hh0[2 * H:].reshape(1, H).astype(jnp.float32)

    # Layers >= 1: fused (2H, 4H) weight for one per-step dot of [x_in | h]:
    #   cols [0:H]   = [Wih_r ; Whh_r]
    #   cols [H:2H]  = [Wih_z ; Whh_z]
    #   cols [2H:3H] = [Wih_n ; 0    ]
    #   cols [3H:4H] = [0     ; Whh_n]
    fused_layers = []
    for (w_ih, w_hh, b_ih, b_hh) in layers[1:]:
        wi_t = w_ih.T                                                  # (H, 3H)
        wh_t = w_hh.T                                                  # (H, 3H)
        zH = jnp.zeros((H, H), jnp.float32)
        top = jnp.concatenate([wi_t, zH], axis=1)                      # (H, 4H)
        bot = jnp.concatenate([wh_t[:, :2 * H], zH, wh_t[:, 2 * H:]], axis=1)
        w_fused = jnp.concatenate([top, bot], axis=0).astype(jnp.bfloat16)  # (2H, 4H)
        b_fused = jnp.concatenate(
            [b_ih[:2 * H] + b_hh[:2 * H], b_ih[2 * H:], b_hh[2 * H:]]
        ).reshape(1, 4 * H).astype(jnp.float32)
        fused_layers.append((w_fused, b_fused))

    # FC head: lane-pad to 128 classes for an unmasked, lane-dense output store.
    fc_w_t = jnp.pad(raw["fc_w"].T, ((0, 0), (0, Cp - C))).astype(jnp.bfloat16)  # (H, Cp)
    fc_b = jnp.pad(raw["fc_b"], (0, Cp - C)).reshape(1, Cp).astype(jnp.float32)  # (1, Cp)

    return {
        "wih0": wih0, "whh0": whh0, "b_i0": b_i0, "b_hn0": b_hn0,
        "fused_layers": fused_layers,
        "fc_w_t": fc_w_t, "fc_b": fc_b,
        "num_classes": C,
    }


# -----------------------------------------------------------------------------
# Pure-JAX reference (for correctness check) — uses raw PyTorch-layout params.
# -----------------------------------------------------------------------------
def sequence_predictor_ref(x_nchw, raw, hidden_size):
    feats = jnp.transpose(jnp.squeeze(x_nchw, axis=1), (2, 0, 1)).astype(jnp.float32)
    Hd = hidden_size
    h_seq = feats
    for (w_ih, w_hh, b_ih, b_hh) in raw["gru_layers"]:
        def step(h_prev, x_t, w_ih=w_ih, w_hh=w_hh, b_ih=b_ih, b_hh=b_hh):
            gi = x_t @ w_ih.T + b_ih
            gh = h_prev @ w_hh.T + b_hh
            r = jax.nn.sigmoid(gi[:, :Hd] + gh[:, :Hd])
            z = jax.nn.sigmoid(gi[:, Hd:2 * Hd] + gh[:, Hd:2 * Hd])
            n = jnp.tanh(gi[:, 2 * Hd:] + r * gh[:, 2 * Hd:])
            h_new = (1.0 - z) * n + z * h_prev
            return h_new, h_new

        h0 = jnp.zeros((h_seq.shape[1], Hd), jnp.float32)
        _, h_seq = jax.lax.scan(step, h0, h_seq)
    return h_seq @ raw["fc_w"].T + raw["fc_b"]


if __name__ == "__main__":
    # x: (B=2, C=1, Himg=16, W=16) -> GRU input_size = 16, seq_len = 16
    B, H_img, W_img = 2, 16, 16
    input_size = H_img
    hidden_size = 32
    num_layers = 2
    num_classes = 11

    key = jax.random.PRNGKey(0)
    key, kx = jax.random.split(key)
    x = jax.random.normal(kx, (B, 1, H_img, W_img), jnp.float32)

    raw = init_raw_params(key, input_size, hidden_size, num_layers, num_classes)
    kparams = prepare_kernel_params(raw, hidden_size)

    out = jax.block_until_ready(sequence_predictor_forward(x, kparams, hidden_size))
    ref = jax.block_until_ready(sequence_predictor_ref(x, raw, hidden_size))

    assert out.shape == (W_img, B, num_classes), out.shape
    # bf16 matmul operands (f32 accumulate) -> loosened tolerance vs. f32 reference.
    max_err = float(jnp.max(jnp.abs(out - ref)))
    assert jnp.allclose(out, ref, atol=5e-2, rtol=5e-2), max_err

    print("KERNEL_OK")
</pallas_src>

<mosaic_0001>
module attributes {stable_mosaic.version = 11 : i64} {
  func.func @_fused_seq_predictor_kernel(%arg0: i32, %arg1: memref<128x16xbf16, #tpu.memory_space<vmem>>, %arg2: memref<16x96xbf16, #tpu.memory_space<vmem>>, %arg3: memref<32x96xbf16, #tpu.memory_space<vmem>>, %arg4: memref<1x96xf32, #tpu.memory_space<vmem>>, %arg5: memref<1x32xf32, #tpu.memory_space<vmem>>, %arg6: memref<64x128xbf16, #tpu.memory_space<vmem>>, %arg7: memref<1x128xf32, #tpu.memory_space<vmem>>, %arg8: memref<32x128xbf16, #tpu.memory_space<vmem>>, %arg9: memref<1x128xf32, #tpu.memory_space<vmem>>, %arg10: memref<128x128xf32, #tpu.memory_space<vmem>>, %arg11: memref<128x96xf32, #tpu.memory_space<vmem>>, %arg12: memref<128x32xf32, #tpu.memory_space<vmem>>) attributes {dimension_semantics = [#tpu.dimension_semantics<arbitrary>], iteration_bounds = array<i64: 1>, scalar_prefetch = 0 : i64, scratch_operands = 2 : i64, tpu.core_type = #tpu.core_type<tc>, window_params = [{pipeline_mode = #tpu.pipeline_mode<synchronous>, transform_indices = @transform_0, window_bounds = array<i64: 128, 16>}, {pipeline_mode = #tpu.pipeline_mode<synchronous>, transform_indices = @transform_1, window_bounds = array<i64: 16, 96>}, {pipeline_mode = #tpu.pipeline_mode<synchronous>, transform_indices = @transform_2, window_bounds = array<i64: 32, 96>}, {pipeline_mode = #tpu.pipeline_mode<synchronous>, transform_indices = @transform_3, window_bounds = array<i64: 1, 96>}, {pipeline_mode = #tpu.pipeline_mode<synchronous>, transform_indices = @transform_4, window_bounds = array<i64: 1, 32>}, {pipeline_mode = #tpu.pipeline_mode<synchronous>, transform_indices = @transform_5, window_bounds = array<i64: 64, 128>}, {pipeline_mode = #tpu.pipeline_mode<synchronous>, transform_indices = @transform_6, window_bounds = array<i64: 1, 128>}, {pipeline_mode = #tpu.pipeline_mode<synchronous>, transform_indices = @transform_7, window_bounds = array<i64: 32, 128>}, {pipeline_mode = #tpu.pipeline_mode<synchronous>, transform_indices = @transform_8, window_bounds = array<i64: 1, 128>}, {pipeline_mode = #tpu.pipeline_mode<synchronous>, transform_indices = @transform_9, window_bounds = array<i64: 128, 128>}]} {
    %c0 = arith.constant 0 : index
    %c0_0 = arith.constant 0 : index
    %0 = vector.load %arg1[%c0, %c0_0] : memref<128x16xbf16, #tpu.memory_space<vmem>>, vector<128x16xbf16>
    %c0_1 = arith.constant 0 : index
    %c0_2 = arith.constant 0 : index
    %1 = vector.load %arg2[%c0_1, %c0_2] : memref<16x96xbf16, #tpu.memory_space<vmem>>, vector<16x96xbf16>
    %cst = arith.constant dense<0.000000e+00> : vector<128x96xf32>
    %2 = tpu.matmul %0, %1, %cst {dimension_numbers = #tpu.dot_dimension_numbers<[1], [0], [0], [1], [0, 0, 1, 1], [], []>} : vector<128x16xbf16>, vector<16x96xbf16>, vector<128x96xf32> -> vector<128x96xf32>
    %c0_3 = arith.constant 0 : index
    %c0_4 = arith.constant 0 : index
    %3 = vector.load %arg4[%c0_3, %c0_4] : memref<1x96xf32, #tpu.memory_space<vmem>>, vector<1x96xf32>
    %4 = vector.broadcast %3 : vector<1x96xf32> to vector<128x96xf32>
    %5 = arith.addf %2, %4 : vector<128x96xf32>
    %c0_5 = arith.constant 0 : index
    %c0_6 = arith.constant 0 : index
    %6 = vector.load %arg11[%c0_5, %c0_6] : memref<128x96xf32, #tpu.memory_space<vmem>>, vector<128x96xf32>
    tpu.vector_store %arg11[%c0_5, %c0_6], %5 {strides = array<i32>} : memref<128x96xf32, #tpu.memory_space<vmem>>, vector<128x96xf32>,
    %c0_7 = arith.constant 0 : index
    %c0_8 = arith.constant 0 : index
    %7 = vector.load %arg3[%c0_7, %c0_8] : memref<32x96xbf16, #tpu.memory_space<vmem>>, vector<32x96xbf16>
    %c0_9 = arith.constant 0 : index
    %c0_10 = arith.constant 0 : index
    %8 = vector.load %arg5[%c0_9, %c0_10] : memref<1x32xf32, #tpu.memory_space<vmem>>, vector<1x32xf32>
    %9 = vector.shape_cast %8 : vector<1x32xf32> to vector<1x32xf32>
    %10 = vector.broadcast %9 : vector<1x32xf32> to vector<8x32xf32>
    %c0_11 = arith.constant 0 : index
    %c0_12 = arith.constant 0 : index
    %11 = vector.load %arg6[%c0_11, %c0_12] : memref<64x128xbf16, #tpu.memory_space<vmem>>, vector<64x128xbf16>
    %c0_13 = arith.constant 0 : index
    %c0_14 = arith.constant 0 : index
    %12 = vector.load %arg7[%c0_13, %c0_14] : memref<1x128xf32, #tpu.memory_space<vmem>>, vector<1x128xf32>
    %13 = vector.shape_cast %12 : vector<1x128xf32> to vector<1x128xf32>
    %14 = vector.broadcast %13 : vector<1x128xf32> to vector<8x128xf32>
    %cst_15 = arith.constant 0.000000e+00 : f32
    %15 = vector.broadcast %cst_15 : f32 to vector<8x32xf32>
    %cst_16 = arith.constant 0.000000e+00 : f32
    %16 = vector.broadcast %cst_16 : f32 to vector<8x32xf32>
    %c0_17 = arith.constant 0 : index
    %c0_18 = arith.constant 0 : index
    %17 = vector.load %arg11[%c0_17, %c0_18] : memref<128x96xf32, #tpu.memory_space<vmem>>, vector<8x96xf32>
    %18 = arith.truncf %15 : vector<8x32xf32> to vector<8x32xbf16>
    %cst_19 = arith.constant dense<0.000000e+00> : vector<8x96xf32>
    %19 = tpu.matmul %18, %7, %cst_19 {dimension_numbers = #tpu.dot_dimension_numbers<[1], [0], [0], [1], [0, 0, 1, 1], [], []>} : vector<8x32xbf16>, vector<32x96xbf16>, vector<8x96xf32> -> vector<8x96xf32>
    %20 = vector.extract_strided_slice %17 {offsets = [0, 0], sizes = [8, 64], strides = [1, 1]} : vector<8x96xf32> to vector<8x64xf32>
    %21 = vector.extract_strided_slice %19 {offsets = [0, 0], sizes = [8, 64], strides = [1, 1]} : vector<8x96xf32> to vector<8x64xf32>
    %22 = arith.addf %20, %21 : vector<8x64xf32>
    %23 = vector.extract_strided_slice %17 {offsets = [0, 64], sizes = [8, 32], strides = [1, 1]} : vector<8x96xf32> to vector<8x32xf32>
    %24 = vector.extract_strided_slice %19 {offsets = [0, 64], sizes = [8, 32], strides = [1, 1]} : vector<8x96xf32> to vector<8x32xf32>
    %25 = arith.addf %24, %10 : vector<8x32xf32>
    %26 = arith.negf %22 : vector<8x64xf32>
    %27 = math.exp %26 : vector<8x64xf32>
    %cst_20 = arith.constant 1.000000e+00 : f32
    %28 = vector.broadcast %cst_20 : f32 to vector<8x64xf32>
    %29 = arith.addf %28, %27 : vector<8x64xf32>
    %30 = arith.divf %28, %29 : vector<8x64xf32>
    %31 = vector.extract_strided_slice %30 {offsets = [0, 0], sizes = [8, 32], strides = [1, 1]} : vector<8x64xf32> to vector<8x32xf32>
    %32 = vector.extract_strided_slice %30 {offsets = [0, 32], sizes = [8, 32], strides = [1, 1]} : vector<8x64xf32> to vector<8x32xf32>
    %33 = arith.mulf %31, %25 : vector<8x32xf32>
    %34 = arith.addf %23, %33 : vector<8x32xf32>
    %35 = math.tanh %34 : vector<8x32xf32>
    %cst_21 = arith.constant 1.000000e+00 : f32
    %36 = vector.broadcast %cst_21 : f32 to vector<8x32xf32>
    %37 = arith.subf %36, %32 : vector<8x32xf32>
    %38 = arith.mulf %37, %35 : vector<8x32xf32>
    %39 = arith.mulf %32, %15 : vector<8x32xf32>
    %40 = arith.addf %38, %39 : vector<8x32xf32>
    %41 = tpu.concatenate %40, %16 in 1 : vector<8x32xf32>, vector<8x32xf32> -> vector<8x64xf32>
    %42 = arith.truncf %41 : vector<8x64xf32> to vector<8x64xbf16>
    %cst_22 = arith.constant dense<0.000000e+00> : vector<8x128xf32>
    %43 = tpu.matmul %42, %11, %cst_22 {dimension_numbers = #tpu.dot_dimension_numbers<[1], [0], [0], [1], [0, 0, 1, 1], [], []>} : vector<8x64xbf16>, vector<64x128xbf16>, vector<8x128xf32> -> vector<8x128xf32>
    %44 = arith.addf %43, %14 : vector<8x128xf32>
    %45 = vector.extract_strided_slice %44 {offsets = [0, 0], sizes = [8, 64], strides = [1, 1]} : vector<8x128xf32> to vector<8x64xf32>
    %46 = vector.extract_strided_slice %44 {offsets = [0, 64], sizes = [8, 32], strides = [1, 1]} : vector<8x128xf32> to vector<8x32xf32>
    %47 = vector.extract_strided_slice %44 {offsets = [0, 96], sizes = [8, 32], strides = [1, 1]} : vector<8x128xf32> to vector<8x32xf32>
    %48 = arith.negf %45 : vector<8x64xf32>
    %49 = math.exp %48 : vector<8x64xf32>
    %cst_23 = arith.constant 1.000000e+00 : f32
    %50 = vector.broadcast %cst_23 : f32 to vector<8x64xf32>
    %51 = arith.addf %50, %49 : vector<8x64xf32>
    %52 = arith.divf %50, %51 : vector<8x64xf32>
    %53 = vector.extract_strided_slice %52 {offsets = [0, 0], sizes = [8, 32], strides = [1, 1]} : vector<8x64xf32> to vector<8x32xf32>
    %54 = vector.extract_strided_slice %52 {offsets = [0, 32], sizes = [8, 32], strides = [1, 1]} : vector<8x64xf32> to vector<8x32xf32>
    %55 = arith.mulf %53, %47 : vector<8x32xf32>
    %56 = arith.addf %46, %55 : vector<8x32xf32>
    %57 = math.tanh %56 : vector<8x32xf32>
    %cst_24 = arith.constant 1.000000e+00 : f32
    %58 = vector.broadcast %cst_24 : f32 to vector<8x32xf32>
    %59 = arith.subf %58, %54 : vector<8x32xf32>
    %60 = arith.mulf %59, %57 : vector<8x32xf32>
    %61 = arith.mulf %54, %16 : vector<8x32xf32>
    %62 = arith.addf %60, %61 : vector<8x32xf32>
    %c0_25 = arith.constant 0 : index
    %c0_26 = arith.constant 0 : index
    %63 = vector.load %arg12[%c0_25, %c0_26] : memref<128x32xf32, #tpu.memory_space<vmem>>, vector<8x32xf32>
    tpu.vector_store %arg12[%c0_25, %c0_26], %62 {strides = array<i32>} : memref<128x32xf32, #tpu.memory_space<vmem>>, vector<8x32xf32>,
    %c8 = arith.constant 8 : index
    %c0_27 = arith.constant 0 : index
    %64 = vector.load %arg11[%c8, %c0_27] : memref<128x96xf32, #tpu.memory_space<vmem>>, vector<8x96xf32>
    %65 = arith.truncf %40 : vector<8x32xf32> to vector<8x32xbf16>
    %cst_28 = arith.constant dense<0.000000e+00> : vector<8x96xf32>
    %66 = tpu.matmul %65, %7, %cst_28 {dimension_numbers = #tpu.dot_dimension_numbers<[1], [0], [0], [1], [0, 0, 1, 1], [], []>} : vector<8x32xbf16>, vector<32x96xbf16>, vector<8x96xf32> -> vector<8x96xf32>
    %67 = vector.extract_strided_slice %64 {offsets = [0, 0], sizes = [8, 64], strides = [1, 1]} : vector<8x96xf32> to vector<8x64xf32>
    %68 = vector.extract_strided_slice %66 {offsets = [0, 0], sizes = [8, 64], strides = [1, 1]} : vector<8x96xf32> to vector<8x64xf32>
    %69 = arith.addf %67, %68 : vector<8x64xf32>
    %70 = vector.extract_strided_slice %64 {offsets = [0, 64], sizes = [8, 32], strides = [1, 1]} : vector<8x96xf32> to vector<8x32xf32>
    %71 = vector.extract_strided_slice %66 {offsets = [0, 64], sizes = [8, 32], strides = [1, 1]} : vector<8x96xf32> to vector<8x32xf32>
    %72 = arith.addf %71, %10 : vector<8x32xf32>
    %73 = arith.negf %69 : vector<8x64xf32>
    %74 = math.exp %73 : vector<8x64xf32>
    %cst_29 = arith.constant 1.000000e+00 : f32
    %75 = vector.broadcast %cst_29 : f32 to vector<8x64xf32>
    %76 = arith.addf %75, %74 : vector<8x64xf32>
    %77 = arith.divf %75, %76 : vector<8x64xf32>
    %78 = vector.extract_strided_slice %77 {offsets = [0, 0], sizes = [8, 32], strides = [1, 1]} : vector<8x64xf32> to vector<8x32xf32>
    %79 = vector.extract_strided_slice %77 {offsets = [0, 32], sizes = [8, 32], strides = [1, 1]} : vector<8x64xf32> to vector<8x32xf32>
    %80 = arith.mulf %78, %72 : vector<8x32xf32>
    %81 = arith.addf %70, %80 : vector<8x32xf32>
    %82 = math.tanh %81 : vector<8x32xf32>
    %cst_30 = arith.constant 1.000000e+00 : f32
    %83 = vector.broadcast %cst_30 : f32 to vector<8x32xf32>
    %84 = arith.subf %83, %79 : vector<8x32xf32>
    %85 = arith.mulf %84, %82 : vector<8x32xf32>
    %86 = arith.mulf %79, %40 : vector<8x32xf32>
    %87 = arith.addf %85, %86 : vector<8x32xf32>
    %88 = tpu.concatenate %87, %62 in 1 : vector<8x32xf32>, vector<8x32xf32> -> vector<8x64xf32>
    %89 = arith.truncf %88 : vector<8x64xf32> to vector<8x64xbf16>
    %cst_31 = arith.constant dense<0.000000e+00> : vector<8x128xf32>
    %90 = tpu.matmul %89, %11, %cst_31 {dimension_numbers = #tpu.dot_dimension_numbers<[1], [0], [0], [1], [0, 0, 1, 1], [], []>} : vector<8x64xbf16>, vector<64x128xbf16>, vector<8x128xf32> -> vector<8x128xf32>
    %91 = arith.addf %90, %14 : vector<8x128xf32>
    %92 = vector.extract_strided_slice %91 {offsets = [0, 0], sizes = [8, 64], strides = [1, 1]} : vector<8x128xf32> to vector<8x64xf32>
    %93 = vector.extract_strided_slice %91 {offsets = [0, 64], sizes = [8, 32], strides = [1, 1]} : vector<8x128xf32> to vector<8x32xf32>
    %94 = vector.extract_strided_slice %91 {offsets = [0, 96], sizes = [8, 32], strides = [1, 1]} : vector<8x128xf32> to vector<8x32xf32>
    %95 = arith.negf %92 : vector<8x64xf32>
    %96 = math.exp %95 : vector<8x64xf32>
    %cst_32 = arith.constant 1.000000e+00 : f32
    %97 = vector.broadcast %cst_32 : f32 to vector<8x64xf32>
    %98 = arith.addf %97, %96 : vector<8x64xf32>
    %99 = arith.divf %97, %98 : vector<8x64xf32>
    %100 = vector.extract_strided_slice %99 {offsets = [0, 0], sizes = [8, 32], strides = [1, 1]} : vector<8x64xf32> to vector<8x32xf32>
    %101 = vector.extract_strided_slice %99 {offsets = [0, 32], sizes = [8, 32], strides = [1, 1]} : vector<8x64xf32> to vector<8x32xf32>
    %102 = arith.mulf %100, %94 : vector<8x32xf32>
    %103 = arith.addf %93, %102 : vector<8x32xf32>
    %104 = math.tanh %103 : vector<8x32xf32>
    %cst_33 = arith.constant 1.000000e+00 : f32
    %105 = vector.broadcast %cst_33 : f32 to vector<8x32xf32>
    %106 = arith.subf %105, %101 : vector<8x32xf32>
    %107 = arith.mulf %106, %104 : vector<8x32xf32>
    %108 = arith.mulf %101, %62 : vector<8x32xf32>
    %109 = arith.addf %107, %108 : vector<8x32xf32>
    %c8_34 = arith.constant 8 : index
    %c0_35 = arith.constant 0 : index
    %110 = vector.load %arg12[%c8_34, %c0_35] : memref<128x32xf32, #tpu.memory_space<vmem>>, vector<8x32xf32>
    tpu.vector_store %arg12[%c8_34, %c0_35], %109 {strides = array<i32>} : memref<128x32xf32, #tpu.memory_space<vmem>>, vector<8x32xf32>,
    %c16 = arith.constant 16 : index
    %c0_36 = arith.constant 0 : index
    %111 = vector.load %arg11[%c16, %c0_36] : memref<128x96xf32, #tpu.memory_space<vmem>>, vector<8x96xf32>
    %112 = arith.truncf %87 : vector<8x32xf32> to vector<8x32xbf16>
    %cst_37 = arith.constant dense<0.000000e+00> : vector<8x96xf32>
    %113 = tpu.matmul %112, %7, %cst_37 {dimension_numbers = #tpu.dot_dimension_numbers<[1], [0], [0], [1], [0, 0, 1, 1], [], []>} : vector<8x32xbf16>, vector<32x96xbf16>, vector<8x96xf32> -> vector<8x96xf32>
    %114 = vector.extract_strided_slice %111 {offsets = [0, 0], sizes = [8, 64], strides = [1, 1]} : vector<8x96xf32> to vector<8x64xf32>
    %115 = vector.extract_strided_slice %113 {offsets = [0, 0], sizes = [8, 64], strides = [1, 1]} : vector<8x96xf32> to vector<8x64xf32>
    %116 = arith.addf %114, %115 : vector<8x64xf32>
    %117 = vector.extract_strided_slice %111 {offsets = [0, 64], sizes = [8, 32], strides = [1, 1]} : vector<8x96xf32> to vector<8x32xf32>
    %118 = vector.extract_strided_slice %113 {offsets = [0, 64], sizes = [8, 32], strides = [1, 1]} : vector<8x96xf32> to vector<8x32xf32>
    %119 = arith.addf %118, %10 : vector<8x32xf32>
    %120 = arith.negf %116 : vector<8x64xf32>
    %121 = math.exp %120 : vector<8x64xf32>
    %cst_38 = arith.constant 1.000000e+00 : f32
    %122 = vector.broadcast %cst_38 : f32 to vector<8x64xf32>
    %123 = arith.addf %122, %121 : vector<8x64xf32>
    %124 = arith.divf %122, %123 : vector<8x64xf32>
    %125 = vector.extract_strided_slice %124 {offsets = [0, 0], sizes = [8, 32], strides = [1, 1]} : vector<8x64xf32> to vector<8x32xf32>
    %126 = vector.extract_strided_slice %124 {offsets = [0, 32], sizes = [8, 32], strides = [1, 1]} : vector<8x64xf32> to vector<8x32xf32>
    %127 = arith.mulf %125, %119 : vector<8x32xf32>
    %128 = arith.addf %117, %127 : vector<8x32xf32>
    %129 = math.tanh %128 : vector<8x32xf32>
    %cst_39 = arith.constant 1.000000e+00 : f32
    %130 = vector.broadcast %cst_39 : f32 to vector<8x32xf32>
    %131 = arith.subf %130, %126 : vector<8x32xf32>
    %132 = arith.mulf %131, %129 : vector<8x32xf32>
    %133 = arith.mulf %126, %87 : vector<8x32xf32>
    %134 = arith.addf %132, %133 : vector<8x32xf32>
    %135 = tpu.concatenate %134, %109 in 1 : vector<8x32xf32>, vector<8x32xf32> -> vector<8x64xf32>
    %136 = arith.truncf %135 : vector<8x64xf32> to vector<8x64xbf16>
    %cst_40 = arith.constant dense<0.000000e+00> : vector<8x128xf32>
    %137 = tpu.matmul %136, %11, %cst_40 {dimension_numbers = #tpu.dot_dimension_numbers<[1], [0], [0], [1], [0, 0, 1, 1], [], []>} : vector<8x64xbf16>, vector<64x128xbf16>, vector<8x128xf32> -> vector<8x128xf32>
    %138 = arith.addf %137, %14 : vector<8x128xf32>
    %139 = vector.extract_strided_slice %138 {offsets = [0, 0], sizes = [8, 64], strides = [1, 1]} : vector<8x128xf32> to vector<8x64xf32>
    %140 = vector.extract_strided_slice %138 {offsets = [0, 64], sizes = [8, 32], strides = [1, 1]} : vector<8x128xf32> to vector<8x32xf32>
    %141 = vector.extract_strided_slice %138 {offsets = [0, 96], sizes = [8, 32], strides = [1, 1]} : vector<8x128xf32> to vector<8x32xf32>
    %142 = arith.negf %139 : vector<8x64xf32>
    %143 = math.exp %142 : vector<8x64xf32>
    %cst_41 = arith.constant 1.000000e+00 : f32
    %144 = vector.broadcast %cst_41 : f32 to vector<8x64xf32>
    %145 = arith.addf %144, %143 : vector<8x64xf32>
    %146 = arith.divf %144, %145 : vector<8x64xf32>
    %147 = vector.extract_strided_slice %146 {offsets = [0, 0], sizes = [8, 32], strides = [1, 1]} : vector<8x64xf32> to vector<8x32xf32>
    %148 = vector.extract_strided_slice %146 {offsets = [0, 32], sizes = [8, 32], strides = [1, 1]} : vector<8x64xf32> to vector<8x32xf32>
    %149 = arith.mulf %147, %141 : vector<8x32xf32>
    %150 = arith.addf %140, %149 : vector<8x32xf32>
    %151 = math.tanh %150 : vector<8x32xf32>
    %cst_42 = arith.constant 1.000000e+00 : f32
    %152 = vector.broadcast %cst_42 : f32 to vector<8x32xf32>
    %153 = arith.subf %152, %148 : vector<8x32xf32>
    %154 = arith.mulf %153, %151 : vector<8x32xf32>
    %155 = arith.mulf %148, %109 : vector<8x32xf32>
    %156 = arith.addf %154, %155 : vector<8x32xf32>
    %c16_43 = arith.constant 16 : index
    %c0_44 = arith.constant 0 : index
    %157 = vector.load %arg12[%c16_43, %c0_44] : memref<128x32xf32, #tpu.memory_space<vmem>>, vector<8x32xf32>
    tpu.vector_store %arg12[%c16_43, %c0_44], %156 {strides = array<i32>} : memref<128x32xf32, #tpu.memory_space<vmem>>, vector<8x32xf32>,
    %c24 = arith.constant 24 : index
    %c0_45 = arith.constant 0 : index
    %158 = vector.load %arg11[%c24, %c0_45] : memref<128x96xf32, #tpu.memory_space<vmem>>, vector<8x96xf32>
    %159 = arith.truncf %134 : vector<8x32xf32> to vector<8x32xbf16>
    %cst_46 = arith.constant dense<0.000000e+00> : vector<8x96xf32>
    %160 = tpu.matmul %159, %7, %cst_46 {dimension_numbers = #tpu.dot_dimension_numbers<[1], [0], [0], [1], [0, 0, 1, 1], [], []>} : vector<8x32xbf16>, vector<32x96xbf16>, vector<8x96xf32> -> vector<8x96xf32>
    %161 = vector.extract_strided_slice %158 {offsets = [0, 0], sizes = [8, 64], strides = [1, 1]} : vector<8x96xf32> to vector<8x64xf32>
    %162 = vector.extract_strided_slice %160 {offsets = [0, 0], sizes = [8, 64], strides = [1, 1]} : vector<8x96xf32> to vector<8x64xf32>
    %163 = arith.addf %161, %162 : vector<8x64xf32>
    %164 = vector.extract_strided_slice %158 {offsets = [0, 64], sizes = [8, 32], strides = [1, 1]} : vector<8x96xf32> to vector<8x32xf32>
    %165 = vector.extract_strided_slice %160 {offsets = [0, 64], sizes = [8, 32], strides = [1, 1]} : vector<8x96xf32> to vector<8x32xf32>
    %166 = arith.addf %165, %10 : vector<8x32xf32>
    %167 = arith.negf %163 : vector<8x64xf32>
    %168 = math.exp %167 : vector<8x64xf32>
    %cst_47 = arith.constant 1.000000e+00 : f32
    %169 = vector.broadcast %cst_47 : f32 to vector<8x64xf32>
    %170 = arith.addf %169, %168 : vector<8x64xf32>
    %171 = arith.divf %169, %170 : vector<8x64xf32>
    %172 = vector.extract_strided_slice %171 {offsets = [0, 0], sizes = [8, 32], strides = [1, 1]} : vector<8x64xf32> to vector<8x32xf32>
    %173 = vector.extract_strided_slice %171 {offsets = [0, 32], sizes = [8, 32], strides = [1, 1]} : vector<8x64xf32> to vector<8x32xf32>
    %174 = arith.mulf %172, %166 : vector<8x32xf32>
    %175 = arith.addf %164, %174 : vector<8x32xf32>
    %176 = math.tanh %175 : vector<8x32xf32>
    %cst_48 = arith.constant 1.000000e+00 : f32
    %177 = vector.broadcast %cst_48 : f32 to vector<8x32xf32>
    %178 = arith.subf %177, %173 : vector<8x32xf32>
    %179 = arith.mulf %178, %176 : vector<8x32xf32>
    %180 = arith.mulf %173, %134 : vector<8x32xf32>
    %181 = arith.addf %179, %180 : vector<8x32xf32>
    %182 = tpu.concatenate %181, %156 in 1 : vector<8x32xf32>, vector<8x32xf32> -> vector<8x64xf32>
    %183 = arith.truncf %182 : vector<8x64xf32> to vector<8x64xbf16>
    %cst_49 = arith.constant dense<0.000000e+00> : vector<8x128xf32>
    %184 = tpu.matmul %183, %11, %cst_49 {dimension_numbers = #tpu.dot_dimension_numbers<[1], [0], [0], [1], [0, 0, 1, 1], [], []>} : vector<8x64xbf16>, vector<64x128xbf16>, vector<8x128xf32> -> vector<8x128xf32>
    %185 = arith.addf %184, %14 : vector<8x128xf32>
    %186 = vector.extract_strided_slice %185 {offsets = [0, 0], sizes = [8, 64], strides = [1, 1]} : vector<8x128xf32> to vector<8x64xf32>
    %187 = vector.extract_strided_slice %185 {offsets = [0, 64], sizes = [8, 32], strides = [1, 1]} : vector<8x128xf32> to vector<8x32xf32>
    %188 = vector.extract_strided_slice %185 {offsets = [0, 96], sizes = [8, 32], strides = [1, 1]} : vector<8x128xf32> to vector<8x32xf32>
    %189 = arith.negf %186 : vector<8x64xf32>
    %190 = math.exp %189 : vector<8x64xf32>
    %cst_50 = arith.constant 1.000000e+00 : f32
    %191 = vector.broadcast %cst_50 : f32 to vector<8x64xf32>
    %192 = arith.addf %191, %190 : vector<8x64xf32>
    %193 = arith.divf %191, %192 : vector<8x64xf32>
    %194 = vector.extract_strided_slice %193 {offsets = [0, 0], sizes = [8, 32], strides = [1, 1]} : vector<8x64xf32> to vector<8x32xf32>
    %195 = vector.extract_strided_slice %193 {offsets = [0, 32], sizes = [8, 32], strides = [1, 1]} : vector<8x64xf32> to vector<8x32xf32>
    %196 = arith.mulf %194, %188 : vector<8x32xf32>
    %197 = arith.addf %187, %196 : vector<8x32xf32>
    %198 = math.tanh %197 : vector<8x32xf32>
    %cst_51 = arith.constant 1.000000e+00 : f32
    %199 = vector.broadcast %cst_51 : f32 to vector<8x32xf32>
    %200 = arith.subf %199, %195 : vector<8x32xf32>
    %201 = arith.mulf %200, %198 : vector<8x32xf32>
    %202 = arith.mulf %195, %156 : vector<8x32xf32>
    %203 = arith.addf %201, %202 : vector<8x32xf32>
    %c24_52 = arith.constant 24 : index
    %c0_53 = arith.constant 0 : index
    %204 = vector.load %arg12[%c24_52, %c0_53] : memref<128x32xf32, #tpu.memory_space<vmem>>, vector<8x32xf32>
    tpu.vector_store %arg12[%c24_52, %c0_53], %203 {strides = array<i32>} : memref<128x32xf32, #tpu.memory_space<vmem>>, vector<8x32xf32>,
    %c32 = arith.constant 32 : index
    %c0_54 = arith.constant 0 : index
    %205 = vector.load %arg11[%c32, %c0_54] : memref<128x96xf32, #tpu.memory_space<vmem>>, vector<8x96xf32>
    %206 = arith.truncf %181 : vector<8x32xf32> to vector<8x32xbf16>
    %cst_55 = arith.constant dense<0.000000e+00> : vector<8x96xf32>
    %207 = tpu.matmul %206, %7, %cst_55 {dimension_numbers = #tpu.dot_dimension_numbers<[1], [0], [0], [1], [0, 0, 1, 1], [], []>} : vector<8x32xbf16>, vector<32x96xbf16>, vector<8x96xf32> -> vector<8x96xf32>
    %208 = vector.extract_strided_slice %205 {offsets = [0, 0], sizes = [8, 64], strides = [1, 1]} : vector<8x96xf32> to vector<8x64xf32>
    %209 = vector.extract_strided_slice %207 {offsets = [0, 0], sizes = [8, 64], strides = [1, 1]} : vector<8x96xf32> to vector<8x64xf32>
    %210 = arith.addf %208, %209 : vector<8x64xf32>
    %211 = vector.extract_strided_slice %205 {offsets = [0, 64], sizes = [8, 32], strides = [1, 1]} : vector<8x96xf32> to vector<8x32xf32>
    %212 = vector.extract_strided_slice %207 {offsets = [0, 64], sizes = [8, 32], strides = [1, 1]} : vector<8x96xf32> to vector<8x32xf32>
    %213 = arith.addf %212, %10 : vector<8x32xf32>
    %214 = arith.negf %210 : vector<8x64xf32>
    %215 = math.exp %214 : vector<8x64xf32>
    %cst_56 = arith.constant 1.000000e+00 : f32
    %216 = vector.broadcast %cst_56 : f32 to vector<8x64xf32>
    %217 = arith.addf %216, %215 : vector<8x64xf32>
    %218 = arith.divf %216, %217 : vector<8x64xf32>
    %219 = vector.extract_strided_slice %218 {offsets = [0, 0], sizes = [8, 32], strides = [1, 1]} : vector<8x64xf32> to vector<8x32xf32>
    %220 = vector.extract_strided_slice %218 {offsets = [0, 32], sizes = [8, 32], strides = [1, 1]} : vector<8x64xf32> to vector<8x32xf32>
    %221 = arith.mulf %219, %213 : vector<8x32xf32>
    %222 = arith.addf %211, %221 : vector<8x32xf32>
    %223 = math.tanh %222 : vector<8x32xf32>
    %cst_57 = arith.constant 1.000000e+00 : f32
    %224 = vector.broadcast %cst_57 : f32 to vector<8x32xf32>
    %225 = arith.subf %224, %220 : vector<8x32xf32>
    %226 = arith.mulf %225, %223 : vector<8x32xf32>
    %227 = arith.mulf %220, %181 : vector<8x32xf32>
    %228 = arith.addf %226, %227 : vector<8x32xf32>
    %229 = tpu.concatenate %228, %203 in 1 : vector<8x32xf32>, vector<8x32xf32> -> vector<8x64xf32>
    %230 = arith.truncf %229 : vector<8x64xf32> to vector<8x64xbf16>
    %cst_58 = arith.constant dense<0.000000e+00> : vector<8x128xf32>
    %231 = tpu.matmul %230, %11, %cst_58 {dimension_numbers = #tpu.dot_dimension_numbers<[1], [0], [0], [1], [0, 0, 1, 1], [], []>} : vector<8x64xbf16>, vector<64x128xbf16>, vector<8x128xf32> -> vector<8x128xf32>
    %232 = arith.addf %231, %14 : vector<8x128xf32>
    %233 = vector.extract_strided_slice %232 {offsets = [0, 0], sizes = [8, 64], strides = [1, 1]} : vector<8x128xf32> to vector<8x64xf32>
    %234 = vector.extract_strided_slice %232 {offsets = [0, 64], sizes = [8, 32], strides = [1, 1]} : vector<8x128xf32> to vector<8x32xf32>
    %235 = vector.extract_strided_slice %232 {offsets = [0, 96], sizes = [8, 32], strides = [1, 1]} : vector<8x128xf32> to vector<8x32xf32>
    %236 = arith.negf %233 : vector<8x64xf32>
    %237 = math.exp %236 : vector<8x64xf32>
    %cst_59 = arith.constant 1.000000e+00 : f32
    %238 = vector.broadcast %cst_59 : f32 to vector<8x64xf32>
    %239 = arith.addf %238, %237 : vector<8x64xf32>
    %240 = arith.divf %238, %239 : vector<8x64xf32>
    %241 = vector.extract_strided_slice %240 {offsets = [0, 0], sizes = [8, 32], strides = [1, 1]} : vector<8x64xf32> to vector<8x32xf32>
    %242 = vector.extract_strided_slice %240 {offsets = [0, 32], sizes = [8, 32], strides = [1, 1]} : vector<8x64xf32> to vector<8x32xf32>
    %243 = arith.mulf %241, %235 : vector<8x32xf32>
    %244 = arith.addf %234, %243 : vector<8x32xf32>
    %245 = math.tanh %244 : vector<8x32xf32>
    %cst_60 = arith.constant 1.000000e+00 : f32
    %246 = vector.broadcast %cst_60 : f32 to vector<8x32xf32>
    %247 = arith.subf %246, %242 : vector<8x32xf32>
    %248 = arith.mulf %247, %245 : vector<8x32xf32>
    %249 = arith.mulf %242, %203 : vector<8x32xf32>
    %250 = arith.addf %248, %249 : vector<8x32xf32>
    %c32_61 = arith.constant 32 : index
    %c0_62 = arith.constant 0 : index
    %251 = vector.load %arg12[%c32_61, %c0_62] : memref<128x32xf32, #tpu.memory_space<vmem>>, vector<8x32xf32>
    tpu.vector_store %arg12[%c32_61, %c0_62], %250 {strides = array<i32>} : memref<128x32xf32, #tpu.memory_space<vmem>>, vector<8x32xf32>,
    %c40 = arith.constant 40 : index
    %c0_63 = arith.constant 0 : index
    %252 = vector.load %arg11[%c40, %c0_63] : memref<128x96xf32, #tpu.memory_space<vmem>>, vector<8x96xf32>
    %253 = arith.truncf %228 : vector<8x32xf32> to vector<8x32xbf16>
    %cst_64 = arith.constant dense<0.000000e+00> : vector<8x96xf32>
    %254 = tpu.matmul %253, %7, %cst_64 {dimension_numbers = #tpu.dot_dimension_numbers<[1], [0], [0], [1], [0, 0, 1, 1], [], []>} : vector<8x32xbf16>, vector<32x96xbf16>, vector<8x96xf32> -> vector<8x96xf32>
    %255 = vector.extract_strided_slice %252 {offsets = [0, 0], sizes = [8, 64], strides = [1, 1]} : vector<8x96xf32> to vector<8x64xf32>
    %256 = vector.extract_strided_slice %254 {offsets = [0, 0], sizes = [8, 64], strides = [1, 1]} : vector<8x96xf32> to vector<8x64xf32>
    %257 = arith.addf %255, %256 : vector<8x64xf32>
    %258 = vector.extract_strided_slice %252 {offsets = [0, 64], sizes = [8, 32], strides = [1, 1]} : vector<8x96xf32> to vector<8x32xf32>
    %259 = vector.extract_strided_slice %254 {offsets = [0, 64], sizes = [8, 32], strides = [1, 1]} : vector<8x96xf32> to vector<8x32xf32>
    %260 = arith.addf %259, %10 : vector<8x32xf32>
    %261 = arith.negf %257 : vector<8x64xf32>
    %262 = math.exp %261 : vector<8x64xf32>
    %cst_65 = arith.constant 1.000000e+00 : f32
    %263 = vector.broadcast %cst_65 : f32 to vector<8x64xf32>
    %264 = arith.addf %263, %262 : vector<8x64xf32>
    %265 = arith.divf %263, %264 : vector<8x64xf32>
    %266 = vector.extract_strided_slice %265 {offsets = [0, 0], sizes = [8, 32], strides = [1, 1]} : vector<8x64xf32> to vector<8x32xf32>
    %267 = vector.extract_strided_slice %265 {offsets = [0, 32], sizes = [8, 32], strides = [1, 1]} : vector<8x64xf32> to vector<8x32xf32>
    %268 = arith.mulf %266, %260 : vector<8x32xf32>
    %269 = arith.addf %258, %268 : vector<8x32xf32>
    %270 = math.tanh %269 : vector<8x32xf32>
    %cst_66 = arith.constant 1.000000e+00 : f32
    %271 = vector.broadcast %cst_66 : f32 to vector<8x32xf32>
    %272 = arith.subf %271, %267 : vector<8x32xf32>
    %273 = arith.mulf %272, %270 : vector<8x32xf32>
    %274 = arith.mulf %267, %228 : vector<8x32xf32>
    %275 = arith.addf %273, %274 : vector<8x32xf32>
    %276 = tpu.concatenate %275, %250 in 1 : vector<8x32xf32>, vector<8x32xf32> -> vector<8x64xf32>
    %277 = arith.truncf %276 : vector<8x64xf32> to vector<8x64xbf16>
    %cst_67 = arith.constant dense<0.000000e+00> : vector<8x128xf32>
    %278 = tpu.matmul %277, %11, %cst_67 {dimension_numbers = #tpu.dot_dimension_numbers<[1], [0], [0], [1], [0, 0, 1, 1], [], []>} : vector<8x64xbf16>, vector<64x128xbf16>, vector<8x128xf32> -> vector<8x128xf32>
    %279 = arith.addf %278, %14 : vector<8x128xf32>
    %280 = vector.extract_strided_slice %279 {offsets = [0, 0], sizes = [8, 64], strides = [1, 1]} : vector<8x128xf32> to vector<8x64xf32>
    %281 = vector.extract_strided_slice %279 {offsets = [0, 64], sizes = [8, 32], strides = [1, 1]} : vector<8x128xf32> to vector<8x32xf32>
    %282 = vector.extract_strided_slice %279 {offsets = [0, 96], sizes = [8, 32], strides = [1, 1]} : vector<8x128xf32> to vector<8x32xf32>
    %283 = arith.negf %280 : vector<8x64xf32>
    %284 = math.exp %283 : vector<8x64xf32>
    %cst_68 = arith.constant 1.000000e+00 : f32
    %285 = vector.broadcast %cst_68 : f32 to vector<8x64xf32>
    %286 = arith.addf %285, %284 : vector<8x64xf32>
    %287 = arith.divf %285, %286 : vector<8x64xf32>
    %288 = vector.extract_strided_slice %287 {offsets = [0, 0], sizes = [8, 32], strides = [1, 1]} : vector<8x64xf32> to vector<8x32xf32>
    %289 = vector.extract_strided_slice %287 {offsets = [0, 32], sizes = [8, 32], strides = [1, 1]} : vector<8x64xf32> to vector<8x32xf32>
    %290 = arith.mulf %288, %282 : vector<8x32xf32>
    %291 = arith.addf %281, %290 : vector<8x32xf32>
    %292 = math.tanh %291 : vector<8x32xf32>
    %cst_69 = arith.constant 1.000000e+00 : f32
    %293 = vector.broadcast %cst_69 : f32 to vector<8x32xf32>
    %294 = arith.subf %293, %289 : vector<8x32xf32>
    %295 = arith.mulf %294, %292 : vector<8x32xf32>
    %296 = arith.mulf %289, %250 : vector<8x32xf32>
    %297 = arith.addf %295, %296 : vector<8x32xf32>
    %c40_70 = arith.constant 40 : index
    %c0_71 = arith.constant 0 : index
    %298 = vector.load %arg12[%c40_70, %c0_71] : memref<128x32xf32, #tpu.memory_space<vmem>>, vector<8x32xf32>
    tpu.vector_store %arg12[%c40_70, %c0_71], %297 {strides = array<i32>} : memref<128x32xf32, #tpu.memory_space<vmem>>, vector<8x32xf32>,
    %c48 = arith.constant 48 : index
    %c0_72 = arith.constant 0 : index
    %299 = vector.load %arg11[%c48, %c0_72] : memref<128x96xf32, #tpu.memory_space<vmem>>, vector<8x96xf32>
    %300 = arith.truncf %275 : vector<8x32xf32> to vector<8x32xbf16>
    %cst_73 = arith.constant dense<0.000000e+00> : vector<8x96xf32>
    %301 = tpu.matmul %300, %7, %cst_73 {dimension_numbers = #tpu.dot_dimension_numbers<[1], [0], [0], [1], [0, 0, 1, 1], [], []>} : vector<8x32xbf16>, vector<32x96xbf16>, vector<8x96xf32> -> vector<8x96xf32>
    %302 = vector.extract_strided_slice %299 {offsets = [0, 0], sizes = [8, 64], strides = [1, 1]} : vector<8x96xf32> to vector<8x64xf32>
    %303 = vector.extract_strided_slice %301 {offsets = [0, 0], sizes = [8, 64], strides = [1, 1]} : vector<8x96xf32> to vector<8x64xf32>
    %304 = arith.addf %302, %303 : vector<8x64xf32>
    %305 = vector.extract_strided_slice %299 {offsets = [0, 64], sizes = [8, 32], strides = [1, 1]} : vector<8x96xf32> to vector<8x32xf32>
    %306 = vector.extract_strided_slice %301 {offsets = [0, 64], sizes = [8, 32], strides = [1, 1]} : vector<8x96xf32> to vector<8x32xf32>
    %307 = arith.addf %306, %10 : vector<8x32xf32>
    %308 = arith.negf %304 : vector<8x64xf32>
    %309 = math.exp %308 : vector<8x64xf32>
    %cst_74 = arith.constant 1.000000e+00 : f32
    %310 = vector.broadcast %cst_74 : f32 to vector<8x64xf32>
    %311 = arith.addf %310, %309 : vector<8x64xf32>
    %312 = arith.divf %310, %311 : vector<8x64xf32>
    %313 = vector.extract_strided_slice %312 {offsets = [0, 0], sizes = [8, 32], strides = [1, 1]} : vector<8x64xf32> to vector<8x32xf32>
    %314 = vector.extract_strided_slice %312 {offsets = [0, 32], sizes = [8, 32], strides = [1, 1]} : vector<8x64xf32> to vector<8x32xf32>
    %315 = arith.mulf %313, %307 : vector<8x32xf32>
    %316 = arith.addf %305, %315 : vector<8x32xf32>
    %317 = math.tanh %316 : vector<8x32xf32>
    %cst_75 = arith.constant 1.000000e+00 : f32
    %318 = vector.broadcast %cst_75 : f32 to vector<8x32xf32>
    %319 = arith.subf %318, %314 : vector<8x32xf32>
    %320 = arith.mulf %319, %317 : vector<8x32xf32>
    %321 = arith.mulf %314, %275 : vector<8x32xf32>
    %322 = arith.addf %320, %321 : vector<8x32xf32>
    %323 = tpu.concatenate %322, %297 in 1 : vector<8x32xf32>, vector<8x32xf32> -> vector<8x64xf32>
    %324 = arith.truncf %323 : vector<8x64xf32> to vector<8x64xbf16>
    %cst_76 = arith.constant dense<0.000000e+00> : vector<8x128xf32>
    %325 = tpu.matmul %324, %11, %cst_76 {dimension_numbers = #tpu.dot_dimension_numbers<[1], [0], [0], [1], [0, 0, 1, 1], [], []>} : vector<8x64xbf16>, vector<64x128xbf16>, vector<8x128xf32> -> vector<8x128xf32>
    %326 = arith.addf %325, %14 : vector<8x128xf32>
    %327 = vector.extract_strided_slice %326 {offsets = [0, 0], sizes = [8, 64], strides = [1, 1]} : vector<8x128xf32> to vector<8x64xf32>
    %328 = vector.extract_strided_slice %326 {offsets = [0, 64], sizes = [8, 32], strides = [1, 1]} : vector<8x128xf32> to vector<8x32xf32>
    %329 = vector.extract_strided_slice %326 {offsets = [0, 96], sizes = [8, 32], strides = [1, 1]} : vector<8x128xf32> to vector<8x32xf32>
    %330 = arith.negf %327 : vector<8x64xf32>
    %331 = math.exp %330 : vector<8x64xf32>
    %cst_77 = arith.constant 1.000000e+00 : f32
    %332 = vector.broadcast %cst_77 : f32 to vector<8x64xf32>
    %333 = arith.addf %332, %331 : vector<8x64xf32>
    %334 = arith.divf %332, %333 : vector<8x64xf32>
    %335 = vector.extract_strided_slice %334 {offsets = [0, 0], sizes = [8, 32], strides = [1, 1]} : vector<8x64xf32> to vector<8x32xf32>
    %336 = vector.extract_strided_slice %334 {offsets = [0, 32], sizes = [8, 32], strides = [1, 1]} : vector<8x64xf32> to vector<8x32xf32>
    %337 = arith.mulf %335, %329 : vector<8x32xf32>
    %338 = arith.addf %328, %337 : vector<8x32xf32>
    %339 = math.tanh %338 : vector<8x32xf32>
    %cst_78 = arith.constant 1.000000e+00 : f32
    %340 = vector.broadcast %cst_78 : f32 to vector<8x32xf32>
    %341 = arith.subf %340, %336 : vector<8x32xf32>
    %342 = arith.mulf %341, %339 : vector<8x32xf32>
    %343 = arith.mulf %336, %297 : vector<8x32xf32>
    %344 = arith.addf %342, %343 : vector<8x32xf32>
    %c48_79 = arith.constant 48 : index
    %c0_80 = arith.constant 0 : index
    %345 = vector.load %arg12[%c48_79, %c0_80] : memref<128x32xf32, #tpu.memory_space<vmem>>, vector<8x32xf32>
    tpu.vector_store %arg12[%c48_79, %c0_80], %344 {strides = array<i32>} : memref<128x32xf32, #tpu.memory_space<vmem>>, vector<8x32xf32>,
    %c56 = arith.constant 56 : index
    %c0_81 = arith.constant 0 : index
    %346 = vector.load %arg11[%c56, %c0_81] : memref<128x96xf32, #tpu.memory_space<vmem>>, vector<8x96xf32>
    %347 = arith.truncf %322 : vector<8x32xf32> to vector<8x32xbf16>
    %cst_82 = arith.constant dense<0.000000e+00> : vector<8x96xf32>
    %348 = tpu.matmul %347, %7, %cst_82 {dimension_numbers = #tpu.dot_dimension_numbers<[1], [0], [0], [1], [0, 0, 1, 1], [], []>} : vector<8x32xbf16>, vector<32x96xbf16>, vector<8x96xf32> -> vector<8x96xf32>
    %349 = vector.extract_strided_slice %346 {offsets = [0, 0], sizes = [8, 64], strides = [1, 1]} : vector<8x96xf32> to vector<8x64xf32>
    %350 = vector.extract_strided_slice %348 {offsets = [0, 0], sizes = [8, 64], strides = [1, 1]} : vector<8x96xf32> to vector<8x64xf32>
    %351 = arith.addf %349, %350 : vector<8x64xf32>
    %352 = vector.extract_strided_slice %346 {offsets = [0, 64], sizes = [8, 32], strides = [1, 1]} : vector<8x96xf32> to vector<8x32xf32>
    %353 = vector.extract_strided_slice %348 {offsets = [0, 64], sizes = [8, 32], strides = [1, 1]} : vector<8x96xf32> to vector<8x32xf32>
    %354 = arith.addf %353, %10 : vector<8x32xf32>
    %355 = arith.negf %351 : vector<8x64xf32>
    %356 = math.exp %355 : vector<8x64xf32>
    %cst_83 = arith.constant 1.000000e+00 : f32
    %357 = vector.broadcast %cst_83 : f32 to vector<8x64xf32>
    %358 = arith.addf %357, %356 : vector<8x64xf32>
    %359 = arith.divf %357, %358 : vector<8x64xf32>
    %360 = vector.extract_strided_slice %359 {offsets = [0, 0], sizes = [8, 32], strides = [1, 1]} : vector<8x64xf32> to vector<8x32xf32>
    %361 = vector.extract_strided_slice %359 {offsets = [0, 32], sizes = [8, 32], strides = [1, 1]} : vector<8x64xf32> to vector<8x32xf32>
    %362 = arith.mulf %360, %354 : vector<8x32xf32>
    %363 = arith.addf %352, %362 : vector<8x32xf32>
    %364 = math.tanh %363 : vector<8x32xf32>
    %cst_84 = arith.constant 1.000000e+00 : f32
    %365 = vector.broadcast %cst_84 : f32 to vector<8x32xf32>
    %366 = arith.subf %365, %361 : vector<8x32xf32>
    %367 = arith.mulf %366, %364 : vector<8x32xf32>
    %368 = arith.mulf %361, %322 : vector<8x32xf32>
    %369 = arith.addf %367, %368 : vector<8x32xf32>
    %370 = tpu.concatenate %369, %344 in 1 : vector<8x32xf32>, vector<8x32xf32> -> vector<8x64xf32>
    %371 = arith.truncf %370 : vector<8x64xf32> to vector<8x64xbf16>
    %cst_85 = arith.constant dense<0.000000e+00> : vector<8x128xf32>
    %372 = tpu.matmul %371, %11, %cst_85 {dimension_numbers = #tpu.dot_dimension_numbers<[1], [0], [0], [1], [0, 0, 1, 1], [], []>} : vector<8x64xbf16>, vector<64x128xbf16>, vector<8x128xf32> -> vector<8x128xf32>
    %373 = arith.addf %372, %14 : vector<8x128xf32>
    %374 = vector.extract_strided_slice %373 {offsets = [0, 0], sizes = [8, 64], strides = [1, 1]} : vector<8x128xf32> to vector<8x64xf32>
    %375 = vector.extract_strided_slice %373 {offsets = [0, 64], sizes = [8, 32], strides = [1, 1]} : vector<8x128xf32> to vector<8x32xf32>
    %376 = vector.extract_strided_slice %373 {offsets = [0, 96], sizes = [8, 32], strides = [1, 1]} : vector<8x128xf32> to vector<8x32xf32>
    %377 = arith.negf %374 : vector<8x64xf32>
    %378 = math.exp %377 : vector<8x64xf32>
    %cst_86 = arith.constant 1.000000e+00 : f32
    %379 = vector.broadcast %cst_86 : f32 to vector<8x64xf32>
    %380 = arith.addf %379, %378 : vector<8x64xf32>
    %381 = arith.divf %379, %380 : vector<8x64xf32>
    %382 = vector.extract_strided_slice %381 {offsets = [0, 0], sizes = [8, 32], strides = [1, 1]} : vector<8x64xf32> to vector<8x32xf32>
    %383 = vector.extract_strided_slice %381 {offsets = [0, 32], sizes = [8, 32], strides = [1, 1]} : vector<8x64xf32> to vector<8x32xf32>
    %384 = arith.mulf %382, %376 : vector<8x32xf32>
    %385 = arith.addf %375, %384 : vector<8x32xf32>
    %386 = math.tanh %385 : vector<8x32xf32>
    %cst_87 = arith.constant 1.000000e+00 : f32
    %387 = vector.broadcast %cst_87 : f32 to vector<8x32xf32>
    %388 = arith.subf %387, %383 : vector<8x32xf32>
    %389 = arith.mulf %388, %386 : vector<8x32xf32>
    %390 = arith.mulf %383, %344 : vector<8x32xf32>
    %391 = arith.addf %389, %390 : vector<8x32xf32>
    %c56_88 = arith.constant 56 : index
    %c0_89 = arith.constant 0 : index
    %392 = vector.load %arg12[%c56_88, %c0_89] : memref<128x32xf32, #tpu.memory_space<vmem>>, vector<8x32xf32>
    tpu.vector_store %arg12[%c56_88, %c0_89], %391 {strides = array<i32>} : memref<128x32xf32, #tpu.memory_space<vmem>>, vector<8x32xf32>,
    %c64 = arith.constant 64 : index
    %c0_90 = arith.constant 0 : index
    %393 = vector.load %arg11[%c64, %c0_90] : memref<128x96xf32, #tpu.memory_space<vmem>>, vector<8x96xf32>
    %394 = arith.truncf %369 : vector<8x32xf32> to vector<8x32xbf16>
    %cst_91 = arith.constant dense<0.000000e+00> : vector<8x96xf32>
    %395 = tpu.matmul %394, %7, %cst_91 {dimension_numbers = #tpu.dot_dimension_numbers<[1], [0], [0], [1], [0, 0, 1, 1], [], []>} : vector<8x32xbf16>, vector<32x96xbf16>, vector<8x96xf32> -> vector<8x96xf32>
    %396 = vector.extract_strided_slice %393 {offsets = [0, 0], sizes = [8, 64], strides = [1, 1]} : vector<8x96xf32> to vector<8x64xf32>
    %397 = vector.extract_strided_slice %395 {offsets = [0, 0], sizes = [8, 64], strides = [1, 1]} : vector<8x96xf32> to vector<8x64xf32>
    %398 = arith.addf %396, %397 : vector<8x64xf32>
    %399 = vector.extract_strided_slice %393 {offsets = [0, 64], sizes = [8, 32], strides = [1, 1]} : vector<8x96xf32> to vector<8x32xf32>
    %400 = vector.extract_strided_slice %395 {offsets = [0, 64], sizes = [8, 32], strides = [1, 1]} : vector<8x96xf32> to vector<8x32xf32>
    %401 = arith.addf %400, %10 : vector<8x32xf32>
    %402 = arith.negf %398 : vector<8x64xf32>
    %403 = math.exp %402 : vector<8x64xf32>
    %cst_92 = arith.constant 1.000000e+00 : f32
    %404 = vector.broadcast %cst_92 : f32 to vector<8x64xf32>
    %405 = arith.addf %404, %403 : vector<8x64xf32>
    %406 = arith.divf %404, %405 : vector<8x64xf32>
    %407 = vector.extract_strided_slice %406 {offsets = [0, 0], sizes = [8, 32], strides = [1, 1]} : vector<8x64xf32> to vector<8x32xf32>
    %408 = vector.extract_strided_slice %406 {offsets = [0, 32], sizes = [8, 32], strides = [1, 1]} : vector<8x64xf32> to vector<8x32xf32>
    %409 = arith.mulf %407, %401 : vector<8x32xf32>
    %410 = arith.addf %399, %409 : vector<8x32xf32>
    %411 = math.tanh %410 : vector<8x32xf32>
    %cst_93 = arith.constant 1.000000e+00 : f32
    %412 = vector.broadcast %cst_93 : f32 to vector<8x32xf32>
    %413 = arith.subf %412, %408 : vector<8x32xf32>
    %414 = arith.mulf %413, %411 : vector<8x32xf32>
    %415 = arith.mulf %408, %369 : vector<8x32xf32>
    %416 = arith.addf %414, %415 : vector<8x32xf32>
    %417 = tpu.concatenate %416, %391 in 1 : vector<8x32xf32>, vector<8x32xf32> -> vector<8x64xf32>
    %418 = arith.truncf %417 : vector<8x64xf32> to vector<8x64xbf16>
    %cst_94 = arith.constant dense<0.000000e+00> : vector<8x128xf32>
    %419 = tpu.matmul %418, %11, %cst_94 {dimension_numbers = #tpu.dot_dimension_numbers<[1], [0], [0], [1], [0, 0, 1, 1], [], []>} : vector<8x64xbf16>, vector<64x128xbf16>, vector<8x128xf32> -> vector<8x128xf32>
    %420 = arith.addf %419, %14 : vector<8x128xf32>
    %421 = vector.extract_strided_slice %420 {offsets = [0, 0], sizes = [8, 64], strides = [1, 1]} : vector<8x128xf32> to vector<8x64xf32>
    %422 = vector.extract_strided_slice %420 {offsets = [0, 64], sizes = [8, 32], strides = [1, 1]} : vector<8x128xf32> to vector<8x32xf32>
    %423 = vector.extract_strided_slice %420 {offsets = [0, 96], sizes = [8, 32], strides = [1, 1]} : vector<8x128xf32> to vector<8x32xf32>
    %424 = arith.negf %421 : vector<8x64xf32>
    %425 = math.exp %424 : vector<8x64xf32>
    %cst_95 = arith.constant 1.000000e+00 : f32
    %426 = vector.broadcast %cst_95 : f32 to vector<8x64xf32>
    %427 = arith.addf %426, %425 : vector<8x64xf32>
    %428 = arith.divf %426, %427 : vector<8x64xf32>
    %429 = vector.extract_strided_slice %428 {offsets = [0, 0], sizes = [8, 32], strides = [1, 1]} : vector<8x64xf32> to vector<8x32xf32>
    %430 = vector.extract_strided_slice %428 {offsets = [0, 32], sizes = [8, 32], strides = [1, 1]} : vector<8x64xf32> to vector<8x32xf32>
    %431 = arith.mulf %429, %423 : vector<8x32xf32>
    %432 = arith.addf %422, %431 : vector<8x32xf32>
    %433 = math.tanh %432 : vector<8x32xf32>
    %cst_96 = arith.constant 1.000000e+00 : f32
    %434 = vector.broadcast %cst_96 : f32 to vector<8x32xf32>
    %435 = arith.subf %434, %430 : vector<8x32xf32>
    %436 = arith.mulf %435, %433 : vector<8x32xf32>
    %437 = arith.mulf %430, %391 : vector<8x32xf32>
    %438 = arith.addf %436, %437 : vector<8x32xf32>
    %c64_97 = arith.constant 64 : index
    %c0_98 = arith.constant 0 : index
    %439 = vector.load %arg12[%c64_97, %c0_98] : memref<128x32xf32, #tpu.memory_space<vmem>>, vector<8x32xf32>
    tpu.vector_store %arg12[%c64_97, %c0_98], %438 {strides = array<i32>} : memref<128x32xf32, #tpu.memory_space<vmem>>, vector<8x32xf32>,
    %c72 = arith.constant 72 : index
    %c0_99 = arith.constant 0 : index
    %440 = vector.load %arg11[%c72, %c0_99] : memref<128x96xf32, #tpu.memory_space<vmem>>, vector<8x96xf32>
    %441 = arith.truncf %416 : vector<8x32xf32> to vector<8x32xbf16>
    %cst_100 = arith.constant dense<0.000000e+00> : vector<8x96xf32>
    %442 = tpu.matmul %441, %7, %cst_100 {dimension_numbers = #tpu.dot_dimension_numbers<[1], [0], [0], [1], [0, 0, 1, 1], [], []>} : vector<8x32xbf16>, vector<32x96xbf16>, vector<8x96xf32> -> vector<8x96xf32>
    %443 = vector.extract_strided_slice %440 {offsets = [0, 0], sizes = [8, 64], strides = [1, 1]} : vector<8x96xf32> to vector<8x64xf32>
    %444 = vector.extract_strided_slice %442 {offsets = [0, 0], sizes = [8, 64], strides = [1, 1]} : vector<8x96xf32> to vector<8x64xf32>
    %445 = arith.addf %443, %444 : vector<8x64xf32>
    %446 = vector.extract_strided_slice %440 {offsets = [0, 64], sizes = [8, 32], strides = [1, 1]} : vector<8x96xf32> to vector<8x32xf32>
    %447 = vector.extract_strided_slice %442 {offsets = [0, 64], sizes = [8, 32], strides = [1, 1]} : vector<8x96xf32> to vector<8x32xf32>
    %448 = arith.addf %447, %10 : vector<8x32xf32>
    %449 = arith.negf %445 : vector<8x64xf32>
    %450 = math.exp %449 : vector<8x64xf32>
    %cst_101 = arith.constant 1.000000e+00 : f32
    %451 = vector.broadcast %cst_101 : f32 to vector<8x64xf32>
    %452 = arith.addf %451, %450 : vector<8x64xf32>
    %453 = arith.divf %451, %452 : vector<8x64xf32>
    %454 = vector.extract_strided_slice %453 {offsets = [0, 0], sizes = [8, 32], strides = [1, 1]} : vector<8x64xf32> to vector<8x32xf32>
    %455 = vector.extract_strided_slice %453 {offsets = [0, 32], sizes = [8, 32], strides = [1, 1]} : vector<8x64xf32> to vector<8x32xf32>
    %456 = arith.mulf %454, %448 : vector<8x32xf32>
    %457 = arith.addf %446, %456 : vector<8x32xf32>
    %458 = math.tanh %457 : vector<8x32xf32>
    %cst_102 = arith.constant 1.000000e+00 : f32
    %459 = vector.broadcast %cst_102 : f32 to vector<8x32xf32>
    %460 = arith.subf %459, %455 : vector<8x32xf32>
    %461 = arith.mulf %460, %458 : vector<8x32xf32>
    %462 = arith.mulf %455, %416 : vector<8x32xf32>
    %463 = arith.addf %461, %462 : vector<8x32xf32>
    %464 = tpu.concatenate %463, %438 in 1 : vector<8x32xf32>, vector<8x32xf32> -> vector<8x64xf32>
    %465 = arith.truncf %464 : vector<8x64xf32> to vector<8x64xbf16>
    %cst_103 = arith.constant dense<0.000000e+00> : vector<8x128xf32>
    %466 = tpu.matmul %465, %11, %cst_103 {dimension_numbers = #tpu.dot_dimension_numbers<[1], [0], [0], [1], [0, 0, 1, 1], [], []>} : vector<8x64xbf16>, vector<64x128xbf16>, vector<8x128xf32> -> vector<8x128xf32>
    %467 = arith.addf %466, %14 : vector<8x128xf32>
    %468 = vector.extract_strided_slice %467 {offsets = [0, 0], sizes = [8, 64], strides = [1, 1]} : vector<8x128xf32> to vector<8x64xf32>
    %469 = vector.extract_strided_slice %467 {offsets = [0, 64], sizes = [8, 32], strides = [1, 1]} : vector<8x128xf32> to vector<8x32xf32>
    %470 = vector.extract_strided_slice %467 {offsets = [0, 96], sizes = [8, 32], strides = [1, 1]} : vector<8x128xf32> to vector<8x32xf32>
    %471 = arith.negf %468 : vector<8x64xf32>
    %472 = math.exp %471 : vector<8x64xf32>
    %cst_104 = arith.constant 1.000000e+00 : f32
    %473 = vector.broadcast %cst_104 : f32 to vector<8x64xf32>
    %474 = arith.addf %473, %472 : vector<8x64xf32>
    %475 = arith.divf %473, %474 : vector<8x64xf32>
    %476 = vector.extract_strided_slice %475 {offsets = [0, 0], sizes = [8, 32], strides = [1, 1]} : vector<8x64xf32> to vector<8x32xf32>
    %477 = vector.extract_strided_slice %475 {offsets = [0, 32], sizes = [8, 32], strides = [1, 1]} : vector<8x64xf32> to vector<8x32xf32>
    %478 = arith.mulf %476, %470 : vector<8x32xf32>
    %479 = arith.addf %469, %478 : vector<8x32xf32>
    %480 = math.tanh %479 : vector<8x32xf32>
    %cst_105 = arith.constant 1.000000e+00 : f32
    %481 = vector.broadcast %cst_105 : f32 to vector<8x32xf32>
    %482 = arith.subf %481, %477 : vector<8x32xf32>
    %483 = arith.mulf %482, %480 : vector<8x32xf32>
    %484 = arith.mulf %477, %438 : vector<8x32xf32>
    %485 = arith.addf %483, %484 : vector<8x32xf32>
    %c72_106 = arith.constant 72 : index
    %c0_107 = arith.constant 0 : index
    %486 = vector.load %arg12[%c72_106, %c0_107] : memref<128x32xf32, #tpu.memory_space<vmem>>, vector<8x32xf32>
    tpu.vector_store %arg12[%c72_106, %c0_107], %485 {strides = array<i32>} : memref<128x32xf32, #tpu.memory_space<vmem>>, vector<8x32xf32>,
    %c80 = arith.constant 80 : index
    %c0_108 = arith.constant 0 : index
    %487 = vector.load %arg11[%c80, %c0_108] : memref<128x96xf32, #tpu.memory_space<vmem>>, vector<8x96xf32>
    %488 = arith.truncf %463 : vector<8x32xf32> to vector<8x32xbf16>
    %cst_109 = arith.constant dense<0.000000e+00> : vector<8x96xf32>
    %489 = tpu.matmul %488, %7, %cst_109 {dimension_numbers = #tpu.dot_dimension_numbers<[1], [0], [0], [1], [0, 0, 1, 1], [], []>} : vector<8x32xbf16>, vector<32x96xbf16>, vector<8x96xf32> -> vector<8x96xf32>
    %490 = vector.extract_strided_slice %487 {offsets = [0, 0], sizes = [8, 64], strides = [1, 1]} : vector<8x96xf32> to vector<8x64xf32>
    %491 = vector.extract_strided_slice %489 {offsets = [0, 0], sizes = [8, 64], strides = [1, 1]} : vector<8x96xf32> to vector<8x64xf32>
    %492 = arith.addf %490, %491 : vector<8x64xf32>
    %493 = vector.extract_strided_slice %487 {offsets = [0, 64], sizes = [8, 32], strides = [1, 1]} : vector<8x96xf32> to vector<8x32xf32>
    %494 = vector.extract_strided_slice %489 {offsets = [0, 64], sizes = [8, 32], strides = [1, 1]} : vector<8x96xf32> to vector<8x32xf32>
    %495 = arith.addf %494, %10 : vector<8x32xf32>
    %496 = arith.negf %492 : vector<8x64xf32>
    %497 = math.exp %496 : vector<8x64xf32>
    %cst_110 = arith.constant 1.000000e+00 : f32
    %498 = vector.broadcast %cst_110 : f32 to vector<8x64xf32>
    %499 = arith.addf %498, %497 : vector<8x64xf32>
    %500 = arith.divf %498, %499 : vector<8x64xf32>
    %501 = vector.extract_strided_slice %500 {offsets = [0, 0], sizes = [8, 32], strides = [1, 1]} : vector<8x64xf32> to vector<8x32xf32>
    %502 = vector.extract_strided_slice %500 {offsets = [0, 32], sizes = [8, 32], strides = [1, 1]} : vector<8x64xf32> to vector<8x32xf32>
    %503 = arith.mulf %501, %495 : vector<8x32xf32>
    %504 = arith.addf %493, %503 : vector<8x32xf32>
    %505 = math.tanh %504 : vector<8x32xf32>
    %cst_111 = arith.constant 1.000000e+00 : f32
    %506 = vector.broadcast %cst_111 : f32 to vector<8x32xf32>
    %507 = arith.subf %506, %502 : vector<8x32xf32>
    %508 = arith.mulf %507, %505 : vector<8x32xf32>
    %509 = arith.mulf %502, %463 : vector<8x32xf32>
    %510 = arith.addf %508, %509 : vector<8x32xf32>
    %511 = tpu.concatenate %510, %485 in 1 : vector<8x32xf32>, vector<8x32xf32> -> vector<8x64xf32>
    %512 = arith.truncf %511 : vector<8x64xf32> to vector<8x64xbf16>
    %cst_112 = arith.constant dense<0.000000e+00> : vector<8x128xf32>
    %513 = tpu.matmul %512, %11, %cst_112 {dimension_numbers = #tpu.dot_dimension_numbers<[1], [0], [0], [1], [0, 0, 1, 1], [], []>} : vector<8x64xbf16>, vector<64x128xbf16>, vector<8x128xf32> -> vector<8x128xf32>
    %514 = arith.addf %513, %14 : vector<8x128xf32>
    %515 = vector.extract_strided_slice %514 {offsets = [0, 0], sizes = [8, 64], strides = [1, 1]} : vector<8x128xf32> to vector<8x64xf32>
    %516 = vector.extract_strided_slice %514 {offsets = [0, 64], sizes = [8, 32], strides = [1, 1]} : vector<8x128xf32> to vector<8x32xf32>
    %517 = vector.extract_strided_slice %514 {offsets = [0, 96], sizes = [8, 32], strides = [1, 1]} : vector<8x128xf32> to vector<8x32xf32>
    %518 = arith.negf %515 : vector<8x64xf32>
    %519 = math.exp %518 : vector<8x64xf32>
    %cst_113 = arith.constant 1.000000e+00 : f32
    %520 = vector.broadcast %cst_113 : f32 to vector<8x64xf32>
    %521 = arith.addf %520, %519 : vector<8x64xf32>
    %522 = arith.divf %520, %521 : vector<8x64xf32>
    %523 = vector.extract_strided_slice %522 {offsets = [0, 0], sizes = [8, 32], strides = [1, 1]} : vector<8x64xf32> to vector<8x32xf32>
    %524 = vector.extract_strided_slice %522 {offsets = [0, 32], sizes = [8, 32], strides = [1, 1]} : vector<8x64xf32> to vector<8x32xf32>
    %525 = arith.mulf %523, %517 : vector<8x32xf32>
    %526 = arith.addf %516, %525 : vector<8x32xf32>
    %527 = math.tanh %526 : vector<8x32xf32>
    %cst_114 = arith.constant 1.000000e+00 : f32
    %528 = vector.broadcast %cst_114 : f32 to vector<8x32xf32>
    %529 = arith.subf %528, %524 : vector<8x32xf32>
    %530 = arith.mulf %529, %527 : vector<8x32xf32>
    %531 = arith.mulf %524, %485 : vector<8x32xf32>
    %532 = arith.addf %530, %531 : vector<8x32xf32>
    %c80_115 = arith.constant 80 : index
    %c0_116 = arith.constant 0 : index
    %533 = vector.load %arg12[%c80_115, %c0_116] : memref<128x32xf32, #tpu.memory_space<vmem>>, vector<8x32xf32>
    tpu.vector_store %arg12[%c80_115, %c0_116], %532 {strides = array<i32>} : memref<128x32xf32, #tpu.memory_space<vmem>>, vector<8x32xf32>,
    %c88 = arith.constant 88 : index
    %c0_117 = arith.constant 0 : index
    %534 = vector.load %arg11[%c88, %c0_117] : memref<128x96xf32, #tpu.memory_space<vmem>>, vector<8x96xf32>
    %535 = arith.truncf %510 : vector<8x32xf32> to vector<8x32xbf16>
    %cst_118 = arith.constant dense<0.000000e+00> : vector<8x96xf32>
    %536 = tpu.matmul %535, %7, %cst_118 {dimension_numbers = #tpu.dot_dimension_numbers<[1], [0], [0], [1], [0, 0, 1, 1], [], []>} : vector<8x32xbf16>, vector<32x96xbf16>, vector<8x96xf32> -> vector<8x96xf32>
    %537 = vector.extract_strided_slice %534 {offsets = [0, 0], sizes = [8, 64], strides = [1, 1]} : vector<8x96xf32> to vector<8x64xf32>
    %538 = vector.extract_strided_slice %536 {offsets = [0, 0], sizes = [8, 64], strides = [1, 1]} : vector<8x96xf32> to vector<8x64xf32>
    %539 = arith.addf %537, %538 : vector<8x64xf32>
    %540 = vector.extract_strided_slice %534 {offsets = [0, 64], sizes = [8, 32], strides = [1, 1]} : vector<8x96xf32> to vector<8x32xf32>
    %541 = vector.extract_strided_slice %536 {offsets = [0, 64], sizes = [8, 32], strides = [1, 1]} : vector<8x96xf32> to vector<8x32xf32>
    %542 = arith.addf %541, %10 : vector<8x32xf32>
    %543 = arith.negf %539 : vector<8x64xf32>
    %544 = math.exp %543 : vector<8x64xf32>
    %cst_119 = arith.constant 1.000000e+00 : f32
    %545 = vector.broadcast %cst_119 : f32 to vector<8x64xf32>
    %546 = arith.addf %545, %544 : vector<8x64xf32>
    %547 = arith.divf %545, %546 : vector<8x64xf32>
    %548 = vector.extract_strided_slice %547 {offsets = [0, 0], sizes = [8, 32], strides = [1, 1]} : vector<8x64xf32> to vector<8x32xf32>
    %549 = vector.extract_strided_slice %547 {offsets = [0, 32], sizes = [8, 32], strides = [1, 1]} : vector<8x64xf32> to vector<8x32xf32>
    %550 = arith.mulf %548, %542 : vector<8x32xf32>
    %551 = arith.addf %540, %550 : vector<8x32xf32>
    %552 = math.tanh %551 : vector<8x32xf32>
    %cst_120 = arith.constant 1.000000e+00 : f32
    %553 = vector.broadcast %cst_120 : f32 to vector<8x32xf32>
    %554 = arith.subf %553, %549 : vector<8x32xf32>
    %555 = arith.mulf %554, %552 : vector<8x32xf32>
    %556 = arith.mulf %549, %510 : vector<8x32xf32>
    %557 = arith.addf %555, %556 : vector<8x32xf32>
    %558 = tpu.concatenate %557, %532 in 1 : vector<8x32xf32>, vector<8x32xf32> -> vector<8x64xf32>
    %559 = arith.truncf %558 : vector<8x64xf32> to vector<8x64xbf16>
    %cst_121 = arith.constant dense<0.000000e+00> : vector<8x128xf32>
    %560 = tpu.matmul %559, %11, %cst_121 {dimension_numbers = #tpu.dot_dimension_numbers<[1], [0], [0], [1], [0, 0, 1, 1], [], []>} : vector<8x64xbf16>, vector<64x128xbf16>, vector<8x128xf32> -> vector<8x128xf32>
    %561 = arith.addf %560, %14 : vector<8x128xf32>
    %562 = vector.extract_strided_slice %561 {offsets = [0, 0], sizes = [8, 64], strides = [1, 1]} : vector<8x128xf32> to vector<8x64xf32>
    %563 = vector.extract_strided_slice %561 {offsets = [0, 64], sizes = [8, 32], strides = [1, 1]} : vector<8x128xf32> to vector<8x32xf32>
    %564 = vector.extract_strided_slice %561 {offsets = [0, 96], sizes = [8, 32], strides = [1, 1]} : vector<8x128xf32> to vector<8x32xf32>
    %565 = arith.negf %562 : vector<8x64xf32>
    %566 = math.exp %565 : vector<8x64xf32>
    %cst_122 = arith.constant 1.000000e+00 : f32
    %567 = vector.broadcast %cst_122 : f32 to vector<8x64xf32>
    %568 = arith.addf %567, %566 : vector<8x64xf32>
    %569 = arith.divf %567, %568 : vector<8x64xf32>
    %570 = vector.extract_strided_slice %569 {offsets = [0, 0], sizes = [8, 32], strides = [1, 1]} : vector<8x64xf32> to vector<8x32xf32>
    %571 = vector.extract_strided_slice %569 {offsets = [0, 32], sizes = [8, 32], strides = [1, 1]} : vector<8x64xf32> to vector<8x32xf32>
    %572 = arith.mulf %570, %564 : vector<8x32xf32>
    %573 = arith.addf %563, %572 : vector<8x32xf32>
    %574 = math.tanh %573 : vector<8x32xf32>
    %cst_123 = arith.constant 1.000000e+00 : f32
    %575 = vector.broadcast %cst_123 : f32 to vector<8x32xf32>
    %576 = arith.subf %575, %571 : vector<8x32xf32>
    %577 = arith.mulf %576, %574 : vector<8x32xf32>
    %578 = arith.mulf %571, %532 : vector<8x32xf32>
    %579 = arith.addf %577, %578 : vector<8x32xf32>
    %c88_124 = arith.constant 88 : index
    %c0_125 = arith.constant 0 : index
    %580 = vector.load %arg12[%c88_124, %c0_125] : memref<128x32xf32, #tpu.memory_space<vmem>>, vector<8x32xf32>
    tpu.vector_store %arg12[%c88_124, %c0_125], %579 {strides = array<i32>} : memref<128x32xf32, #tpu.memory_space<vmem>>, vector<8x32xf32>,
    %c96 = arith.constant 96 : index
    %c0_126 = arith.constant 0 : index
    %581 = vector.load %arg11[%c96, %c0_126] : memref<128x96xf32, #tpu.memory_space<vmem>>, vector<8x96xf32>
    %582 = arith.truncf %557 : vector<8x32xf32> to vector<8x32xbf16>
    %cst_127 = arith.constant dense<0.000000e+00> : vector<8x96xf32>
    %583 = tpu.matmul %582, %7, %cst_127 {dimension_numbers = #tpu.dot_dimension_numbers<[1], [0], [0], [1], [0, 0, 1, 1], [], []>} : vector<8x32xbf16>, vector<32x96xbf16>, vector<8x96xf32> -> vector<8x96xf32>
    %584 = vector.extract_strided_slice %581 {offsets = [0, 0], sizes = [8, 64], strides = [1, 1]} : vector<8x96xf32> to vector<8x64xf32>
    %585 = vector.extract_strided_slice %583 {offsets = [0, 0], sizes = [8, 64], strides = [1, 1]} : vector<8x96xf32> to vector<8x64xf32>
    %586 = arith.addf %584, %585 : vector<8x64xf32>
    %587 = vector.extract_strided_slice %581 {offsets = [0, 64], sizes = [8, 32], strides = [1, 1]} : vector<8x96xf32> to vector<8x32xf32>
    %588 = vector.extract_strided_slice %583 {offsets = [0, 64], sizes = [8, 32], strides = [1, 1]} : vector<8x96xf32> to vector<8x32xf32>
    %589 = arith.addf %588, %10 : vector<8x32xf32>
    %590 = arith.negf %586 : vector<8x64xf32>
    %591 = math.exp %590 : vector<8x64xf32>
    %cst_128 = arith.constant 1.000000e+00 : f32
    %592 = vector.broadcast %cst_128 : f32 to vector<8x64xf32>
    %593 = arith.addf %592, %591 : vector<8x64xf32>
    %594 = arith.divf %592, %593 : vector<8x64xf32>
    %595 = vector.extract_strided_slice %594 {offsets = [0, 0], sizes = [8, 32], strides = [1, 1]} : vector<8x64xf32> to vector<8x32xf32>
    %596 = vector.extract_strided_slice %594 {offsets = [0, 32], sizes = [8, 32], strides = [1, 1]} : vector<8x64xf32> to vector<8x32xf32>
    %597 = arith.mulf %595, %589 : vector<8x32xf32>
    %598 = arith.addf %587, %597 : vector<8x32xf32>
    %599 = math.tanh %598 : vector<8x32xf32>
    %cst_129 = arith.constant 1.000000e+00 : f32
    %600 = vector.broadcast %cst_129 : f32 to vector<8x32xf32>
    %601 = arith.subf %600, %596 : vector<8x32xf32>
    %602 = arith.mulf %601, %599 : vector<8x32xf32>
    %603 = arith.mulf %596, %557 : vector<8x32xf32>
    %604 = arith.addf %602, %603 : vector<8x32xf32>
    %605 = tpu.concatenate %604, %579 in 1 : vector<8x32xf32>, vector<8x32xf32> -> vector<8x64xf32>
    %606 = arith.truncf %605 : vector<8x64xf32> to vector<8x64xbf16>
    %cst_130 = arith.constant dense<0.000000e+00> : vector<8x128xf32>
    %607 = tpu.matmul %606, %11, %cst_130 {dimension_numbers = #tpu.dot_dimension_numbers<[1], [0], [0], [1], [0, 0, 1, 1], [], []>} : vector<8x64xbf16>, vector<64x128xbf16>, vector<8x128xf32> -> vector<8x128xf32>
    %608 = arith.addf %607, %14 : vector<8x128xf32>
    %609 = vector.extract_strided_slice %608 {offsets = [0, 0], sizes = [8, 64], strides = [1, 1]} : vector<8x128xf32> to vector<8x64xf32>
    %610 = vector.extract_strided_slice %608 {offsets = [0, 64], sizes = [8, 32], strides = [1, 1]} : vector<8x128xf32> to vector<8x32xf32>
    %611 = vector.extract_strided_slice %608 {offsets = [0, 96], sizes = [8, 32], strides = [1, 1]} : vector<8x128xf32> to vector<8x32xf32>
    %612 = arith.negf %609 : vector<8x64xf32>
    %613 = math.exp %612 : vector<8x64xf32>
    %cst_131 = arith.constant 1.000000e+00 : f32
    %614 = vector.broadcast %cst_131 : f32 to vector<8x64xf32>
    %615 = arith.addf %614, %613 : vector<8x64xf32>
    %616 = arith.divf %614, %615 : vector<8x64xf32>
    %617 = vector.extract_strided_slice %616 {offsets = [0, 0], sizes = [8, 32], strides = [1, 1]} : vector<8x64xf32> to vector<8x32xf32>
    %618 = vector.extract_strided_slice %616 {offsets = [0, 32], sizes = [8, 32], strides = [1, 1]} : vector<8x64xf32> to vector<8x32xf32>
    %619 = arith.mulf %617, %611 : vector<8x32xf32>
    %620 = arith.addf %610, %619 : vector<8x32xf32>
    %621 = math.tanh %620 : vector<8x32xf32>
    %cst_132 = arith.constant 1.000000e+00 : f32
    %622 = vector.broadcast %cst_132 : f32 to vector<8x32xf32>
    %623 = arith.subf %622, %618 : vector<8x32xf32>
    %624 = arith.mulf %623, %621 : vector<8x32xf32>
    %625 = arith.mulf %618, %579 : vector<8x32xf32>
    %626 = arith.addf %624, %625 : vector<8x32xf32>
    %c96_133 = arith.constant 96 : index
    %c0_134 = arith.constant 0 : index
    %627 = vector.load %arg12[%c96_133, %c0_134] : memref<128x32xf32, #tpu.memory_space<vmem>>, vector<8x32xf32>
    tpu.vector_store %arg12[%c96_133, %c0_134], %626 {strides = array<i32>} : memref<128x32xf32, #tpu.memory_space<vmem>>, vector<8x32xf32>,
    %c104 = arith.constant 104 : index
    %c0_135 = arith.constant 0 : index
    %628 = vector.load %arg11[%c104, %c0_135] : memref<128x96xf32, #tpu.memory_space<vmem>>, vector<8x96xf32>
    %629 = arith.truncf %604 : vector<8x32xf32> to vector<8x32xbf16>
    %cst_136 = arith.constant dense<0.000000e+00> : vector<8x96xf32>
    %630 = tpu.matmul %629, %7, %cst_136 {dimension_numbers = #tpu.dot_dimension_numbers<[1], [0], [0], [1], [0, 0, 1, 1], [], []>} : vector<8x32xbf16>, vector<32x96xbf16>, vector<8x96xf32> -> vector<8x96xf32>
    %631 = vector.extract_strided_slice %628 {offsets = [0, 0], sizes = [8, 64], strides = [1, 1]} : vector<8x96xf32> to vector<8x64xf32>
    %632 = vector.extract_strided_slice %630 {offsets = [0, 0], sizes = [8, 64], strides = [1, 1]} : vector<8x96xf32> to vector<8x64xf32>
    %633 = arith.addf %631, %632 : vector<8x64xf32>
    %634 = vector.extract_strided_slice %628 {offsets = [0, 64], sizes = [8, 32], strides = [1, 1]} : vector<8x96xf32> to vector<8x32xf32>
    %635 = vector.extract_strided_slice %630 {offsets = [0, 64], sizes = [8, 32], strides = [1, 1]} : vector<8x96xf32> to vector<8x32xf32>
    %636 = arith.addf %635, %10 : vector<8x32xf32>
    %637 = arith.negf %633 : vector<8x64xf32>
    %638 = math.exp %637 : vector<8x64xf32>
    %cst_137 = arith.constant 1.000000e+00 : f32
    %639 = vector.broadcast %cst_137 : f32 to vector<8x64xf32>
    %640 = arith.addf %639, %638 : vector<8x64xf32>
    %641 = arith.divf %639, %640 : vector<8x64xf32>
    %642 = vector.extract_strided_slice %641 {offsets = [0, 0], sizes = [8, 32], strides = [1, 1]} : vector<8x64xf32> to vector<8x32xf32>
    %643 = vector.extract_strided_slice %641 {offsets = [0, 32], sizes = [8, 32], strides = [1, 1]} : vector<8x64xf32> to vector<8x32xf32>
    %644 = arith.mulf %642, %636 : vector<8x32xf32>
    %645 = arith.addf %634, %644 : vector<8x32xf32>
    %646 = math.tanh %645 : vector<8x32xf32>
    %cst_138 = arith.constant 1.000000e+00 : f32
    %647 = vector.broadcast %cst_138 : f32 to vector<8x32xf32>
    %648 = arith.subf %647, %643 : vector<8x32xf32>
    %649 = arith.mulf %648, %646 : vector<8x32xf32>
    %650 = arith.mulf %643, %604 : vector<8x32xf32>
    %651 = arith.addf %649, %650 : vector<8x32xf32>
    %652 = tpu.concatenate %651, %626 in 1 : vector<8x32xf32>, vector<8x32xf32> -> vector<8x64xf32>
    %653 = arith.truncf %652 : vector<8x64xf32> to vector<8x64xbf16>
    %cst_139 = arith.constant dense<0.000000e+00> : vector<8x128xf32>
    %654 = tpu.matmul %653, %11, %cst_139 {dimension_numbers = #tpu.dot_dimension_numbers<[1], [0], [0], [1], [0, 0, 1, 1], [], []>} : vector<8x64xbf16>, vector<64x128xbf16>, vector<8x128xf32> -> vector<8x128xf32>
    %655 = arith.addf %654, %14 : vector<8x128xf32>
    %656 = vector.extract_strided_slice %655 {offsets = [0, 0], sizes = [8, 64], strides = [1, 1]} : vector<8x128xf32> to vector<8x64xf32>
    %657 = vector.extract_strided_slice %655 {offsets = [0, 64], sizes = [8, 32], strides = [1, 1]} : vector<8x128xf32> to vector<8x32xf32>
    %658 = vector.extract_strided_slice %655 {offsets = [0, 96], sizes = [8, 32], strides = [1, 1]} : vector<8x128xf32> to vector<8x32xf32>
    %659 = arith.negf %656 : vector<8x64xf32>
    %660 = math.exp %659 : vector<8x64xf32>
    %cst_140 = arith.constant 1.000000e+00 : f32
    %661 = vector.broadcast %cst_140 : f32 to vector<8x64xf32>
    %662 = arith.addf %661, %660 : vector<8x64xf32>
    %663 = arith.divf %661, %662 : vector<8x64xf32>
    %664 = vector.extract_strided_slice %663 {offsets = [0, 0], sizes = [8, 32], strides = [1, 1]} : vector<8x64xf32> to vector<8x32xf32>
    %665 = vector.extract_strided_slice %663 {offsets = [0, 32], sizes = [8, 32], strides = [1, 1]} : vector<8x64xf32> to vector<8x32xf32>
    %666 = arith.mulf %664, %658 : vector<8x32xf32>
    %667 = arith.addf %657, %666 : vector<8x32xf32>
    %668 = math.tanh %667 : vector<8x32xf32>
    %cst_141 = arith.constant 1.000000e+00 : f32
    %669 = vector.broadcast %cst_141 : f32 to vector<8x32xf32>
    %670 = arith.subf %669, %665 : vector<8x32xf32>
    %671 = arith.mulf %670, %668 : vector<8x32xf32>
    %672 = arith.mulf %665, %626 : vector<8x32xf32>
    %673 = arith.addf %671, %672 : vector<8x32xf32>
    %c104_142 = arith.constant 104 : index
    %c0_143 = arith.constant 0 : index
    %674 = vector.load %arg12[%c104_142, %c0_143] : memref<128x32xf32, #tpu.memory_space<vmem>>, vector<8x32xf32>
    tpu.vector_store %arg12[%c104_142, %c0_143], %673 {strides = array<i32>} : memref<128x32xf32, #tpu.memory_space<vmem>>, vector<8x32xf32>,
    %c112 = arith.constant 112 : index
    %c0_144 = arith.constant 0 : index
    %675 = vector.load %arg11[%c112, %c0_144] : memref<128x96xf32, #tpu.memory_space<vmem>>, vector<8x96xf32>
    %676 = arith.truncf %651 : vector<8x32xf32> to vector<8x32xbf16>
    %cst_145 = arith.constant dense<0.000000e+00> : vector<8x96xf32>
    %677 = tpu.matmul %676, %7, %cst_145 {dimension_numbers = #tpu.dot_dimension_numbers<[1], [0], [0], [1], [0, 0, 1, 1], [], []>} : vector<8x32xbf16>, vector<32x96xbf16>, vector<8x96xf32> -> vector<8x96xf32>
    %678 = vector.extract_strided_slice %675 {offsets = [0, 0], sizes = [8, 64], strides = [1, 1]} : vector<8x96xf32> to vector<8x64xf32>
    %679 = vector.extract_strided_slice %677 {offsets = [0, 0], sizes = [8, 64], strides = [1, 1]} : vector<8x96xf32> to vector<8x64xf32>
    %680 = arith.addf %678, %679 : vector<8x64xf32>
    %681 = vector.extract_strided_slice %675 {offsets = [0, 64], sizes = [8, 32], strides = [1, 1]} : vector<8x96xf32> to vector<8x32xf32>
    %682 = vector.extract_strided_slice %677 {offsets = [0, 64], sizes = [8, 32], strides = [1, 1]} : vector<8x96xf32> to vector<8x32xf32>
    %683 = arith.addf %682, %10 : vector<8x32xf32>
    %684 = arith.negf %680 : vector<8x64xf32>
    %685 = math.exp %684 : vector<8x64xf32>
    %cst_146 = arith.constant 1.000000e+00 : f32
    %686 = vector.broadcast %cst_146 : f32 to vector<8x64xf32>
    %687 = arith.addf %686, %685 : vector<8x64xf32>
    %688 = arith.divf %686, %687 : vector<8x64xf32>
    %689 = vector.extract_strided_slice %688 {offsets = [0, 0], sizes = [8, 32], strides = [1, 1]} : vector<8x64xf32> to vector<8x32xf32>
    %690 = vector.extract_strided_slice %688 {offsets = [0, 32], sizes = [8, 32], strides = [1, 1]} : vector<8x64xf32> to vector<8x32xf32>
    %691 = arith.mulf %689, %683 : vector<8x32xf32>
    %692 = arith.addf %681, %691 : vector<8x32xf32>
    %693 = math.tanh %692 : vector<8x32xf32>
    %cst_147 = arith.constant 1.000000e+00 : f32
    %694 = vector.broadcast %cst_147 : f32 to vector<8x32xf32>
    %695 = arith.subf %694, %690 : vector<8x32xf32>
    %696 = arith.mulf %695, %693 : vector<8x32xf32>
    %697 = arith.mulf %690, %651 : vector<8x32xf32>
    %698 = arith.addf %696, %697 : vector<8x32xf32>
    %699 = tpu.concatenate %698, %673 in 1 : vector<8x32xf32>, vector<8x32xf32> -> vector<8x64xf32>
    %700 = arith.truncf %699 : vector<8x64xf32> to vector<8x64xbf16>
    %cst_148 = arith.constant dense<0.000000e+00> : vector<8x128xf32>
    %701 = tpu.matmul %700, %11, %cst_148 {dimension_numbers = #tpu.dot_dimension_numbers<[1], [0], [0], [1], [0, 0, 1, 1], [], []>} : vector<8x64xbf16>, vector<64x128xbf16>, vector<8x128xf32> -> vector<8x128xf32>
    %702 = arith.addf %701, %14 : vector<8x128xf32>
    %703 = vector.extract_strided_slice %702 {offsets = [0, 0], sizes = [8, 64], strides = [1, 1]} : vector<8x128xf32> to vector<8x64xf32>
    %704 = vector.extract_strided_slice %702 {offsets = [0, 64], sizes = [8, 32], strides = [1, 1]} : vector<8x128xf32> to vector<8x32xf32>
    %705 = vector.extract_strided_slice %702 {offsets = [0, 96], sizes = [8, 32], strides = [1, 1]} : vector<8x128xf32> to vector<8x32xf32>
    %706 = arith.negf %703 : vector<8x64xf32>
    %707 = math.exp %706 : vector<8x64xf32>
    %cst_149 = arith.constant 1.000000e+00 : f32
    %708 = vector.broadcast %cst_149 : f32 to vector<8x64xf32>
    %709 = arith.addf %708, %707 : vector<8x64xf32>
    %710 = arith.divf %708, %709 : vector<8x64xf32>
    %711 = vector.extract_strided_slice %710 {offsets = [0, 0], sizes = [8, 32], strides = [1, 1]} : vector<8x64xf32> to vector<8x32xf32>
    %712 = vector.extract_strided_slice %710 {offsets = [0, 32], sizes = [8, 32], strides = [1, 1]} : vector<8x64xf32> to vector<8x32xf32>
    %713 = arith.mulf %711, %705 : vector<8x32xf32>
    %714 = arith.addf %704, %713 : vector<8x32xf32>
    %715 = math.tanh %714 : vector<8x32xf32>
    %cst_150 = arith.constant 1.000000e+00 : f32
    %716 = vector.broadcast %cst_150 : f32 to vector<8x32xf32>
    %717 = arith.subf %716, %712 : vector<8x32xf32>
    %718 = arith.mulf %717, %715 : vector<8x32xf32>
    %719 = arith.mulf %712, %673 : vector<8x32xf32>
    %720 = arith.addf %718, %719 : vector<8x32xf32>
    %c112_151 = arith.constant 112 : index
    %c0_152 = arith.constant 0 : index
    %721 = vector.load %arg12[%c112_151, %c0_152] : memref<128x32xf32, #tpu.memory_space<vmem>>, vector<8x32xf32>
    tpu.vector_store %arg12[%c112_151, %c0_152], %720 {strides = array<i32>} : memref<128x32xf32, #tpu.memory_space<vmem>>, vector<8x32xf32>,
    %c120 = arith.constant 120 : index
    %c0_153 = arith.constant 0 : index
    %722 = vector.load %arg11[%c120, %c0_153] : memref<128x96xf32, #tpu.memory_space<vmem>>, vector<8x96xf32>
    %723 = arith.truncf %698 : vector<8x32xf32> to vector<8x32xbf16>
    %cst_154 = arith.constant dense<0.000000e+00> : vector<8x96xf32>
    %724 = tpu.matmul %723, %7, %cst_154 {dimension_numbers = #tpu.dot_dimension_numbers<[1], [0], [0], [1], [0, 0, 1, 1], [], []>} : vector<8x32xbf16>, vector<32x96xbf16>, vector<8x96xf32> -> vector<8x96xf32>
    %725 = vector.extract_strided_slice %722 {offsets = [0, 0], sizes = [8, 64], strides = [1, 1]} : vector<8x96xf32> to vector<8x64xf32>
    %726 = vector.extract_strided_slice %724 {offsets = [0, 0], sizes = [8, 64], strides = [1, 1]} : vector<8x96xf32> to vector<8x64xf32>
    %727 = arith.addf %725, %726 : vector<8x64xf32>
    %728 = vector.extract_strided_slice %722 {offsets = [0, 64], sizes = [8, 32], strides = [1, 1]} : vector<8x96xf32> to vector<8x32xf32>
    %729 = vector.extract_strided_slice %724 {offsets = [0, 64], sizes = [8, 32], strides = [1, 1]} : vector<8x96xf32> to vector<8x32xf32>
    %730 = arith.addf %729, %10 : vector<8x32xf32>
    %731 = arith.negf %727 : vector<8x64xf32>
    %732 = math.exp %731 : vector<8x64xf32>
    %cst_155 = arith.constant 1.000000e+00 : f32
    %733 = vector.broadcast %cst_155 : f32 to vector<8x64xf32>
    %734 = arith.addf %733, %732 : vector<8x64xf32>
    %735 = arith.divf %733, %734 : vector<8x64xf32>
    %736 = vector.extract_strided_slice %735 {offsets = [0, 0], sizes = [8, 32], strides = [1, 1]} : vector<8x64xf32> to vector<8x32xf32>
    %737 = vector.extract_strided_slice %735 {offsets = [0, 32], sizes = [8, 32], strides = [1, 1]} : vector<8x64xf32> to vector<8x32xf32>
    %738 = arith.mulf %736, %730 : vector<8x32xf32>
    %739 = arith.addf %728, %738 : vector<8x32xf32>
    %740 = math.tanh %739 : vector<8x32xf32>
    %cst_156 = arith.constant 1.000000e+00 : f32
    %741 = vector.broadcast %cst_156 : f32 to vector<8x32xf32>
    %742 = arith.subf %741, %737 : vector<8x32xf32>
    %743 = arith.mulf %742, %740 : vector<8x32xf32>
    %744 = arith.mulf %737, %698 : vector<8x32xf32>
    %745 = arith.addf %743, %744 : vector<8x32xf32>
    %746 = tpu.concatenate %745, %720 in 1 : vector<8x32xf32>, vector<8x32xf32> -> vector<8x64xf32>
    %747 = arith.truncf %746 : vector<8x64xf32> to vector<8x64xbf16>
    %cst_157 = arith.constant dense<0.000000e+00> : vector<8x128xf32>
    %748 = tpu.matmul %747, %11, %cst_157 {dimension_numbers = #tpu.dot_dimension_numbers<[1], [0], [0], [1], [0, 0, 1, 1], [], []>} : vector<8x64xbf16>, vector<64x128xbf16>, vector<8x128xf32> -> vector<8x128xf32>
    %749 = arith.addf %748, %14 : vector<8x128xf32>
    %750 = vector.extract_strided_slice %749 {offsets = [0, 0], sizes = [8, 64], strides = [1, 1]} : vector<8x128xf32> to vector<8x64xf32>
    %751 = vector.extract_strided_slice %749 {offsets = [0, 64], sizes = [8, 32], strides = [1, 1]} : vector<8x128xf32> to vector<8x32xf32>
    %752 = vector.extract_strided_slice %749 {offsets = [0, 96], sizes = [8, 32], strides = [1, 1]} : vector<8x128xf32> to vector<8x32xf32>
    %753 = arith.negf %750 : vector<8x64xf32>
    %754 = math.exp %753 : vector<8x64xf32>
    %cst_158 = arith.constant 1.000000e+00 : f32
    %755 = vector.broadcast %cst_158 : f32 to vector<8x64xf32>
    %756 = arith.addf %755, %754 : vector<8x64xf32>
    %757 = arith.divf %755, %756 : vector<8x64xf32>
    %758 = vector.extract_strided_slice %757 {offsets = [0, 0], sizes = [8, 32], strides = [1, 1]} : vector<8x64xf32> to vector<8x32xf32>
    %759 = vector.extract_strided_slice %757 {offsets = [0, 32], sizes = [8, 32], strides = [1, 1]} : vector<8x64xf32> to vector<8x32xf32>
    %760 = arith.mulf %758, %752 : vector<8x32xf32>
    %761 = arith.addf %751, %760 : vector<8x32xf32>
    %762 = math.tanh %761 : vector<8x32xf32>
    %cst_159 = arith.constant 1.000000e+00 : f32
    %763 = vector.broadcast %cst_159 : f32 to vector<8x32xf32>
    %764 = arith.subf %763, %759 : vector<8x32xf32>
    %765 = arith.mulf %764, %762 : vector<8x32xf32>
    %766 = arith.mulf %759, %720 : vector<8x32xf32>
    %767 = arith.addf %765, %766 : vector<8x32xf32>
    %c120_160 = arith.constant 120 : index
    %c0_161 = arith.constant 0 : index
    %768 = vector.load %arg12[%c120_160, %c0_161] : memref<128x32xf32, #tpu.memory_space<vmem>>, vector<8x32xf32>
    tpu.vector_store %arg12[%c120_160, %c0_161], %767 {strides = array<i32>} : memref<128x32xf32, #tpu.memory_space<vmem>>, vector<8x32xf32>,
    %c0_162 = arith.constant 0 : index
    %c0_163 = arith.constant 0 : index
    %769 = vector.load %arg12[%c0_162, %c0_163] : memref<128x32xf32, #tpu.memory_space<vmem>>, vector<128x32xf32>
    %770 = arith.truncf %769 : vector<128x32xf32> to vector<128x32xbf16>
    %c0_164 = arith.constant 0 : index
    %c0_165 = arith.constant 0 : index
    %771 = vector.load %arg8[%c0_164, %c0_165] : memref<32x128xbf16, #tpu.memory_space<vmem>>, vector<32x128xbf16>
    %cst_166 = arith.constant dense<0.000000e+00> : vector<128x128xf32>
    %772 = tpu.matmul %770, %771, %cst_166 {dimension_numbers = #tpu.dot_dimension_numbers<[1], [0], [0], [1], [0, 0, 1, 1], [], []>} : vector<128x32xbf16>, vector<32x128xbf16>, vector<128x128xf32> -> vector<128x128xf32>
    %c0_167 = arith.constant 0 : index
    %c0_168 = arith.constant 0 : index
    %773 = vector.load %arg9[%c0_167, %c0_168] : memref<1x128xf32, #tpu.memory_space<vmem>>, vector<1x128xf32>
    %774 = vector.broadcast %773 : vector<1x128xf32> to vector<128x128xf32>
    %775 = arith.addf %772, %774 : vector<128x128xf32>
    %c0_169 = arith.constant 0 : index
    %c0_170 = arith.constant 0 : index
    %776 = vector.load %arg10[%c0_169, %c0_170] : memref<128x128xf32, #tpu.memory_space<vmem>>, vector<128x128xf32>
    tpu.vector_store %arg10[%c0_169, %c0_170], %775 {strides = array<i32>} : memref<128x128xf32, #tpu.memory_space<vmem>>, vector<128x128xf32>,
    return
  }
  func.func @transform_0(%arg0: i32) -> (i32, i32) {
    %c0_i32 = arith.constant 0 : i32
    %c0_i32_0 = arith.constant 0 : i32
    %c0_i32_1 = arith.constant 0 : i32
    return %c0_i32, %c0_i32_0 : i32, i32
  }
  func.func @transform_1(%arg0: i32) -> (i32, i32) {
    %c0_i32 = arith.constant 0 : i32
    %c0_i32_0 = arith.constant 0 : i32
    %c0_i32_1 = arith.constant 0 : i32
    return %c0_i32, %c0_i32_0 : i32, i32
  }
  func.func @transform_2(%arg0: i32) -> (i32, i32) {
    %c0_i32 = arith.constant 0 : i32
    %c0_i32_0 = arith.constant 0 : i32
    %c0_i32_1 = arith.constant 0 : i32
    return %c0_i32, %c0_i32_0 : i32, i32
  }
  func.func @transform_3(%arg0: i32) -> (i32, i32) {
    %c0_i32 = arith.constant 0 : i32
    %c0_i32_0 = arith.constant 0 : i32
    %c0_i32_1 = arith.constant 0 : i32
    return %c0_i32, %c0_i32_0 : i32, i32
  }
  func.func @transform_4(%arg0: i32) -> (i32, i32) {
    %c0_i32 = arith.constant 0 : i32
    %c0_i32_0 = arith.constant 0 : i32
    %c0_i32_1 = arith.constant 0 : i32
    return %c0_i32, %c0_i32_0 : i32, i32
  }
  func.func @transform_5(%arg0: i32) -> (i32, i32) {
    %c0_i32 = arith.constant 0 : i32
    %c0_i32_0 = arith.constant 0 : i32
    %c0_i32_1 = arith.constant 0 : i32
    return %c0_i32, %c0_i32_0 : i32, i32
  }
  func.func @transform_6(%arg0: i32) -> (i32, i32) {
    %c0_i32 = arith.constant 0 : i32
    %c0_i32_0 = arith.constant 0 : i32
    %c0_i32_1 = arith.constant 0 : i32
    return %c0_i32, %c0_i32_0 : i32, i32
  }
  func.func @transform_7(%arg0: i32) -> (i32, i32) {
    %c0_i32 = arith.constant 0 : i32
    %c0_i32_0 = arith.constant 0 : i32
    %c0_i32_1 = arith.constant 0 : i32
    return %c0_i32, %c0_i32_0 : i32, i32
  }
  func.func @transform_8(%arg0: i32) -> (i32, i32) {
    %c0_i32 = arith.constant 0 : i32
    %c0_i32_0 = arith.constant 0 : i32
    %c0_i32_1 = arith.constant 0 : i32
    return %c0_i32, %c0_i32_0 : i32, i32
  }
  func.func @transform_9(%arg0: i32) -> (i32, i32) {
    %c0_i32 = arith.constant 0 : i32
    %c0_i32_0 = arith.constant 0 : i32
    %c0_i32_1 = arith.constant 0 : i32
    return %c0_i32, %c0_i32_0 : i32, i32
  }
}

</mosaic_0001>

<bundles_post_ra>
// kernel: tpu_custom_call.1
= control target key start
LH: loop header
LB: loop body
LE: loop exit
PB: predicated region body
PF: predicated region fallthrough
CT: control target
= control target key end

     0   :  { %vm105_vm0 = vcmask 130048   ;;  %v3831_v4 = vmov 0.0   ;;  %s3832_s28 = smov 64   ;;  %vm3833_vm1 = vmmov 0   ;;  %s4719_s0 = inlined_call_operand.vmem [shape: bf16[128,16], index: 0, kind: input, shape index: {}]   ;;  %s4720_s1 = inlined_call_operand.vmem [shape: bf16[16,96], index: 1, kind: input, shape index: {}]   ;;  %s4721_s2 = inlined_call_operand.vmem [shape: bf16[32,96], index: 2, kind: input, shape index: {}]   ;;  %s4722_s3 = inlined_call_operand.vmem [shape: f32[1,96], index: 3, kind: input, shape index: {}]   ;;  %s4723_s4 = inlined_call_operand.vmem [shape: f32[1,32], index: 4, kind: input, shape index: {}]   ;;  %s4724_s5 = inlined_call_operand.vmem [shape: bf16[64,128], index: 5, kind: input, shape index: {}]   ;;  %s4725_s6 = inlined_call_operand.vmem [shape: f32[1,128], index: 6, kind: input, shape index: {}]   ;;  %s4726_s7 = inlined_call_operand.vmem [shape: bf16[32,128], index: 7, kind: input, shape index: {}]   ;;  %s4727_s8 = inlined_call_operand.vmem [shape: f32[1,128], index: 8, kind: input, shape index: {}]   ;;  %s4728_s9 = inlined_call_operand.hbm [shape: f32[128,128], index: 9, kind: output, shape index: {}]  }
   0x1   :  { %v3586_v0 = vld [vmem:[%s4720_s1] sm:$0xff]   ;;  %v3588_v2 = vld [vmem:[%s4719_s0 + $0x28] sm:$0xff]   ;;  %v3592_v7 = vld [vmem:[%s4719_s0 + $0x30] sm:$0xff]  }
   0x2   :  { %v3587_v1 = vld [vmem:[%s4719_s0 + $0x20] sm:$0xff]   ;;  %3575 = vmatprep.subr.bf16.mxu1 %v3586_v0  ;;  %3217 = vmatprep.subr.bf16.mxu0 %v3586_v0  ;;  %v3903_v3 = vld [vmem:[%s4721_s2 + $0x8] sm:$0xff]   ;;  %v3593_v9 = vld [vmem:[%s4719_s0 + $0x38] sm:$0xff]  }
   0x3   :  { %3576 = vmatpush3.bf16.msra.mxu1 %v3586_v0  ;;  %3227 = vmatprep.mubr.msk.bf16.mxu1 %vm105_vm0, %v3587_v1  ;;  %v3590_v5 = vld [vmem:[%s4719_s0] sm:$0xff]   ;;  %v3591_v6 = vld [vmem:[%s4719_s0 + $0x8] sm:$0xff]  }
   0x4   :  { %3235 = vmatprep.subr.bf16.mxu1 %v3831_v4  ;;  %3218 = vmatpush3.bf16.msra.mxu0 %v3586_v0  ;;  %v3925_v8 = vld [vmem:[%s4721_s2] sm:$0xff]  }
   0x5   :  { %3263 = vmatprep.subr.bf16.mxu0 %v3831_v4  ;;  %3219 = vmatprep.mubr.msk.bf16.mxu0 %vm105_vm0, %v3590_v5  ;;  %v2988_v10 = vld [vmem:[%s4723_s4] ss:$0 sm:$0xff] }
   0x6   :  { %3228 = vmatmul.mubr.msk.bf16.vlgmr.msra.gmra.mxu1 %vm105_vm0, %v3588_v2  ;;  %327 = vrot.lane.b32.xlu0 %v2988_v10, %s3832_s28 }
   0x7   :  { %3236 = vmatpush3.bf16.msra.mxu1 %v3903_v3  ;;  %3220 = vmatmul.mubr.msk.bf16.vlgmr.msra.gmra.mxu0 %vm105_vm0, %v3591_v6 }
   0x8   :  { %3231 = vmatprep.mubr.msk.bf16.mxu1 %vm105_vm0, %v3592_v7  ;;  %3237 = vmatprep.subr.bf16.mxu1 %v3831_v4 }
   0xb   :  { %3238 = vmatpush3.bf16.msra.mxu1 %v3925_v8 }
   0xc   :  { %3243 = vmatprep.subr.bf16.mxu1 %v3831_v4 }
   0xe   :  { %3232 = vmatmul.mubr.msk.bf16.gmra.mxu1 %vm105_vm0, %v3593_v9 }
   0xf   :  { %3239 = vmatprep.mubr.msk.bf16.mxu1 %vm3833_vm1, %v3831_v4 }
  0x10   :  { %14 = vsyncpa [#allocation5], 0  ;;  %v3834_v11 = vmov 0   ;;  %v3944_v12 = vld [vmem:[%s4722_s3] ss:$0 sm:$0xff]  ;;  %vm227_vm2 = vcmask 785408  }
  0x11   :  { %v3978_v53 = vld [vmem:[%s4724_s5 + $0x18] sm:$0xff]   ;;  %v3984_v54 = vld [vmem:[%s4724_s5 + $0x10] sm:$0xff]   ;;  %v3993_v56 = vld [vmem:[%s4724_s5 + $0x8] sm:$0xff]   ;;  %s3835_s14 = smov 96   ;;  %vm282_vm3 = vcmask 261120   ;;  %vm386_vm4 = vcmask 523264  }
  0x12   :  { %3264 = vmatpush3.bf16.msra.mxu0 %v3978_v53  ;;  %v4006_v57 = vld [vmem:[%s4724_s5] sm:$0xff]   ;;  %s3836_s18 = smov 32  }
  0x13   :  { %3265 = vmatprep.subr.bf16.mxu0 %v3831_v4 }
  0x16   :  { %3240 = vmatmul.mubr.bf16.vlgmr.msra.gmra.mxu1 %v3834_v11  ;;  %3266 = vmatpush3.bf16.msra.mxu0 %v3984_v54 }
  0x17   :  { %3251 = vmatprep.mubr.msk.bf16.mxu1 %vm3833_vm1, %v3831_v4  ;;  %3244 = vmatpush3.bf16.msra.mxu1 %v3978_v53 }
  0x18   :  { %3245 = vmatprep.subr.bf16.mxu1 %v3831_v4  ;;  %3267 = vmatprep.subr.bf16.mxu0 %v3831_v4 }
  0x1a   :  { %3268 = vmatpush3.bf16.msra.mxu0 %v3993_v56 }
  0x1b   :  { %3246 = vmatpush3.bf16.msra.mxu1 %v3984_v54  ;;  %3269 = vmatprep.subr.bf16.mxu0 %v3831_v4 }
  0x1c   :  { %3247 = vmatprep.subr.bf16.mxu1 %v3831_v4 }
  0x1e   :  { %3270 = vmatpush3.bf16.msra.mxu0 %v4006_v57 }
  0x1f   :  { %3248 = vmatpush3.bf16.msra.mxu1 %v3993_v56  ;;  %3283 = vmatprep.subr.bf16.mxu0 %v3831_v4 }
  0x20   :  { %3249 = vmatprep.subr.bf16.mxu1 %v3831_v4 }
  0x23   :  { %3250 = vmatpush3.bf16.msra.mxu1 %v4006_v57 }
  0x24   :  { %3255 = vmatprep.subr.bf16.mxu1 %v3831_v4 }
  0x78   :  { %v3967_v36 = vpop.permute.xlu0 %327 }
  0xc6   :  { %v3229_v13 = vpop.f32.mrf.mxu1 }
  0xc7   :  { %v205_v14 = vadd.f32 %v3229_v13, %v3944_v12  ;;  %v3221_v15 = vpop.f32.mrf.mxu0 }
  0xc8   :  { %v196_v16 = vpop.f32.mrf.mxu1  ;;  %v173_v17 = vadd.f32 %v3221_v15, %v3944_v12 }
  0xc9   :  { %238 = vst.msk [vmem:[#allocation2 + $0x50] sm:$0xff] %vm227_vm2, %v205_v14  ;;  %v197_v18 = vadd.f32 %v3944_v12, %v196_v16  ;;  %v164_v19 = vpop.f32.mrf.mxu0 }
  0xca   :  { %v3230_v20 = vpop.f32.mrf.mxu1  ;;  %230 = vst.msk [vmem:[#allocation2 + $0x10] sm:$0xff] %vm227_vm2, %v173_v17  ;;  %v165_v21 = vadd.f32 %v3944_v12, %v164_v19 }
  0xcb   :  { %236 = vst.msk [vmem:[#allocation2 + $0x40] sm:$0xff] %vm227_vm2, %v197_v18  ;;  %v208_v22 = vadd.f32 %v3230_v20, %v3944_v12  ;;  %v3222_v23 = vpop.f32.mrf.mxu0 }
  0xcc   :  { %v199_v24 = vpop.f32.mrf.mxu1  ;;  %228 = vst.msk [vmem:[#allocation2] sm:$0xff] %vm227_vm2, %v165_v21  ;;  %v176_v25 = vadd.f32 %v3222_v23, %v3944_v12 }
  0xcd   :  { %239 = vst.msk [vmem:[#allocation2 + $0x58] sm:$0xff] %vm227_vm2, %v208_v22  ;;  %v200_v26 = vadd.f32 %v3944_v12, %v199_v24  ;;  %v167_v27 = vpop.f32.mrf.mxu0 }
  0xce   :  { %v3233_v28 = vpop.f32.mrf.mxu1  ;;  %231 = vst.msk [vmem:[#allocation2 + $0x18] sm:$0xff] %vm227_vm2, %v176_v25  ;;  %v168_v29 = vadd.f32 %v3944_v12, %v167_v27 }
  0xcf   :  { %237 = vst.msk [vmem:[#allocation2 + $0x48] sm:$0xff] %vm227_vm2, %v200_v26  ;;  %v221_v30 = vadd.f32 %v3233_v28, %v3944_v12 }
  0xd0   :  { %v212_v31 = vpop.f32.mrf.mxu1  ;;  %229 = vst.msk [vmem:[#allocation2 + $0x8] sm:$0xff] %vm227_vm2, %v168_v29 }
  0xd1   :  { %242 = vst.msk [vmem:[#allocation2 + $0x70] sm:$0xff] %vm227_vm2, %v221_v30  ;;  %v213_v32 = vadd.f32 %v3944_v12, %v212_v31 }
  0xd2   :  { %v3234_v33 = vpop.f32.mrf.mxu1 }
  0xd3   :  { %240 = vst.msk [vmem:[#allocation2 + $0x60] sm:$0xff] %vm227_vm2, %v213_v32  ;;  %v224_v34 = vadd.f32 %v3234_v33, %v3944_v12  ;;  %v269_v43 = vld [vmem:[#allocation2] sm:$0xff] }
  0xd4   :  { %v215_v35 = vpop.f32.mrf.mxu1 }
  0xd5   :  { %243 = vst.msk [vmem:[#allocation2 + $0x78] sm:$0xff] %vm227_vm2, %v224_v34  ;;  %v216_v37 = vadd.f32 %v3944_v12, %v215_v35 }
  0xd6   :  { %v320_v38 = vpop.f32.mrf.mxu1 }
  0xd7   :  { %241 = vst.msk [vmem:[#allocation2 + $0x68] sm:$0xff] %vm227_vm2, %v216_v37  ;;  %v330_v39 = vadd.f32 %v3967_v36, %v320_v38  ;;  %v326_v44 = vadd.f32 %v320_v38, %v269_v43  ;;  %v460_v17 = vld [vmem:[#allocation2 + $0x8] sm:$0xff]  ;;  %v4045_v38 = vld [vmem:[%s4725_s6] ss:$0 sm:$0xff] }
  0xd8   :  { %v3241_v40 = vpop.f32.mrf.mxu1 }
  0xd9   :  { %338 = vrot.lane.b32.xlu0 %v330_v39, %s3832_s28  ;;  %v2992_v45 = vmul.f32 -1.442695, %v326_v44 }
  0xda   :  { %v323_v41 = vpop.f32.mrf.mxu1 }
  0xdb   :  { %3603 = vpow2.f32 %v2992_v45 }
  0xdc   :  { %v3242_v42 = vpop.f32.mrf.mxu1 }
  0xe8   :  { %v3604_v46 = vpop.eup %3603 }
  0xe9   :  { %v334_v47 = vadd.f32 1.0, %v3604_v46 }
  0xeb   :  { %3605 = vrcp.f32 %v334_v47 }
  0xf8   :  { %v3606_v48 = vpop.eup %3605 }
  0xf9   :  { %v348_v58 = vsub.f32 1.0, %v3606_v48  ;;  %v354_v60 = vmul.f32 0.0, %v3606_v48 }
 0x14b   :  { %v339_v49 = vpop.permute.xlu0 %338 }
 0x14c   :  { %v341_v50 = vmul.f32 %v3606_v48, %v339_v49 }
 0x14e   :  { %343 = vrot.lane.b32.xlu1 %v341_v50, %s3832_s28 }
 0x1c0   :  { %v344_v51 = vpop.permute.xlu1 %343 }
 0x1c1   :  { %v346_v52 = vadd.f32 %v344_v51, %v269_v43  ;;  %v614_v43 = vld [vmem:[#allocation2 + $0x10] sm:$0xff] }
 0x1c3   :  { %3607 = vtanh.f32 %v346_v52 }
 0x1d0   :  { %v3608_v55 = vpop.eup %3607 }
 0x1d1   :  { %350 = vrot.lane.b32.xlu1 %v3608_v55, %s3835_s14 }
 0x243   :  { %v351_v59 = vpop.permute.xlu1 %350 }
 0x244   :  { %v353_v61 = vmul.f32 %v351_v59, %v348_v58 }
 0x246   :  { %v355_v62 = vadd.f32 %v354_v60, %v353_v61 }
 0x248   :  { %357 = vrot.lane.b32.xlu0 %v355_v62, %s3835_s14  ;;  %v461_v63 = vpack.c.bf16 %v355_v62, %v355_v62 }
 0x24a   :  { %463 = vrot.lane.b32.xlu1 %v461_v63, %s3835_s14 }
 0x2ba   :  { %v358_v0 = vpop.permute.xlu0 %357 }
 0x2bb   :  { %v360_v1 = vsel %vm282_vm3, %v358_v0, 0.0 }
 0x2bc   :  { %v361_v2 = vpack.c.bf16 %v360_v1, %v360_v1  ;;  %v464_v5 = vpop.permute.xlu1 %463  ;;  %v3599_v1 = vld [vmem:[%s4719_s0 + $0x10] sm:$0xff]  }
 0x2bd   :  { %3223 = vmatprep.mubr.msk.bf16.mxu0 %vm105_vm0, %v3599_v1 }
 0x2be   :  { %3252 = vmatmul.mubr.msk.bf16.vlgmr.msra.gmra.mxu1 %vm386_vm4, %v361_v2  ;;  %v3600_v2 = vld [vmem:[%s4719_s0 + $0x18] sm:$0xff]  }
 0x2bf   :  { %3256 = vmatpush3.bf16.msra.mxu1 %v3903_v3  ;;  %3259 = vmatprep.mubr.msk.bf16.mxu1 %vm3833_vm1, %v3831_v4 }
 0x2c0   :  { %3257 = vmatprep.subr.bf16.mxu1 %v3831_v4  ;;  %3224 = vmatmul.mubr.msk.bf16.gmra.mxu0 %vm105_vm0, %v3600_v2 }
 0x2c1   :  { %3271 = vmatprep.mubr.msk.bf16.mxu0 %vm3833_vm1, %v3831_v4 }
 0x2c3   :  { %3258 = vmatpush3.bf16.msra.mxu1 %v3925_v8 }
 0x2c4   :  { %3275 = vmatprep.subr.bf16.mxu1 %v3831_v4 }
 0x2c6   :  { %3260 = vmatmul.mubr.msk.bf16.vlgmr.msra.gmra.mxu1 %vm282_vm3, %v464_v5 }
 0x2c7   :  { %3276 = vmatpush3.bf16.msra.mxu1 %v3903_v3  ;;  %3279 = vmatprep.mubr.msk.bf16.mxu1 %vm3833_vm1, %v3831_v4 }
 0x2c8   :  { %3277 = vmatprep.subr.bf16.mxu1 %v3831_v4 }
 0x2cb   :  { %3278 = vmatpush3.bf16.msra.mxu1 %v3925_v8 }
 0x2cc   :  { %3295 = vmatprep.subr.bf16.mxu1 %v3831_v4 }
 0x37e   :  { %v424_v6 = vpop.f32.mrf.mxu1 }
 0x37f   :  { %v425_v41 = vadd.f32 %v4045_v38, %v424_v6 }
 0x380   :  { %v3253_v7 = vpop.f32.mrf.mxu1 }
 0x381   :  { %v2998_v46 = vmul.f32 -1.442695, %v425_v41 }
 0x382   :  { %v427_v9 = vpop.f32.mrf.mxu1 }
 0x384   :  { %v3254_v10 = vpop.f32.mrf.mxu1 }
 0x386   :  { %v502_v11 = vpop.f32.mrf.mxu1 }
 0x387   :  { %v509_v13 = vadd.f32 %v502_v11, %v3967_v36  ;;  %v508_v18 = vadd.f32 %v502_v11, %v460_v17 }
 0x388   :  { %v3261_v14 = vpop.f32.mrf.mxu1 }
 0x389   :  { %517 = vrot.lane.b32.xlu0 %v509_v13, %s3832_s28  ;;  %v3000_v19 = vmul.f32 -1.442695, %v508_v18 }
 0x38a   :  { %v505_v15 = vpop.f32.mrf.mxu1 }
 0x38b   :  { %3609 = vpow2.f32 %v3000_v19  ;;  %v3225_v15 = vpop.f32.mrf.mxu0 }
 0x38c   :  { %v3262_v16 = vpop.f32.mrf.mxu1 }
 0x38d   :  { %v189_v16 = vadd.f32 %v3225_v15, %v3944_v12 }
 0x38f   :  { %234 = vst.msk [vmem:[#allocation2 + $0x30] sm:$0xff] %vm227_vm2, %v189_v16 }
 0x398   :  { %v3610_v20 = vpop.eup %3609 }
 0x399   :  { %v513_v21 = vadd.f32 1.0, %v3610_v20 }
 0x39b   :  { %3611 = vrcp.f32 %v513_v21 }
 0x3a8   :  { %v3612_v22 = vpop.eup %3611 }
 0x3a9   :  { %v527_v28 = vsub.f32 1.0, %v3612_v22  ;;  %v533_v30 = vmul.f32 %v3612_v22, %v355_v62 }
 0x3fb   :  { %v518_v23 = vpop.permute.xlu0 %517 }
 0x3fc   :  { %v520_v24 = vmul.f32 %v3612_v22, %v518_v23 }
 0x3fe   :  { %522 = vrot.lane.b32.xlu1 %v520_v24, %s3832_s28 }
 0x470   :  { %v523_v25 = vpop.permute.xlu1 %522 }
 0x471   :  { %v525_v26 = vadd.f32 %v523_v25, %v460_v17 }
 0x473   :  { %3613 = vtanh.f32 %v525_v26  ;;  %v180_v26 = vpop.f32.mrf.mxu0 }
 0x480   :  { %v3614_v27 = vpop.eup %3613 }
 0x481   :  { %529 = vrot.lane.b32.xlu0 %v3614_v27, %s3835_s14  ;;  %v3226_v27 = vpop.f32.mrf.mxu0 }
 0x4f3   :  { %v530_v29 = vpop.permute.xlu0 %529 }
 0x4f4   :  { %v532_v31 = vmul.f32 %v530_v29, %v527_v28  ;;  %v183_v28 = vpop.f32.mrf.mxu0  ;;  %v181_v29 = vadd.f32 %v3944_v12, %v180_v26 }
 0x4f6   :  { %v534_v32 = vadd.f32 %v533_v30, %v532_v31  ;;  %v192_v30 = vadd.f32 %v3226_v27, %v3944_v12  ;;  %v184_v31 = vadd.f32 %v3944_v12, %v183_v28  ;;  %232 = vst.msk [vmem:[#allocation2 + $0x20] sm:$0xff] %vm227_vm2, %v181_v29 }
 0x4f8   :  { %v615_v33 = vpack.c.bf16 %v534_v32, %v534_v32  ;;  %235 = vst.msk [vmem:[#allocation2 + $0x38] sm:$0xff] %vm227_vm2, %v192_v30  ;;  %233 = vst.msk [vmem:[#allocation2 + $0x28] sm:$0xff] %vm227_vm2, %v184_v31 }
 0x4fa   :  { %617 = vrot.lane.b32.xlu1 %v615_v33, %s3835_s14 }
 0x56c   :  { %v618_v34 = vpop.permute.xlu1 %617 }
 0x56d   :  { %3280 = vmatmul.mubr.msk.bf16.vlgmr.msra.gmra.mxu1 %vm282_vm3, %v618_v34 }
 0x56e   :  { %3296 = vmatpush3.bf16.msra.mxu1 %v3903_v3  ;;  %3299 = vmatprep.mubr.msk.bf16.mxu1 %vm3833_vm1, %v3831_v4 }
 0x56f   :  { %3297 = vmatprep.subr.bf16.mxu1 %v3831_v4 }
 0x572   :  { %3298 = vmatpush3.bf16.msra.mxu1 %v3925_v8 }
 0x573   :  { %3303 = vmatprep.subr.bf16.mxu1 %v3831_v4 }
 0x62d   :  { %v656_v35 = vpop.f32.mrf.mxu1 }
 0x62e   :  { %v663_v37 = vadd.f32 %v656_v35, %v3967_v36  ;;  %v662_v44 = vadd.f32 %v656_v35, %v614_v43 }
 0x62f   :  { %v3281_v39 = vpop.f32.mrf.mxu1 }
 0x630   :  { %671 = vrot.lane.b32.xlu0 %v663_v37, %s3832_s28  ;;  %v3004_v45 = vmul.f32 -1.442695, %v662_v44 }
 0x631   :  { %v659_v40 = vpop.f32.mrf.mxu1 }
 0x632   :  { %3615 = vpow2.f32 %v3004_v45 }
 0x633   :  { %v3282_v42 = vpop.f32.mrf.mxu1  ;;  %3617 = vpow2.f32 %v2998_v46 }
 0x634   :  { %437 = vrot.lane.b32.xlu0 %v425_v41, %s3836_s18 }
 0x63f   :  { %v3616_v47 = vpop.eup %3615 }
 0x640   :  { %v667_v48 = vadd.f32 1.0, %v3616_v47  ;;  %v3618_v49 = vpop.eup %3617 }
 0x641   :  { %v433_v50 = vadd.f32 1.0, %v3618_v49 }
 0x642   :  { %3619 = vrcp.f32 %v667_v48 }
 0x643   :  { %3621 = vrcp.f32 %v433_v50 }
 0x64f   :  { %v3620_v51 = vpop.eup %3619 }
 0x650   :  { %v3622_v58 = vpop.eup %3621  ;;  %v681_v7 = vsub.f32 1.0, %v3620_v51  ;;  %v687_v10 = vmul.f32 %v3620_v51, %v534_v32 }
 0x651   :  { %v447_v18 = vsub.f32 1.0, %v3622_v58  ;;  %v453_v21 = vmul.f32 0.0, %v3622_v58 }
 0x6a2   :  { %v672_v52 = vpop.permute.xlu0 %671 }
 0x6a3   :  { %v674_v55 = vmul.f32 %v3620_v51, %v672_v52 }
 0x6a5   :  { %676 = vrot.lane.b32.xlu1 %v674_v55, %s3832_s28 }
 0x6a6   :  { %v438_v59 = vpop.permute.xlu0 %437 }
 0x6a7   :  { %v440_v60 = vmul.f32 %v3622_v58, %v438_v59 }
 0x6a9   :  { %442 = vrot.lane.b32.xlu0 %v440_v60, %s3832_s28 }
 0x717   :  { %v677_v61 = vpop.permute.xlu1 %676 }
 0x718   :  { %v679_v62 = vadd.f32 %v677_v61, %v614_v43  ;;  %v768_v43 = vld [vmem:[#allocation2 + $0x18] sm:$0xff] }
 0x71a   :  { %3623 = vtanh.f32 %v679_v62 }
 0x71b   :  { %v443_v63 = vpop.permute.xlu0 %442 }
 0x71c   :  { %v445_v0 = vadd.f32 %v443_v63, %v425_v41 }
 0x71e   :  { %3625 = vtanh.f32 %v445_v0 }
 0x727   :  { %v3624_v5 = vpop.eup %3623 }
 0x728   :  { %683 = vrot.lane.b32.xlu1 %v3624_v5, %s3835_s14 }
 0x72b   :  { %v3626_v6 = vpop.eup %3625 }
 0x72c   :  { %449 = vrot.lane.b32.xlu0 %v3626_v6, %s3835_s14 }
 0x79a   :  { %v684_v9 = vpop.permute.xlu1 %683 }
 0x79b   :  { %v686_v11 = vmul.f32 %v684_v9, %v681_v7 }
 0x79d   :  { %v4064_v13 = vadd.f32 %v687_v10, %v686_v11 }
 0x79e   :  { %v450_v17 = vpop.permute.xlu0 %449 }
 0x79f   :  { %v769_v14 = vpack.c.bf16 %v4064_v13, %v4064_v13  ;;  %v452_v19 = vmul.f32 %v450_v17, %v447_v18 }
 0x7a1   :  { %771 = vrot.lane.b32.xlu1 %v769_v14, %s3835_s14  ;;  %v4076_v22 = vadd.f32 %v453_v21, %v452_v19 }
 0x7a5   :  { %536 = vrot.lane.b32.xlu1 %v534_v32, %s3835_s14 }
 0x813   :  { %v772_v20 = vpop.permute.xlu1 %771 }
 0x814   :  { %3300 = vmatmul.mubr.msk.bf16.vlgmr.msra.gmra.mxu1 %vm282_vm3, %v772_v20 }
 0x815   :  { %3304 = vmatpush3.bf16.msra.mxu1 %v3978_v53  ;;  %3311 = vmatprep.mubr.msk.bf16.mxu1 %vm3833_vm1, %v3831_v4 }
 0x816   :  { %3305 = vmatprep.subr.bf16.mxu1 %v3831_v4 }
 0x817   :  { %v537_v23 = vpop.permute.xlu1 %536 }
 0x818   :  { %v539_v24 = vsel %vm282_vm3, %v537_v23, %v4076_v22 }
 0x819   :  { %v540_v25 = vpack.c.bf16 %v539_v24, %v539_v24  ;;  %3306 = vmatpush3.bf16.msra.mxu1 %v3984_v54 }
 0x81a   :  { %3307 = vmatprep.subr.bf16.mxu1 %v3831_v4 }
 0x81b   :  { %3272 = vmatmul.mubr.msk.bf16.vlgmr.msra.gmra.mxu0 %vm386_vm4, %v540_v25 }
 0x81c   :  { %3284 = vmatpush3.bf16.msra.mxu0 %v3978_v53  ;;  %3291 = vmatprep.mubr.msk.bf16.mxu0 %vm3833_vm1, %v3831_v4 }
 0x81d   :  { %3285 = vmatprep.subr.bf16.mxu0 %v3831_v4  ;;  %3308 = vmatpush3.bf16.msra.mxu1 %v3993_v56 }
 0x81e   :  { %3309 = vmatprep.subr.bf16.mxu1 %v3831_v4 }
 0x820   :  { %3286 = vmatpush3.bf16.msra.mxu0 %v3984_v54 }
 0x821   :  { %3287 = vmatprep.subr.bf16.mxu0 %v3831_v4  ;;  %3310 = vmatpush3.bf16.msra.mxu1 %v4006_v57 }
 0x822   :  { %3335 = vmatprep.subr.bf16.mxu1 %v3831_v4 }
 0x824   :  { %3288 = vmatpush3.bf16.msra.mxu0 %v3993_v56 }
 0x825   :  { %3289 = vmatprep.subr.bf16.mxu0 %v3831_v4 }
 0x828   :  { %3290 = vmatpush3.bf16.msra.mxu0 %v4006_v57 }
 0x829   :  { %3315 = vmatprep.subr.bf16.mxu0 %v3831_v4 }
 0x8d4   :  { %v810_v32 = vpop.f32.mrf.mxu1 }
 0x8d5   :  { %v817_v33 = vadd.f32 %v810_v32, %v3967_v36  ;;  %v816_v44 = vadd.f32 %v810_v32, %v768_v43 }
 0x8d6   :  { %v3301_v34 = vpop.f32.mrf.mxu1 }
 0x8d7   :  { %825 = vrot.lane.b32.xlu0 %v817_v33, %s3832_s28  ;;  %v3008_v45 = vmul.f32 -1.442695, %v816_v44 }
 0x8d8   :  { %v813_v35 = vpop.f32.mrf.mxu1 }
 0x8d9   :  { %3627 = vpow2.f32 %v3008_v45 }
 0x8da   :  { %v3302_v37 = vpop.f32.mrf.mxu1 }
 0x8db   :  { %v578_v39 = vpop.f32.mrf.mxu0 }
 0x8dc   :  { %v579_v40 = vadd.f32 %v4045_v38, %v578_v39 }
 0x8dd   :  { %v3273_v41 = vpop.f32.mrf.mxu0 }
 0x8de   :  { %591 = vrot.lane.b32.xlu1 %v579_v40, %s3836_s18  ;;  %v3002_v46 = vmul.f32 -1.442695, %v579_v40  ;;  %v922_v41 = vld [vmem:[#allocation2 + $0x20] sm:$0xff] }
 0x8df   :  { %v581_v12 = vpop.f32.mrf.mxu0 }
 0x8e0   :  { %3629 = vpow2.f32 %v3002_v46 }
 0x8e1   :  { %v3274_v42 = vpop.f32.mrf.mxu0 }
 0x8e6   :  { %v3628_v47 = vpop.eup %3627 }
 0x8e7   :  { %v821_v48 = vadd.f32 1.0, %v3628_v47 }
 0x8e9   :  { %3631 = vrcp.f32 %v821_v48 }
 0x8ed   :  { %v3630_v49 = vpop.eup %3629 }
 0x8ee   :  { %v587_v50 = vadd.f32 1.0, %v3630_v49 }
 0x8f0   :  { %3633 = vrcp.f32 %v587_v50 }
 0x8f6   :  { %v3632_v51 = vpop.eup %3631 }
 0x8f7   :  { %v835_v5 = vsub.f32 1.0, %v3632_v51  ;;  %v841_v7 = vmul.f32 %v3632_v51, %v4064_v13 }
 0x8fd   :  { %v3634_v58 = vpop.eup %3633 }
 0x8fe   :  { %v601_v14 = vsub.f32 1.0, %v3634_v58  ;;  %v607_v16 = vmul.f32 %v3634_v58, %v4076_v22 }
 0x949   :  { %v826_v52 = vpop.permute.xlu0 %825 }
 0x94a   :  { %v828_v55 = vmul.f32 %v3632_v51, %v826_v52 }
 0x94c   :  { %830 = vrot.lane.b32.xlu0 %v828_v55, %s3832_s28 }
 0x950   :  { %v592_v59 = vpop.permute.xlu1 %591 }
 0x951   :  { %v594_v60 = vmul.f32 %v3634_v58, %v592_v59 }
 0x953   :  { %596 = vrot.lane.b32.xlu1 %v594_v60, %s3832_s28 }
 0x9be   :  { %v831_v61 = vpop.permute.xlu0 %830 }
 0x9bf   :  { %v833_v62 = vadd.f32 %v831_v61, %v768_v43 }
 0x9c1   :  { %3635 = vtanh.f32 %v833_v62 }
 0x9c5   :  { %v597_v63 = vpop.permute.xlu1 %596 }
 0x9c6   :  { %v599_v0 = vadd.f32 %v597_v63, %v579_v40 }
 0x9c8   :  { %3637 = vtanh.f32 %v599_v0 }
 0x9ce   :  { %v3636_v1 = vpop.eup %3635 }
 0x9cf   :  { %837 = vrot.lane.b32.xlu0 %v3636_v1, %s3835_s14 }
 0x9d3   :  { %690 = vrot.lane.b32.xlu0 %v4064_v13, %s3835_s14 }
 0x9d5   :  { %v3638_v2 = vpop.eup %3637 }
 0x9d6   :  { %603 = vrot.lane.b32.xlu1 %v3638_v2, %s3835_s14 }
 0xa41   :  { %v838_v6 = vpop.permute.xlu0 %837 }
 0xa42   :  { %v840_v9 = vmul.f32 %v838_v6, %v835_v5 }
 0xa44   :  { %v4115_v10 = vadd.f32 %v841_v7, %v840_v9 }
 0xa45   :  { %v691_v19 = vpop.permute.xlu0 %690 }
 0xa46   :  { %v923_v11 = vpack.c.bf16 %v4115_v10, %v4115_v10 }
 0xa48   :  { %v604_v15 = vpop.permute.xlu1 %603  ;;  %925 = vrot.lane.b32.xlu1 %v923_v11, %s3835_s14 }
 0xa49   :  { %v606_v17 = vmul.f32 %v604_v15, %v601_v14 }
 0xa4b   :  { %v4121_v18 = vadd.f32 %v607_v16, %v606_v17 }
 0xa4d   :  { %v693_v20 = vsel %vm282_vm3, %v691_v19, %v4121_v18 }
 0xa4e   :  { %v694_v13 = vpack.c.bf16 %v693_v20, %v693_v20 }
 0xa50   :  { %3292 = vmatmul.mubr.msk.bf16.vlgmr.msra.gmra.mxu0 %vm386_vm4, %v694_v13 }
 0xa51   :  { %3316 = vmatpush3.bf16.msra.mxu0 %v3903_v3  ;;  %3319 = vmatprep.mubr.msk.bf16.mxu0 %vm3833_vm1, %v3831_v4 }
 0xa52   :  { %3317 = vmatprep.subr.bf16.mxu0 %v3831_v4 }
 0xa55   :  { %3318 = vmatpush3.bf16.msra.mxu0 %v3925_v8 }
 0xa56   :  { %3323 = vmatprep.subr.bf16.mxu0 %v3831_v4 }
 0xaba   :  { %v926_v21 = vpop.permute.xlu1 %925 }
 0xabb   :  { %3320 = vmatmul.mubr.msk.bf16.vlgmr.msra.gmra.mxu0 %vm282_vm3, %v926_v21 }
 0xabc   :  { %3324 = vmatpush3.bf16.msra.mxu0 %v3978_v53  ;;  %3331 = vmatprep.mubr.msk.bf16.mxu0 %vm3833_vm1, %v3831_v4 }
 0xabd   :  { %3325 = vmatprep.subr.bf16.mxu0 %v3831_v4 }
 0xac0   :  { %3326 = vmatpush3.bf16.msra.mxu0 %v3984_v54 }
 0xac1   :  { %3327 = vmatprep.subr.bf16.mxu0 %v3831_v4 }
 0xac4   :  { %3328 = vmatpush3.bf16.msra.mxu0 %v3993_v56 }
 0xac5   :  { %3329 = vmatprep.subr.bf16.mxu0 %v3831_v4 }
 0xac8   :  { %3330 = vmatpush3.bf16.msra.mxu0 %v4006_v57 }
 0xac9   :  { %3355 = vmatprep.subr.bf16.mxu0 %v3831_v4 }
 0xb10   :  { %v732_v23 = vpop.f32.mrf.mxu0 }
 0xb11   :  { %v733_v24 = vadd.f32 %v4045_v38, %v732_v23 }
 0xb12   :  { %v3293_v25 = vpop.f32.mrf.mxu0 }
 0xb13   :  { %745 = vrot.lane.b32.xlu1 %v733_v24, %s3836_s18  ;;  %v3006_v28 = vmul.f32 -1.442695, %v733_v24 }
 0xb14   :  { %v735_v26 = vpop.f32.mrf.mxu0 }
 0xb15   :  { %3639 = vpow2.f32 %v3006_v28 }
 0xb16   :  { %v3294_v27 = vpop.f32.mrf.mxu0 }
 0xb22   :  { %v3640_v29 = vpop.eup %3639 }
 0xb23   :  { %v741_v30 = vadd.f32 1.0, %v3640_v29 }
 0xb25   :  { %3641 = vrcp.f32 %v741_v30 }
 0xb32   :  { %v3642_v37 = vpop.eup %3641 }
 0xb33   :  { %v755_v59 = vsub.f32 1.0, %v3642_v37  ;;  %v761_v63 = vmul.f32 %v3642_v37, %v4121_v18 }
 0xb7b   :  { %v964_v31 = vpop.f32.mrf.mxu0 }
 0xb7c   :  { %v971_v32 = vadd.f32 %v964_v31, %v3967_v36  ;;  %v970_v12 = vadd.f32 %v964_v31, %v922_v41  ;;  %v1076_v31 = vld [vmem:[#allocation2 + $0x28] sm:$0xff] }
 0xb7d   :  { %v3321_v33 = vpop.f32.mrf.mxu0 }
 0xb7e   :  { %979 = vrot.lane.b32.xlu0 %v971_v32, %s3832_s28  ;;  %v3012_v42 = vmul.f32 -1.442695, %v970_v12 }
 0xb7f   :  { %v967_v34 = vpop.f32.mrf.mxu0 }
 0xb80   :  { %3643 = vpow2.f32 %v3012_v42 }
 0xb81   :  { %v3322_v35 = vpop.f32.mrf.mxu0 }
 0xb85   :  { %v746_v39 = vpop.permute.xlu1 %745 }
 0xb86   :  { %v748_v40 = vmul.f32 %v3642_v37, %v746_v39 }
 0xb88   :  { %750 = vrot.lane.b32.xlu1 %v748_v40, %s3832_s28 }
 0xb8d   :  { %v3644_v43 = vpop.eup %3643 }
 0xb8e   :  { %v975_v44 = vadd.f32 1.0, %v3644_v43 }
 0xb90   :  { %3645 = vrcp.f32 %v975_v44 }
 0xb9d   :  { %v3646_v45 = vpop.eup %3645 }
 0xb9e   :  { %v989_v61 = vsub.f32 1.0, %v3646_v45  ;;  %v995_v0 = vmul.f32 %v3646_v45, %v4115_v10 }
 0xbf0   :  { %v980_v46 = vpop.permute.xlu0 %979 }
 0xbf1   :  { %v982_v47 = vmul.f32 %v3646_v45, %v980_v46 }
 0xbf3   :  { %984 = vrot.lane.b32.xlu0 %v982_v47, %s3832_s28 }
 0xbfa   :  { %v751_v48 = vpop.permute.xlu1 %750 }
 0xbfb   :  { %v753_v49 = vadd.f32 %v751_v48, %v733_v24 }
 0xbfd   :  { %3647 = vtanh.f32 %v753_v49 }
 0xc0a   :  { %v3648_v50 = vpop.eup %3647 }
 0xc0b   :  { %757 = vrot.lane.b32.xlu1 %v3648_v50, %s3835_s14 }
 0xc65   :  { %v985_v51 = vpop.permute.xlu0 %984 }
 0xc66   :  { %v987_v52 = vadd.f32 %v985_v51, %v922_v41 }
 0xc68   :  { %3649 = vtanh.f32 %v987_v52 }
 0xc75   :  { %v3650_v55 = vpop.eup %3649 }
 0xc76   :  { %991 = vrot.lane.b32.xlu0 %v3650_v55, %s3835_s14 }
 0xc7a   :  { %844 = vrot.lane.b32.xlu0 %v4115_v10, %s3835_s14 }
 0xc7d   :  { %v758_v58 = vpop.permute.xlu1 %757 }
 0xc7e   :  { %v760_v60 = vmul.f32 %v758_v58, %v755_v59 }
 0xc80   :  { %v4155_v2 = vadd.f32 %v761_v63, %v760_v60 }
 0xce8   :  { %v992_v62 = vpop.permute.xlu0 %991 }
 0xce9   :  { %v994_v1 = vmul.f32 %v992_v62, %v989_v61 }
 0xceb   :  { %v4157_v5 = vadd.f32 %v995_v0, %v994_v1 }
 0xcec   :  { %v845_v6 = vpop.permute.xlu0 %844 }
 0xced   :  { %v847_v7 = vsel %vm282_vm3, %v845_v6, %v4155_v2  ;;  %v1077_v9 = vpack.c.bf16 %v4157_v5, %v4157_v5 }
 0xcee   :  { %v848_v11 = vpack.c.bf16 %v847_v7, %v847_v7 }
 0xcef   :  { %1079 = vrot.lane.b32.xlu1 %v1077_v9, %s3835_s14 }
 0xcf0   :  { %3312 = vmatmul.mubr.msk.bf16.vlgmr.msra.gmra.mxu1 %vm386_vm4, %v848_v11 }
 0xcf1   :  { %3336 = vmatpush3.bf16.msra.mxu1 %v3903_v3  ;;  %3339 = vmatprep.mubr.msk.bf16.mxu1 %vm3833_vm1, %v3831_v4 }
 0xcf2   :  { %3337 = vmatprep.subr.bf16.mxu1 %v3831_v4 }
 0xcf5   :  { %3338 = vmatpush3.bf16.msra.mxu1 %v3925_v8 }
 0xcf6   :  { %3343 = vmatprep.subr.bf16.mxu1 %v3831_v4 }
 0xd61   :  { %v1080_v10 = vpop.permute.xlu1 %1079 }
 0xd62   :  { %3340 = vmatmul.mubr.msk.bf16.vlgmr.msra.gmra.mxu1 %vm282_vm3, %v1080_v10 }
 0xd63   :  { %3344 = vmatpush3.bf16.msra.mxu1 %v3978_v53  ;;  %3351 = vmatprep.mubr.msk.bf16.mxu1 %vm3833_vm1, %v3831_v4 }
 0xd64   :  { %3345 = vmatprep.subr.bf16.mxu1 %v3831_v4 }
 0xd67   :  { %3346 = vmatpush3.bf16.msra.mxu1 %v3984_v54 }
 0xd68   :  { %3347 = vmatprep.subr.bf16.mxu1 %v3831_v4 }
 0xd6b   :  { %3348 = vmatpush3.bf16.msra.mxu1 %v3993_v56 }
 0xd6c   :  { %3349 = vmatprep.subr.bf16.mxu1 %v3831_v4 }
 0xd6f   :  { %3350 = vmatpush3.bf16.msra.mxu1 %v4006_v57 }
 0xd70   :  { %3375 = vmatprep.subr.bf16.mxu1 %v3831_v4 }
 0xdb0   :  { %v886_v14 = vpop.f32.mrf.mxu1 }
 0xdb1   :  { %v887_v15 = vadd.f32 %v4045_v38, %v886_v14 }
 0xdb2   :  { %v3313_v16 = vpop.f32.mrf.mxu1 }
 0xdb3   :  { %899 = vrot.lane.b32.xlu1 %v887_v15, %s3836_s18  ;;  %v3010_v20 = vmul.f32 -1.442695, %v887_v15 }
 0xdb4   :  { %v889_v17 = vpop.f32.mrf.mxu1 }
 0xdb5   :  { %3651 = vpow2.f32 %v3010_v20 }
 0xdb6   :  { %v3314_v19 = vpop.f32.mrf.mxu1 }
 0xdc2   :  { %v3652_v13 = vpop.eup %3651 }
 0xdc3   :  { %v895_v21 = vadd.f32 1.0, %v3652_v13 }
 0xdc5   :  { %3653 = vrcp.f32 %v895_v21  ;;  %v1230_v21 = vld [vmem:[#allocation2 + $0x30] sm:$0xff] }
 0xdd2   :  { %v3654_v26 = vpop.eup %3653 }
 0xdd3   :  { %v909_v47 = vsub.f32 1.0, %v3654_v26  ;;  %v915_v51 = vmul.f32 %v3654_v26, %v4155_v2 }
 0xe22   :  { %v1118_v23 = vpop.f32.mrf.mxu1 }
 0xe23   :  { %v1125_v24 = vadd.f32 %v1118_v23, %v3967_v36  ;;  %v1124_v32 = vadd.f32 %v1118_v23, %v1076_v31 }
 0xe24   :  { %v3341_v25 = vpop.f32.mrf.mxu1 }
 0xe25   :  { %v900_v27 = vpop.permute.xlu1 %899  ;;  %1133 = vrot.lane.b32.xlu0 %v1125_v24, %s3832_s28  ;;  %v3016_v33 = vmul.f32 -1.442695, %v1124_v32 }
 0xe26   :  { %v902_v28 = vmul.f32 %v3654_v26, %v900_v27  ;;  %v1121_v29 = vpop.f32.mrf.mxu1 }
 0xe27   :  { %3655 = vpow2.f32 %v3016_v33 }
 0xe28   :  { %904 = vrot.lane.b32.xlu1 %v902_v28, %s3832_s28  ;;  %v3342_v30 = vpop.f32.mrf.mxu1 }
 0xe34   :  { %v3656_v34 = vpop.eup %3655 }
 0xe35   :  { %v1129_v35 = vadd.f32 1.0, %v3656_v34 }
 0xe37   :  { %3657 = vrcp.f32 %v1129_v35 }
 0xe44   :  { %v3658_v37 = vpop.eup %3657 }
 0xe45   :  { %v1143_v49 = vsub.f32 1.0, %v3658_v37  ;;  %v1149_v52 = vmul.f32 %v3658_v37, %v4157_v5 }
 0xe97   :  { %v1134_v39 = vpop.permute.xlu0 %1133 }
 0xe98   :  { %v1136_v40 = vmul.f32 %v3658_v37, %v1134_v39 }
 0xe9a   :  { %v905_v41 = vpop.permute.xlu1 %904  ;;  %1138 = vrot.lane.b32.xlu0 %v1136_v40, %s3832_s28 }
 0xe9b   :  { %v907_v12 = vadd.f32 %v905_v41, %v887_v15 }
 0xe9d   :  { %3659 = vtanh.f32 %v907_v12 }
 0xeaa   :  { %v3660_v42 = vpop.eup %3659 }
 0xeab   :  { %911 = vrot.lane.b32.xlu1 %v3660_v42, %s3835_s14 }
 0xf0c   :  { %v1139_v43 = vpop.permute.xlu0 %1138 }
 0xf0d   :  { %v1141_v44 = vadd.f32 %v1139_v43, %v1076_v31 }
 0xf0f   :  { %3661 = vtanh.f32 %v1141_v44 }
 0xf1c   :  { %v3662_v45 = vpop.eup %3661 }
 0xf1d   :  { %1145 = vrot.lane.b32.xlu0 %v3662_v45, %s3835_s14  ;;  %v912_v46 = vpop.permute.xlu1 %911 }
 0xf1e   :  { %v914_v48 = vmul.f32 %v912_v46, %v909_v47 }
 0xf20   :  { %v4194_v58 = vadd.f32 %v915_v51, %v914_v48  ;;  %v4246_v51 = vld [vmem:[%s4721_s2 + $0x8] sm:$0xff]  }
 0xf21   :  { %998 = vrot.lane.b32.xlu0 %v4157_v5, %s3835_s14 }
 0xf8f   :  { %v1146_v50 = vpop.permute.xlu0 %1145 }
 0xf90   :  { %v1148_v55 = vmul.f32 %v1146_v50, %v1143_v49 }
 0xf92   :  { %v4196_v59 = vadd.f32 %v1149_v52, %v1148_v55  ;;  %v4255_v52 = vld [vmem:[%s4721_s2] sm:$0xff]  }
 0xf93   :  { %v999_v60 = vpop.permute.xlu0 %998 }
 0xf94   :  { %v1001_v61 = vsel %vm282_vm3, %v999_v60, %v4194_v58  ;;  %v1231_v62 = vpack.c.bf16 %v4196_v59, %v4196_v59 }
 0xf95   :  { %v1002_v63 = vpack.c.bf16 %v1001_v61, %v1001_v61 }
 0xf96   :  { %1233 = vrot.lane.b32.xlu1 %v1231_v62, %s3835_s14 }
 0xf97   :  { %3332 = vmatmul.mubr.msk.bf16.vlgmr.msra.gmra.mxu0 %vm386_vm4, %v1002_v63 }
 0xf98   :  { %3356 = vmatpush3.bf16.msra.mxu0 %v3903_v3  ;;  %3359 = vmatprep.mubr.msk.bf16.mxu0 %vm3833_vm1, %v3831_v4 }
 0xf99   :  { %3357 = vmatprep.subr.bf16.mxu0 %v3831_v4 }
 0xf9c   :  { %3358 = vmatpush3.bf16.msra.mxu0 %v3925_v8 }
 0xf9d   :  { %3363 = vmatprep.subr.bf16.mxu0 %v3831_v4 }
0x1008   :  { %v1234_v0 = vpop.permute.xlu1 %1233 }
0x1009   :  { %3360 = vmatmul.mubr.msk.bf16.vlgmr.msra.gmra.mxu0 %vm282_vm3, %v1234_v0 }
0x100a   :  { %3364 = vmatpush3.bf16.msra.mxu0 %v3978_v53  ;;  %3371 = vmatprep.mubr.msk.bf16.mxu0 %vm3833_vm1, %v3831_v4 }
0x100b   :  { %3365 = vmatprep.subr.bf16.mxu0 %v3831_v4 }
0x100e   :  { %3366 = vmatpush3.bf16.msra.mxu0 %v3984_v54 }
0x100f   :  { %3367 = vmatprep.subr.bf16.mxu0 %v3831_v4 }
0x1012   :  { %3368 = vmatpush3.bf16.msra.mxu0 %v3993_v56 }
0x1013   :  { %3369 = vmatprep.subr.bf16.mxu0 %v3831_v4 }
0x1016   :  { %3370 = vmatpush3.bf16.msra.mxu0 %v4006_v57 }
0x1017   :  { %3395 = vmatprep.subr.bf16.mxu0 %v3831_v4 }
0x1057   :  { %v1040_v3 = vpop.f32.mrf.mxu0 }
0x1058   :  { %v1041_v8 = vadd.f32 %v4045_v38, %v1040_v3 }
0x1059   :  { %v3333_v1 = vpop.f32.mrf.mxu0 }
0x105a   :  { %1053 = vrot.lane.b32.xlu1 %v1041_v8, %s3836_s18  ;;  %v3014_v7 = vmul.f32 -1.442695, %v1041_v8 }
0x105b   :  { %v1043_v5 = vpop.f32.mrf.mxu0 }
0x105c   :  { %3663 = vpow2.f32 %v3014_v7 }
0x105d   :  { %v3334_v6 = vpop.f32.mrf.mxu0 }
0x1069   :  { %v3664_v9 = vpop.eup %3663 }
0x106a   :  { %v1049_v11 = vadd.f32 1.0, %v3664_v9  ;;  %v1384_v9 = vld [vmem:[#allocation2 + $0x38] sm:$0xff] }
0x106c   :  { %3665 = vrcp.f32 %v1049_v11 }
0x1079   :  { %v3666_v16 = vpop.eup %3665 }
0x107a   :  { %v1063_v39 = vsub.f32 1.0, %v3666_v16  ;;  %v1069_v42 = vmul.f32 %v3666_v16, %v4194_v58 }
0x10c9   :  { %v1272_v10 = vpop.f32.mrf.mxu0 }
0x10ca   :  { %v1279_v14 = vadd.f32 %v1272_v10, %v3967_v36  ;;  %v1278_v23 = vadd.f32 %v1272_v10, %v1230_v21 }
0x10cb   :  { %v3361_v15 = vpop.f32.mrf.mxu0 }
0x10cc   :  { %v1054_v17 = vpop.permute.xlu1 %1053  ;;  %1287 = vrot.lane.b32.xlu0 %v1279_v14, %s3832_s28  ;;  %v3020_v24 = vmul.f32 -1.442695, %v1278_v23 }
0x10cd   :  { %v1056_v19 = vmul.f32 %v3666_v16, %v1054_v17  ;;  %v1275_v20 = vpop.f32.mrf.mxu0 }
0x10ce   :  { %3667 = vpow2.f32 %v3020_v24 }
0x10cf   :  { %1058 = vrot.lane.b32.xlu1 %v1056_v19, %s3832_s28  ;;  %v3362_v13 = vpop.f32.mrf.mxu0 }
0x10db   :  { %v3668_v25 = vpop.eup %3667 }
0x10dc   :  { %v1283_v26 = vadd.f32 1.0, %v3668_v25 }
0x10de   :  { %3669 = vrcp.f32 %v1283_v26 }
0x10eb   :  { %v3670_v27 = vpop.eup %3669 }
0x10ec   :  { %v1297_v41 = vsub.f32 1.0, %v3670_v27  ;;  %v1303_v43 = vmul.f32 %v3670_v27, %v4196_v59 }
0x113e   :  { %v1288_v28 = vpop.permute.xlu0 %1287 }
0x113f   :  { %v1290_v29 = vmul.f32 %v3670_v27, %v1288_v28 }
0x1141   :  { %v1059_v30 = vpop.permute.xlu1 %1058  ;;  %1292 = vrot.lane.b32.xlu0 %v1290_v29, %s3832_s28 }
0x1142   :  { %v1061_v31 = vadd.f32 %v1059_v30, %v1041_v8 }
0x1144   :  { %3671 = vtanh.f32 %v1061_v31 }
0x1151   :  { %v3672_v32 = vpop.eup %3671 }
0x1152   :  { %1065 = vrot.lane.b32.xlu1 %v3672_v32, %s3835_s14 }
0x11b3   :  { %v1293_v33 = vpop.permute.xlu0 %1292 }
0x11b4   :  { %v1295_v34 = vadd.f32 %v1293_v33, %v1230_v21 }
0x11b6   :  { %3673 = vtanh.f32 %v1295_v34 }
0x11c3   :  { %v3674_v35 = vpop.eup %3673 }
0x11c4   :  { %1299 = vrot.lane.b32.xlu0 %v3674_v35, %s3835_s14  ;;  %v1066_v37 = vpop.permute.xlu1 %1065 }
0x11c5   :  { %v1068_v40 = vmul.f32 %v1066_v37, %v1063_v39 }
0x11c7   :  { %v4233_v45 = vadd.f32 %v1069_v42, %v1068_v40  ;;  %v4302_v42 = vld [vmem:[%s4724_s5 + $0x18] sm:$0xff]  }
0x11c8   :  { %1152 = vrot.lane.b32.xlu0 %v4196_v59, %s3835_s14 }
0x1236   :  { %v1300_v12 = vpop.permute.xlu0 %1299 }
0x1237   :  { %v1302_v44 = vmul.f32 %v1300_v12, %v1297_v41 }
0x1239   :  { %v4235_v46 = vadd.f32 %v1303_v43, %v1302_v44  ;;  %v4311_v43 = vld [vmem:[%s4724_s5 + $0x10] sm:$0xff]   ;;  %v4318_v44 = vld [vmem:[%s4724_s5 + $0x8] sm:$0xff]  }
0x123a   :  { %v1153_v47 = vpop.permute.xlu0 %1152 }
0x123b   :  { %v1155_v48 = vsel %vm282_vm3, %v1153_v47, %v4233_v45  ;;  %v1385_v49 = vpack.c.bf16 %v4235_v46, %v4235_v46 }
0x123c   :  { %v1156_v50 = vpack.c.bf16 %v1155_v48, %v1155_v48 }
0x123d   :  { %1387 = vrot.lane.b32.xlu1 %v1385_v49, %s3835_s14 }
0x123e   :  { %3352 = vmatmul.mubr.msk.bf16.vlgmr.msra.gmra.mxu1 %vm386_vm4, %v1156_v50 }
0x123f   :  { %3376 = vmatpush3.bf16.msra.mxu1 %v4246_v51  ;;  %3379 = vmatprep.mubr.msk.bf16.mxu1 %vm3833_vm1, %v3831_v4 }
0x1240   :  { %3377 = vmatprep.subr.bf16.mxu1 %v3831_v4 }
0x1243   :  { %3378 = vmatpush3.bf16.msra.mxu1 %v4255_v52 }
0x1244   :  { %3383 = vmatprep.subr.bf16.mxu1 %v3831_v4 }
0x12af   :  { %v1388_v55 = vpop.permute.xlu1 %1387 }
0x12b0   :  { %3380 = vmatmul.mubr.msk.bf16.vlgmr.msra.gmra.mxu1 %vm282_vm3, %v1388_v55 }
0x12b1   :  { %3384 = vmatpush3.bf16.msra.mxu1 %v3978_v53  ;;  %3391 = vmatprep.mubr.msk.bf16.mxu1 %vm3833_vm1, %v3831_v4 }
0x12b2   :  { %3385 = vmatprep.subr.bf16.mxu1 %v3831_v4 }
0x12b5   :  { %3386 = vmatpush3.bf16.msra.mxu1 %v3984_v54 }
0x12b6   :  { %3387 = vmatprep.subr.bf16.mxu1 %v3831_v4 }
0x12b9   :  { %3388 = vmatpush3.bf16.msra.mxu1 %v3993_v56 }
0x12ba   :  { %3389 = vmatprep.subr.bf16.mxu1 %v3831_v4 }
0x12bd   :  { %3390 = vmatpush3.bf16.msra.mxu1 %v4006_v57 }
0x12be   :  { %3415 = vmatprep.subr.bf16.mxu1 %v3831_v4 }
0x12fe   :  { %v1194_v59 = vpop.f32.mrf.mxu1 }
0x12ff   :  { %v1195_v53 = vadd.f32 %v4045_v38, %v1194_v59 }
0x1300   :  { %v3353_v60 = vpop.f32.mrf.mxu1 }
0x1301   :  { %1207 = vrot.lane.b32.xlu1 %v1195_v53, %s3836_s18  ;;  %v3018_v63 = vmul.f32 -1.442695, %v1195_v53 }
0x1302   :  { %v1197_v61 = vpop.f32.mrf.mxu1 }
0x1303   :  { %3675 = vpow2.f32 %v3018_v63 }
0x1304   :  { %v3354_v62 = vpop.f32.mrf.mxu1 }
0x1310   :  { %v3676_v54 = vpop.eup %3675 }
0x1311   :  { %v1203_v0 = vadd.f32 1.0, %v3676_v54 }
0x1313   :  { %3677 = vrcp.f32 %v1203_v0 }
0x1320   :  { %v3678_v57 = vpop.eup %3677 }
0x1321   :  { %v1217_v27 = vsub.f32 1.0, %v3678_v57  ;;  %v1223_v31 = vmul.f32 %v3678_v57, %v4233_v45 }
0x1370   :  { %v1426_v56 = vpop.f32.mrf.mxu1 }
0x1371   :  { %v1433_v3 = vadd.f32 %v1426_v56, %v3967_v36  ;;  %v1432_v11 = vadd.f32 %v1426_v56, %v1384_v9 }
0x1372   :  { %v3381_v8 = vpop.f32.mrf.mxu1 }
0x1373   :  { %v1208_v1 = vpop.permute.xlu1 %1207  ;;  %1441 = vrot.lane.b32.xlu0 %v1433_v3, %s3832_s28  ;;  %v3024_v10 = vmul.f32 -1.442695, %v1432_v11  ;;  %v1538_v8 = vld [vmem:[#allocation2 + $0x40] sm:$0xff] }
0x1374   :  { %v1210_v5 = vmul.f32 %v3678_v57, %v1208_v1  ;;  %v1429_v6 = vpop.f32.mrf.mxu1 }
0x1375   :  { %3679 = vpow2.f32 %v3024_v10 }
0x1376   :  { %1212 = vrot.lane.b32.xlu1 %v1210_v5, %s3832_s28  ;;  %v3382_v7 = vpop.f32.mrf.mxu1 }
0x1382   :  { %v3680_v14 = vpop.eup %3679 }
0x1383   :  { %v1437_v15 = vadd.f32 1.0, %v3680_v14 }
0x1385   :  { %3681 = vrcp.f32 %v1437_v15 }
0x1392   :  { %v3682_v16 = vpop.eup %3681 }
0x1393   :  { %v1451_v29 = vsub.f32 1.0, %v3682_v16  ;;  %v1457_v32 = vmul.f32 %v3682_v16, %v4235_v46 }
0x13e5   :  { %v1442_v17 = vpop.permute.xlu0 %1441 }
0x13e6   :  { %v1444_v19 = vmul.f32 %v3682_v16, %v1442_v17 }
0x13e8   :  { %v1213_v20 = vpop.permute.xlu1 %1212  ;;  %1446 = vrot.lane.b32.xlu0 %v1444_v19, %s3832_s28 }
0x13e9   :  { %v1215_v13 = vadd.f32 %v1213_v20, %v1195_v53 }
0x13eb   :  { %3683 = vtanh.f32 %v1215_v13 }
0x13f8   :  { %v3684_v21 = vpop.eup %3683 }
0x13f9   :  { %1219 = vrot.lane.b32.xlu1 %v3684_v21, %s3835_s14 }
0x145a   :  { %v1447_v23 = vpop.permute.xlu0 %1446 }
0x145b   :  { %v1449_v24 = vadd.f32 %v1447_v23, %v1384_v9 }
0x145d   :  { %3685 = vtanh.f32 %v1449_v24 }
0x146a   :  { %v3686_v25 = vpop.eup %3685 }
0x146b   :  { %1453 = vrot.lane.b32.xlu0 %v3686_v25, %s3835_s14  ;;  %v1220_v26 = vpop.permute.xlu1 %1219 }
0x146c   :  { %v1222_v28 = vmul.f32 %v1220_v26, %v1217_v27 }
0x146e   :  { %v4282_v34 = vadd.f32 %v1223_v31, %v1222_v28 }
0x146f   :  { %1306 = vrot.lane.b32.xlu0 %v4235_v46, %s3835_s14  ;;  %v4325_v46 = vld [vmem:[%s4724_s5] sm:$0xff]  }
0x14dd   :  { %v1454_v30 = vpop.permute.xlu0 %1453 }
0x14de   :  { %v1456_v33 = vmul.f32 %v1454_v30, %v1451_v29 }
0x14e0   :  { %v4284_v35 = vadd.f32 %v1457_v32, %v1456_v33 }
0x14e1   :  { %v1307_v37 = vpop.permute.xlu0 %1306 }
0x14e2   :  { %v1309_v39 = vsel %vm282_vm3, %v1307_v37, %v4282_v34  ;;  %v1539_v40 = vpack.c.bf16 %v4284_v35, %v4284_v35 }
0x14e3   :  { %v1310_v41 = vpack.c.bf16 %v1309_v39, %v1309_v39  ;;  %v4371_v39 = vld [vmem:[%s4725_s6] ss:$0 sm:$0xff] }
0x14e4   :  { %1541 = vrot.lane.b32.xlu1 %v1539_v40, %s3835_s14 }
0x14e5   :  { %3372 = vmatmul.mubr.msk.bf16.vlgmr.msra.gmra.mxu0 %vm386_vm4, %v1310_v41 }
0x14e6   :  { %3396 = vmatpush3.bf16.msra.mxu0 %v4246_v51  ;;  %3399 = vmatprep.mubr.msk.bf16.mxu0 %vm3833_vm1, %v3831_v4 }
0x14e7   :  { %3397 = vmatprep.subr.bf16.mxu0 %v3831_v4 }
0x14ea   :  { %3398 = vmatpush3.bf16.msra.mxu0 %v4255_v52 }
0x14eb   :  { %3403 = vmatprep.subr.bf16.mxu0 %v3831_v4 }
0x1556   :  { %v1542_v12 = vpop.permute.xlu1 %1541 }
0x1557   :  { %3400 = vmatmul.mubr.msk.bf16.vlgmr.msra.gmra.mxu0 %vm282_vm3, %v1542_v12 }
0x1558   :  { %3404 = vmatpush3.bf16.msra.mxu0 %v4302_v42  ;;  %3411 = vmatprep.mubr.msk.bf16.mxu0 %vm3833_vm1, %v3831_v4 }
0x1559   :  { %3405 = vmatprep.subr.bf16.mxu0 %v3831_v4 }
0x155c   :  { %3406 = vmatpush3.bf16.msra.mxu0 %v4311_v43 }
0x155d   :  { %3407 = vmatprep.subr.bf16.mxu0 %v3831_v4 }
0x1560   :  { %3408 = vmatpush3.bf16.msra.mxu0 %v4318_v44 }
0x1561   :  { %3409 = vmatprep.subr.bf16.mxu0 %v3831_v4 }
0x1564   :  { %3410 = vmatpush3.bf16.msra.mxu0 %v4325_v46 }
0x1565   :  { %3435 = vmatprep.subr.bf16.mxu0 %v3831_v4 }
0x15a5   :  { %v1348_v47 = vpop.f32.mrf.mxu0 }
0x15a6   :  { %v1349_v48 = vadd.f32 %v4045_v38, %v1348_v47 }
0x15a7   :  { %v3373_v49 = vpop.f32.mrf.mxu0 }
0x15a8   :  { %1361 = vrot.lane.b32.xlu1 %v1349_v48, %s3836_s18  ;;  %v3022_v59 = vmul.f32 -1.442695, %v1349_v48 }
0x15a9   :  { %v1351_v50 = vpop.f32.mrf.mxu0 }
0x15aa   :  { %3687 = vpow2.f32 %v3022_v59 }
0x15ab   :  { %v3374_v55 = vpop.f32.mrf.mxu0 }
0x15b7   :  { %v3688_v53 = vpop.eup %3687 }
0x15b8   :  { %v1357_v60 = vadd.f32 1.0, %v3688_v53 }
0x15ba   :  { %3689 = vrcp.f32 %v1357_v60 }
0x15c7   :  { %v3690_v54 = vpop.eup %3689 }
0x15c8   :  { %v1371_v13 = vsub.f32 1.0, %v3690_v54  ;;  %v1377_v25 = vmul.f32 %v3690_v54, %v4282_v34 }
0x1617   :  { %v1580_v61 = vpop.f32.mrf.mxu0 }
0x1618   :  { %v1587_v62 = vadd.f32 %v1580_v61, %v3967_v36  ;;  %v1586_v57 = vadd.f32 %v1580_v61, %v1538_v8 }
0x1619   :  { %v3401_v63 = vpop.f32.mrf.mxu0 }
0x161a   :  { %v1362_v0 = vpop.permute.xlu1 %1361  ;;  %1595 = vrot.lane.b32.xlu0 %v1587_v62, %s3832_s28  ;;  %v3028_v1 = vmul.f32 -1.442695, %v1586_v57 }
0x161b   :  { %v1364_v56 = vmul.f32 %v3690_v54, %v1362_v0  ;;  %v1583_v38 = vpop.f32.mrf.mxu0  ;;  %v1692_v0 = vld [vmem:[#allocation2 + $0x48] sm:$0xff] }
0x161c   :  { %3691 = vpow2.f32 %v3028_v1 }
0x161d   :  { %1366 = vrot.lane.b32.xlu1 %v1364_v56, %s3832_s28  ;;  %v3402_v3 = vpop.f32.mrf.mxu0 }
0x1629   :  { %v3692_v5 = vpop.eup %3691 }
0x162a   :  { %v1591_v6 = vadd.f32 1.0, %v3692_v5 }
0x162c   :  { %3693 = vrcp.f32 %v1591_v6 }
0x1639   :  { %v3694_v7 = vpop.eup %3693 }
0x163a   :  { %v1605_v23 = vsub.f32 1.0, %v3694_v7  ;;  %v1611_v26 = vmul.f32 %v3694_v7, %v4284_v35 }
0x168c   :  { %v1596_v9 = vpop.permute.xlu0 %1595 }
0x168d   :  { %v1598_v11 = vmul.f32 %v3694_v7, %v1596_v9 }
0x168f   :  { %v1367_v10 = vpop.permute.xlu1 %1366  ;;  %1600 = vrot.lane.b32.xlu0 %v1598_v11, %s3832_s28 }
0x1690   :  { %v1369_v14 = vadd.f32 %v1367_v10, %v1349_v48 }
0x1692   :  { %3695 = vtanh.f32 %v1369_v14 }
0x169f   :  { %v3696_v15 = vpop.eup %3695 }
0x16a0   :  { %1373 = vrot.lane.b32.xlu1 %v3696_v15, %s3835_s14 }
0x1701   :  { %v1601_v16 = vpop.permute.xlu0 %1600 }
0x1702   :  { %v1603_v17 = vadd.f32 %v1601_v16, %v1538_v8 }
0x1704   :  { %3697 = vtanh.f32 %v1603_v17 }
0x1711   :  { %v3698_v19 = vpop.eup %3697 }
0x1712   :  { %1607 = vrot.lane.b32.xlu0 %v3698_v19, %s3835_s14  ;;  %v1374_v20 = vpop.permute.xlu1 %1373 }
0x1713   :  { %v1376_v21 = vmul.f32 %v1374_v20, %v1371_v13 }
0x1715   :  { %v4341_v28 = vadd.f32 %v1377_v25, %v1376_v21 }
0x1716   :  { %1460 = vrot.lane.b32.xlu0 %v4284_v35, %s3835_s14 }
0x1784   :  { %v1608_v24 = vpop.permute.xlu0 %1607 }
0x1785   :  { %v1610_v27 = vmul.f32 %v1608_v24, %v1605_v23 }
0x1787   :  { %v4343_v29 = vadd.f32 %v1611_v26, %v1610_v27 }
0x1788   :  { %v1461_v30 = vpop.permute.xlu0 %1460 }
0x1789   :  { %v1463_v31 = vsel %vm282_vm3, %v1461_v30, %v4341_v28  ;;  %v1693_v32 = vpack.c.bf16 %v4343_v29, %v4343_v29 }
0x178a   :  { %v1464_v33 = vpack.c.bf16 %v1463_v31, %v1463_v31 }
0x178b   :  { %1695 = vrot.lane.b32.xlu1 %v1693_v32, %s3835_s14 }
0x178c   :  { %3392 = vmatmul.mubr.msk.bf16.vlgmr.msra.gmra.mxu1 %vm386_vm4, %v1464_v33 }
0x178d   :  { %3416 = vmatpush3.bf16.msra.mxu1 %v4246_v51  ;;  %3419 = vmatprep.mubr.msk.bf16.mxu1 %vm3833_vm1, %v3831_v4 }
0x178e   :  { %3417 = vmatprep.subr.bf16.mxu1 %v3831_v4 }
0x1791   :  { %3418 = vmatpush3.bf16.msra.mxu1 %v4255_v52 }
0x1792   :  { %3423 = vmatprep.subr.bf16.mxu1 %v3831_v4 }
0x17fd   :  { %v1696_v35 = vpop.permute.xlu1 %1695 }
0x17fe   :  { %3420 = vmatmul.mubr.msk.bf16.vlgmr.msra.gmra.mxu1 %vm282_vm3, %v1696_v35 }
0x17ff   :  { %3424 = vmatpush3.bf16.msra.mxu1 %v4302_v42  ;;  %3431 = vmatprep.mubr.msk.bf16.mxu1 %vm3833_vm1, %v3831_v4 }
0x1800   :  { %3425 = vmatprep.subr.bf16.mxu1 %v3831_v4 }
0x1803   :  { %3426 = vmatpush3.bf16.msra.mxu1 %v4311_v43 }
0x1804   :  { %3427 = vmatprep.subr.bf16.mxu1 %v3831_v4 }
0x1807   :  { %3428 = vmatpush3.bf16.msra.mxu1 %v4318_v44 }
0x1808   :  { %3429 = vmatprep.subr.bf16.mxu1 %v3831_v4 }
0x180b   :  { %3430 = vmatpush3.bf16.msra.mxu1 %v4325_v46 }
0x180c   :  { %3455 = vmatprep.subr.bf16.mxu1 %v3831_v4 }
0x184c   :  { %v1502_v37 = vpop.f32.mrf.mxu1 }
0x184d   :  { %v1503_v40 = vadd.f32 %v4371_v39, %v1502_v37 }
0x184e   :  { %v3393_v41 = vpop.f32.mrf.mxu1 }
0x184f   :  { %1515 = vrot.lane.b32.xlu1 %v1503_v40, %s3836_s18  ;;  %v3026_v48 = vmul.f32 -1.442695, %v1503_v40 }
0x1850   :  { %v1505_v12 = vpop.f32.mrf.mxu1 }
0x1851   :  { %3699 = vpow2.f32 %v3026_v48 }
0x1852   :  { %v3394_v47 = vpop.f32.mrf.mxu1 }
0x185e   :  { %v3700_v49 = vpop.eup %3699 }
0x185f   :  { %v1511_v50 = vadd.f32 1.0, %v3700_v49 }
0x1861   :  { %3701 = vrcp.f32 %v1511_v50 }
0x186e   :  { %v3702_v60 = vpop.eup %3701 }
0x186f   :  { %v1525_v16 = vsub.f32 1.0, %v3702_v60  ;;  %v1531_v13 = vmul.f32 %v3702_v60, %v4341_v28 }
0x18be   :  { %v1734_v55 = vpop.f32.mrf.mxu1 }
0x18bf   :  { %v1741_v59 = vadd.f32 %v1734_v55, %v3967_v36  ;;  %v1740_v56 = vadd.f32 %v1734_v55, %v1692_v0 }
0x18c0   :  { %v3421_v53 = vpop.f32.mrf.mxu1 }
0x18c1   :  { %v1516_v61 = vpop.permute.xlu1 %1515  ;;  %1749 = vrot.lane.b32.xlu0 %v1741_v59, %s3832_s28  ;;  %v3032_v38 = vmul.f32 -1.442695, %v1740_v56 }
0x18c2   :  { %v1518_v62 = vmul.f32 %v3702_v60, %v1516_v61  ;;  %v1737_v63 = vpop.f32.mrf.mxu1 }
0x18c3   :  { %3703 = vpow2.f32 %v3032_v38 }
0x18c4   :  { %1520 = vrot.lane.b32.xlu1 %v1518_v62, %s3832_s28  ;;  %v3422_v54 = vpop.f32.mrf.mxu1  ;;  %v1846_v62 = vld [vmem:[#allocation2 + $0x50] sm:$0xff] }
0x18d0   :  { %v3704_v3 = vpop.eup %3703 }
0x18d1   :  { %v1745_v8 = vadd.f32 1.0, %v3704_v3 }
0x18d3   :  { %3705 = vrcp.f32 %v1745_v8 }
0x18e0   :  { %v3706_v57 = vpop.eup %3705 }
0x18e1   :  { %v1759_v19 = vsub.f32 1.0, %v3706_v57  ;;  %v1765_v21 = vmul.f32 %v3706_v57, %v4343_v29 }
0x1933   :  { %v1750_v1 = vpop.permute.xlu0 %1749 }
0x1934   :  { %v1752_v5 = vmul.f32 %v3706_v57, %v1750_v1 }
0x1936   :  { %v1521_v6 = vpop.permute.xlu1 %1520  ;;  %1754 = vrot.lane.b32.xlu0 %v1752_v5, %s3832_s28 }
0x1937   :  { %v1523_v7 = vadd.f32 %v1521_v6, %v1503_v40 }
0x1939   :  { %3707 = vtanh.f32 %v1523_v7 }
0x1946   :  { %v3708_v9 = vpop.eup %3707 }
0x1947   :  { %1527 = vrot.lane.b32.xlu1 %v3708_v9, %s3835_s14 }
0x19a8   :  { %v1755_v11 = vpop.permute.xlu0 %1754 }
0x19a9   :  { %v1757_v10 = vadd.f32 %v1755_v11, %v1692_v0 }
0x19ab   :  { %3709 = vtanh.f32 %v1757_v10 }
0x19b8   :  { %v3710_v14 = vpop.eup %3709 }
0x19b9   :  { %1761 = vrot.lane.b32.xlu0 %v3710_v14, %s3835_s14  ;;  %v1528_v15 = vpop.permute.xlu1 %1527 }
0x19ba   :  { %v1530_v17 = vmul.f32 %v1528_v15, %v1525_v16 }
0x19bc   :  { %v4385_v24 = vadd.f32 %v1531_v13, %v1530_v17 }
0x19bd   :  { %1614 = vrot.lane.b32.xlu0 %v4343_v29, %s3835_s14 }
0x1a2b   :  { %v1762_v20 = vpop.permute.xlu0 %1761 }
0x1a2c   :  { %v1764_v23 = vmul.f32 %v1762_v20, %v1759_v19 }
0x1a2e   :  { %v4387_v25 = vadd.f32 %v1765_v21, %v1764_v23 }
0x1a2f   :  { %v1615_v26 = vpop.permute.xlu0 %1614 }
0x1a30   :  { %v1617_v27 = vsel %vm282_vm3, %v1615_v26, %v4385_v24  ;;  %v1847_v30 = vpack.c.bf16 %v4387_v25, %v4387_v25 }
0x1a31   :  { %v1618_v31 = vpack.c.bf16 %v1617_v27, %v1617_v27 }
0x1a32   :  { %1849 = vrot.lane.b32.xlu1 %v1847_v30, %s3835_s14 }
0x1a33   :  { %3412 = vmatmul.mubr.msk.bf16.vlgmr.msra.gmra.mxu0 %vm386_vm4, %v1618_v31 }
0x1a34   :  { %3436 = vmatpush3.bf16.msra.mxu0 %v4246_v51  ;;  %3439 = vmatprep.mubr.msk.bf16.mxu0 %vm3833_vm1, %v3831_v4 }
0x1a35   :  { %3437 = vmatprep.subr.bf16.mxu0 %v3831_v4 }
0x1a38   :  { %3438 = vmatpush3.bf16.msra.mxu0 %v4255_v52 }
0x1a39   :  { %3443 = vmatprep.subr.bf16.mxu0 %v3831_v4 }
0x1aa4   :  { %v1850_v29 = vpop.permute.xlu1 %1849 }
0x1aa5   :  { %3440 = vmatmul.mubr.msk.bf16.vlgmr.msra.gmra.mxu0 %vm282_vm3, %v1850_v29 }
0x1aa6   :  { %3444 = vmatpush3.bf16.msra.mxu0 %v4302_v42  ;;  %3451 = vmatprep.mubr.msk.bf16.mxu0 %vm3833_vm1, %v3831_v4 }
0x1aa7   :  { %3445 = vmatprep.subr.bf16.mxu0 %v3831_v4 }
0x1aaa   :  { %3446 = vmatpush3.bf16.msra.mxu0 %v4311_v43 }
0x1aab   :  { %3447 = vmatprep.subr.bf16.mxu0 %v3831_v4 }
0x1aae   :  { %3448 = vmatpush3.bf16.msra.mxu0 %v4318_v44 }
0x1aaf   :  { %3449 = vmatprep.subr.bf16.mxu0 %v3831_v4 }
0x1ab2   :  { %3450 = vmatpush3.bf16.msra.mxu0 %v4325_v46 }
0x1ab3   :  { %3475 = vmatprep.subr.bf16.mxu0 %v3831_v4 }
0x1af3   :  { %v1656_v32 = vpop.f32.mrf.mxu0 }
0x1af4   :  { %v1657_v33 = vadd.f32 %v4371_v39, %v1656_v32 }
0x1af5   :  { %v3413_v35 = vpop.f32.mrf.mxu0 }
0x1af6   :  { %1669 = vrot.lane.b32.xlu0 %v1657_v33, %s3836_s18  ;;  %v3030_v41 = vmul.f32 -1.442695, %v1657_v33 }
0x1af7   :  { %v1659_v37 = vpop.f32.mrf.mxu0 }
0x1af8   :  { %3711 = vpow2.f32 %v3030_v41 }
0x1af9   :  { %v3414_v40 = vpop.f32.mrf.mxu0 }
0x1b05   :  { %v3712_v12 = vpop.eup %3711 }
0x1b06   :  { %v1665_v47 = vadd.f32 1.0, %v3712_v12 }
0x1b08   :  { %3713 = vrcp.f32 %v1665_v47 }
0x1b15   :  { %v3714_v55 = vpop.eup %3713 }
0x1b16   :  { %v1679_v11 = vsub.f32 1.0, %v3714_v55  ;;  %v1685_v14 = vmul.f32 %v3714_v55, %v4385_v24 }
0x1b65   :  { %v1888_v48 = vpop.f32.mrf.mxu0 }
0x1b66   :  { %v1895_v49 = vadd.f32 %v1888_v48, %v3967_v36  ;;  %v1894_v63 = vadd.f32 %v1888_v48, %v1846_v62 }
0x1b67   :  { %v3441_v50 = vpop.f32.mrf.mxu0 }
0x1b68   :  { %v1670_v59 = vpop.permute.xlu0 %1669  ;;  %1903 = vrot.lane.b32.xlu1 %v1895_v49, %s3832_s28  ;;  %v3036_v54 = vmul.f32 -1.442695, %v1894_v63  ;;  %v2000_v63 = vld [vmem:[#allocation2 + $0x58] sm:$0xff] }
0x1b69   :  { %v1672_v53 = vmul.f32 %v3714_v55, %v1670_v59  ;;  %v1891_v60 = vpop.f32.mrf.mxu0 }
0x1b6a   :  { %3715 = vpow2.f32 %v3036_v54 }
0x1b6b   :  { %1674 = vrot.lane.b32.xlu0 %v1672_v53, %s3832_s28  ;;  %v3442_v61 = vpop.f32.mrf.mxu0 }
0x1b77   :  { %v3716_v0 = vpop.eup %3715 }
0x1b78   :  { %v1899_v56 = vadd.f32 1.0, %v3716_v0 }
0x1b7a   :  { %3717 = vrcp.f32 %v1899_v56 }
0x1b87   :  { %v3718_v38 = vpop.eup %3717 }
0x1b88   :  { %v1913_v13 = vsub.f32 1.0, %v3718_v38  ;;  %v1919_v23 = vmul.f32 %v3718_v38, %v4387_v25 }
0x1bda   :  { %v1904_v3 = vpop.permute.xlu1 %1903 }
0x1bdb   :  { %v1906_v8 = vmul.f32 %v3718_v38, %v1904_v3 }
0x1bdd   :  { %v1675_v57 = vpop.permute.xlu0 %1674  ;;  %1908 = vrot.lane.b32.xlu1 %v1906_v8, %s3832_s28 }
0x1bde   :  { %v1677_v1 = vadd.f32 %v1675_v57, %v1657_v33 }
0x1be0   :  { %3719 = vtanh.f32 %v1677_v1 }
0x1be1   :  { %1768 = vrot.lane.b32.xlu1 %v4387_v25, %s3835_s14 }
0x1bed   :  { %v3720_v5 = vpop.eup %3719 }
0x1bee   :  { %1681 = vrot.lane.b32.xlu0 %v3720_v5, %s3835_s14 }
0x1c4f   :  { %v1909_v6 = vpop.permute.xlu1 %1908 }
0x1c50   :  { %v1911_v7 = vadd.f32 %v1909_v6, %v1846_v62 }
0x1c52   :  { %3721 = vtanh.f32 %v1911_v7 }
0x1c53   :  { %v1769_v17 = vpop.permute.xlu1 %1768 }
0x1c5f   :  { %v3722_v9 = vpop.eup %3721 }
0x1c60   :  { %v1682_v10 = vpop.permute.xlu0 %1681  ;;  %1915 = vrot.lane.b32.xlu0 %v3722_v9, %s3835_s14 }
0x1c61   :  { %v1684_v15 = vmul.f32 %v1682_v10, %v1679_v11 }
0x1c63   :  { %v4423_v16 = vadd.f32 %v1685_v14, %v1684_v15 }
0x1c65   :  { %v1771_v19 = vsel %vm282_vm3, %v1769_v17, %v4423_v16 }
0x1c66   :  { %v1772_v20 = vpack.c.bf16 %v1771_v19, %v1771_v19 }
0x1c68   :  { %3432 = vmatmul.mubr.msk.bf16.vlgmr.msra.gmra.mxu1 %vm386_vm4, %v1772_v20 }
0x1c69   :  { %3456 = vmatpush3.bf16.msra.mxu1 %v4246_v51  ;;  %3459 = vmatprep.mubr.msk.bf16.mxu1 %vm3833_vm1, %v3831_v4 }
0x1c6a   :  { %3457 = vmatprep.subr.bf16.mxu1 %v3831_v4 }
0x1c6d   :  { %3458 = vmatpush3.bf16.msra.mxu1 %v4255_v52 }
0x1c6e   :  { %3463 = vmatprep.subr.bf16.mxu1 %v3831_v4 }
0x1cd2   :  { %v1916_v21 = vpop.permute.xlu0 %1915 }
0x1cd3   :  { %v1918_v26 = vmul.f32 %v1916_v21, %v1913_v13 }
0x1cd5   :  { %v4435_v27 = vadd.f32 %v1919_v23, %v1918_v26 }
0x1cd7   :  { %v2001_v30 = vpack.c.bf16 %v4435_v27, %v4435_v27 }
0x1cd9   :  { %2003 = vrot.lane.b32.xlu1 %v2001_v30, %s3835_s14 }
0x1d28   :  { %v1810_v31 = vpop.f32.mrf.mxu1 }
0x1d29   :  { %v1811_v29 = vadd.f32 %v4371_v39, %v1810_v31 }
0x1d2a   :  { %v3433_v32 = vpop.f32.mrf.mxu1 }
0x1d2b   :  { %1823 = vrot.lane.b32.xlu0 %v1811_v29, %s3836_s18  ;;  %v3034_v25 = vmul.f32 -1.442695, %v1811_v29 }
0x1d2c   :  { %v1813_v33 = vpop.f32.mrf.mxu1 }
0x1d2d   :  { %3723 = vpow2.f32 %v3034_v25 }
0x1d2e   :  { %v3434_v35 = vpop.f32.mrf.mxu1 }
0x1d3a   :  { %v3724_v40 = vpop.eup %3723 }
0x1d3b   :  { %v1819_v41 = vadd.f32 1.0, %v3724_v40 }
0x1d3d   :  { %3725 = vrcp.f32 %v1819_v41 }
0x1d4a   :  { %v3726_v12 = vpop.eup %3725 }
0x1d4b   :  { %v2004_v37 = vpop.permute.xlu1 %2003  ;;  %v1833_v1 = vsub.f32 1.0, %v3726_v12  ;;  %v1839_v6 = vmul.f32 %v3726_v12, %v4423_v16 }
0x1d4c   :  { %3460 = vmatmul.mubr.msk.bf16.vlgmr.msra.gmra.mxu1 %vm282_vm3, %v2004_v37 }
0x1d4d   :  { %3464 = vmatpush3.bf16.msra.mxu1 %v4302_v42  ;;  %3471 = vmatprep.mubr.msk.bf16.mxu1 %vm3833_vm1, %v3831_v4 }
0x1d4e   :  { %3465 = vmatprep.subr.bf16.mxu1 %v3831_v4 }
0x1d51   :  { %3466 = vmatpush3.bf16.msra.mxu1 %v4311_v43 }
0x1d52   :  { %3467 = vmatprep.subr.bf16.mxu1 %v3831_v4 }
0x1d55   :  { %3468 = vmatpush3.bf16.msra.mxu1 %v4318_v44 }
0x1d56   :  { %3469 = vmatprep.subr.bf16.mxu1 %v3831_v4 }
0x1d59   :  { %3470 = vmatpush3.bf16.msra.mxu1 %v4325_v46 }
0x1d5a   :  { %3495 = vmatprep.subr.bf16.mxu1 %v3831_v4 }
0x1d9d   :  { %v1824_v47 = vpop.permute.xlu0 %1823 }
0x1d9e   :  { %v1826_v48 = vmul.f32 %v3726_v12, %v1824_v47 }
0x1da0   :  { %1828 = vrot.lane.b32.xlu1 %v1826_v48, %s3832_s28 }
0x1e0c   :  { %v2042_v49 = vpop.f32.mrf.mxu1 }
0x1e0d   :  { %v2049_v50 = vadd.f32 %v2042_v49, %v3967_v36  ;;  %v2048_v54 = vadd.f32 %v2042_v49, %v2000_v63 }
0x1e0e   :  { %v3461_v55 = vpop.f32.mrf.mxu1 }
0x1e0f   :  { %2057 = vrot.lane.b32.xlu0 %v2049_v50, %s3832_s28  ;;  %v3040_v0 = vmul.f32 -1.442695, %v2048_v54 }
0x1e10   :  { %v2045_v59 = vpop.f32.mrf.mxu1 }
0x1e12   :  { %v1829_v53 = vpop.permute.xlu1 %1828  ;;  %v3462_v60 = vpop.f32.mrf.mxu1 }
0x1e13   :  { %v1831_v61 = vadd.f32 %v1829_v53, %v1811_v29  ;;  %1922 = vrot.lane.b32.xlu0 %v4435_v27, %s3835_s14 }
0x1e15   :  { %3727 = vtanh.f32 %v1831_v61 }
0x1e16   :  { %3729 = vpow2.f32 %v3040_v0 }
0x1e22   :  { %v3728_v62 = vpop.eup %3727 }
0x1e23   :  { %1835 = vrot.lane.b32.xlu1 %v3728_v62, %s3835_s14  ;;  %v3730_v56 = vpop.eup %3729 }
0x1e24   :  { %v2053_v38 = vadd.f32 1.0, %v3730_v56 }
0x1e26   :  { %3731 = vrcp.f32 %v2053_v38 }
0x1e33   :  { %v3732_v3 = vpop.eup %3731 }
0x1e34   :  { %v2067_v30 = vsub.f32 1.0, %v3732_v3  ;;  %v2073_v29 = vmul.f32 %v3732_v3, %v4435_v27 }
0x1e81   :  { %v2058_v8 = vpop.permute.xlu0 %2057 }
0x1e82   :  { %v2060_v57 = vmul.f32 %v3732_v3, %v2058_v8 }
0x1e84   :  { %2062 = vrot.lane.b32.xlu1 %v2060_v57, %s3832_s28  ;;  %v2154_v57 = vld [vmem:[#allocation2 + $0x60] sm:$0xff] }
0x1e85   :  { %v1923_v11 = vpop.permute.xlu0 %1922 }
0x1e95   :  { %v1836_v5 = vpop.permute.xlu1 %1835 }
0x1e96   :  { %v1838_v7 = vmul.f32 %v1836_v5, %v1833_v1 }
0x1e98   :  { %v4461_v9 = vadd.f32 %v1839_v6, %v1838_v7 }
0x1e9a   :  { %v1925_v10 = vsel %vm282_vm3, %v1923_v11, %v4461_v9 }
0x1e9b   :  { %v1926_v14 = vpack.c.bf16 %v1925_v10, %v1925_v10 }
0x1e9d   :  { %3452 = vmatmul.mubr.msk.bf16.vlgmr.msra.gmra.mxu0 %vm386_vm4, %v1926_v14 }
0x1e9e   :  { %3476 = vmatpush3.bf16.msra.mxu0 %v4246_v51  ;;  %3479 = vmatprep.mubr.msk.bf16.mxu0 %vm3833_vm1, %v3831_v4 }
0x1e9f   :  { %3477 = vmatprep.subr.bf16.mxu0 %v3831_v4 }
0x1ea2   :  { %3478 = vmatpush3.bf16.msra.mxu0 %v4255_v52 }
0x1ea3   :  { %3483 = vmatprep.subr.bf16.mxu0 %v3831_v4 }
0x1ef6   :  { %v2063_v15 = vpop.permute.xlu1 %2062 }
0x1ef7   :  { %v2065_v17 = vadd.f32 %v2063_v15, %v2000_v63 }
0x1ef9   :  { %3733 = vtanh.f32 %v2065_v17 }
0x1f06   :  { %v3734_v19 = vpop.eup %3733 }
0x1f07   :  { %2069 = vrot.lane.b32.xlu0 %v3734_v19, %s3835_s14 }
0x1f5d   :  { %v1964_v20 = vpop.f32.mrf.mxu0 }
0x1f5e   :  { %v1965_v13 = vadd.f32 %v4371_v39, %v1964_v20 }
0x1f5f   :  { %v3453_v21 = vpop.f32.mrf.mxu0 }
0x1f60   :  { %1977 = vrot.lane.b32.xlu0 %v1965_v13, %s3836_s18  ;;  %v3038_v37 = vmul.f32 -1.442695, %v1965_v13 }
0x1f61   :  { %v1967_v23 = vpop.f32.mrf.mxu0 }
0x1f62   :  { %3735 = vpow2.f32 %v3038_v37 }
0x1f63   :  { %v3454_v26 = vpop.f32.mrf.mxu0 }
0x1f6f   :  { %v3736_v25 = vpop.eup %3735 }
0x1f70   :  { %v1973_v40 = vadd.f32 1.0, %v3736_v25 }
0x1f72   :  { %3737 = vrcp.f32 %v1973_v40 }
0x1f79   :  { %v2070_v31 = vpop.permute.xlu0 %2069 }
0x1f7a   :  { %v2072_v32 = vmul.f32 %v2070_v31, %v2067_v30 }
0x1f7c   :  { %v4476_v33 = vadd.f32 %v2073_v29, %v2072_v32 }
0x1f7e   :  { %v2155_v35 = vpack.c.bf16 %v4476_v33, %v4476_v33 }
0x1f7f   :  { %v3738_v41 = vpop.eup %3737 }
0x1f80   :  { %2157 = vrot.lane.b32.xlu1 %v2155_v35, %s3835_s14  ;;  %v1987_v62 = vsub.f32 1.0, %v3738_v41  ;;  %v1993_v54 = vmul.f32 %v3738_v41, %v4461_v9 }
0x1fd2   :  { %v1978_v12 = vpop.permute.xlu0 %1977 }
0x1fd3   :  { %v1980_v47 = vmul.f32 %v3738_v41, %v1978_v12 }
0x1fd5   :  { %1982 = vrot.lane.b32.xlu1 %v1980_v47, %s3832_s28 }
0x1fd9   :  { %2076 = vrot.lane.b32.xlu1 %v4476_v33, %s3835_s14 }
0x1ff2   :  { %v2158_v27 = vpop.permute.xlu1 %2157 }
0x1ff3   :  { %3480 = vmatmul.mubr.msk.bf16.vlgmr.msra.gmra.mxu0 %vm282_vm3, %v2158_v27 }
0x1ff4   :  { %3484 = vmatpush3.bf16.msra.mxu0 %v4302_v42  ;;  %3491 = vmatprep.mubr.msk.bf16.mxu0 %vm3833_vm1, %v3831_v4 }
0x1ff5   :  { %3485 = vmatprep.subr.bf16.mxu0 %v3831_v4 }
0x1ff8   :  { %3486 = vmatpush3.bf16.msra.mxu0 %v4311_v43 }
0x1ff9   :  { %3487 = vmatprep.subr.bf16.mxu0 %v3831_v4 }
0x1ffc   :  { %3488 = vmatpush3.bf16.msra.mxu0 %v4318_v44 }
0x1ffd   :  { %3489 = vmatprep.subr.bf16.mxu0 %v3831_v4 }
0x2000   :  { %3490 = vmatpush3.bf16.msra.mxu0 %v4325_v46 }
0x2001   :  { %3515 = vmatprep.subr.bf16.mxu0 %v3831_v4 }
0x2047   :  { %v1983_v48 = vpop.permute.xlu1 %1982 }
0x2048   :  { %v1985_v49 = vadd.f32 %v1983_v48, %v1965_v13 }
0x204a   :  { %3739 = vtanh.f32 %v1985_v49 }
0x204b   :  { %v2077_v38 = vpop.permute.xlu1 %2076 }
0x2057   :  { %v3740_v50 = vpop.eup %3739 }
0x2058   :  { %1989 = vrot.lane.b32.xlu0 %v3740_v50, %s3835_s14 }
0x20b3   :  { %v2196_v55 = vpop.f32.mrf.mxu0 }
0x20b4   :  { %v2203_v59 = vadd.f32 %v2196_v55, %v3967_v36  ;;  %v2202_v1 = vadd.f32 %v2196_v55, %v2154_v57 }
0x20b5   :  { %v3481_v53 = vpop.f32.mrf.mxu0 }
0x20b6   :  { %2211 = vrot.lane.b32.xlu0 %v2203_v59, %s3832_s28  ;;  %v3044_v5 = vmul.f32 -1.442695, %v2202_v1  ;;  %v2308_v1 = vld [vmem:[#allocation2 + $0x68] sm:$0xff] }
0x20b7   :  { %v2199_v60 = vpop.f32.mrf.mxu0 }
0x20b8   :  { %3741 = vpow2.f32 %v3044_v5 }
0x20b9   :  { %v3482_v61 = vpop.f32.mrf.mxu0 }
0x20c5   :  { %v3742_v6 = vpop.eup %3741 }
0x20c6   :  { %v2207_v7 = vadd.f32 1.0, %v3742_v6 }
0x20c8   :  { %3743 = vrcp.f32 %v2207_v7 }
0x20ca   :  { %v1990_v63 = vpop.permute.xlu0 %1989 }
0x20cb   :  { %v1992_v0 = vmul.f32 %v1990_v63, %v1987_v62 }
0x20cd   :  { %v4499_v56 = vadd.f32 %v1993_v54, %v1992_v0 }
0x20cf   :  { %v2079_v3 = vsel %vm282_vm3, %v2077_v38, %v4499_v56 }
0x20d0   :  { %v2080_v8 = vpack.c.bf16 %v2079_v3, %v2079_v3 }
0x20d2   :  { %3472 = vmatmul.mubr.msk.bf16.vlgmr.msra.gmra.mxu1 %vm386_vm4, %v2080_v8 }
0x20d3   :  { %3496 = vmatpush3.bf16.msra.mxu1 %v4246_v51  ;;  %3499 = vmatprep.mubr.msk.bf16.mxu1 %vm3833_vm1, %v3831_v4 }
0x20d4   :  { %3497 = vmatprep.subr.bf16.mxu1 %v3831_v4 }
0x20d5   :  { %v3744_v11 = vpop.eup %3743 }
0x20d6   :  { %v2221_v32 = vsub.f32 1.0, %v3744_v11  ;;  %v2227_v37 = vmul.f32 %v3744_v11, %v4476_v33 }
0x20d7   :  { %3498 = vmatpush3.bf16.msra.mxu1 %v4255_v52 }
0x20d8   :  { %3503 = vmatprep.subr.bf16.mxu1 %v3831_v4 }
0x2128   :  { %v2212_v10 = vpop.permute.xlu0 %2211 }
0x2129   :  { %v2214_v14 = vmul.f32 %v3744_v11, %v2212_v10 }
0x212b   :  { %2216 = vrot.lane.b32.xlu1 %v2214_v14, %s3832_s28 }
0x2192   :  { %v2118_v15 = vpop.f32.mrf.mxu1 }
0x2193   :  { %v2119_v26 = vadd.f32 %v4371_v39, %v2118_v15 }
0x2194   :  { %v3473_v17 = vpop.f32.mrf.mxu1 }
0x2195   :  { %v3042_v30 = vmul.f32 -1.442695, %v2119_v26 }
0x2196   :  { %v2121_v19 = vpop.f32.mrf.mxu1 }
0x2198   :  { %v3474_v20 = vpop.f32.mrf.mxu1 }
0x219d   :  { %v2217_v13 = vpop.permute.xlu1 %2216 }
0x219e   :  { %v2219_v21 = vadd.f32 %v2217_v13, %v2154_v57 }
0x21a0   :  { %3745 = vtanh.f32 %v2219_v21 }
0x21a1   :  { %3747 = vpow2.f32 %v3042_v30 }
0x21ad   :  { %v3746_v23 = vpop.eup %3745 }
0x21ae   :  { %2223 = vrot.lane.b32.xlu0 %v3746_v23, %s3835_s14  ;;  %v3748_v31 = vpop.eup %3747 }
0x21af   :  { %v2127_v29 = vadd.f32 1.0, %v3748_v31 }
0x21b1   :  { %3749 = vrcp.f32 %v2127_v29 }
0x21b2   :  { %2131 = vrot.lane.b32.xlu0 %v2119_v26, %s3836_s18 }
0x21be   :  { %v3750_v47 = vpop.eup %3749 }
0x21bf   :  { %v2141_v55 = vsub.f32 1.0, %v3750_v47  ;;  %v2147_v53 = vmul.f32 %v3750_v47, %v4499_v56 }
0x2220   :  { %v2224_v35 = vpop.permute.xlu0 %2223 }
0x2221   :  { %v2226_v25 = vmul.f32 %v2224_v35, %v2221_v32 }
0x2223   :  { %v4515_v40 = vadd.f32 %v2227_v37, %v2226_v25 }
0x2224   :  { %v2132_v12 = vpop.permute.xlu0 %2131 }
0x2225   :  { %v2309_v41 = vpack.c.bf16 %v4515_v40, %v4515_v40  ;;  %v2134_v27 = vmul.f32 %v3750_v47, %v2132_v12 }
0x2227   :  { %2311 = vrot.lane.b32.xlu1 %v2309_v41, %s3835_s14 }
0x222b   :  { %2136 = vrot.lane.b32.xlu1 %v2134_v27, %s3832_s28 }
0x222f   :  { %2230 = vrot.lane.b32.xlu1 %v4515_v40, %s3835_s14 }
0x2299   :  { %v2312_v48 = vpop.permute.xlu1 %2311 }
0x229a   :  { %3500 = vmatmul.mubr.msk.bf16.vlgmr.msra.gmra.mxu1 %vm282_vm3, %v2312_v48 }
0x229b   :  { %3504 = vmatpush3.bf16.msra.mxu1 %v4302_v42  ;;  %3511 = vmatprep.mubr.msk.bf16.mxu1 %vm3833_vm1, %v3831_v4 }
0x229c   :  { %3505 = vmatprep.subr.bf16.mxu1 %v3831_v4 }
0x229d   :  { %v2137_v33 = vpop.permute.xlu1 %2136 }
0x229e   :  { %v2139_v49 = vadd.f32 %v2137_v33, %v2119_v26 }
0x229f   :  { %3506 = vmatpush3.bf16.msra.mxu1 %v4311_v43 }
0x22a0   :  { %3751 = vtanh.f32 %v2139_v49  ;;  %3507 = vmatprep.subr.bf16.mxu1 %v3831_v4 }
0x22a1   :  { %v2231_v62 = vpop.permute.xlu1 %2230 }
0x22a3   :  { %3508 = vmatpush3.bf16.msra.mxu1 %v4318_v44 }
0x22a4   :  { %3509 = vmatprep.subr.bf16.mxu1 %v3831_v4 }
0x22a7   :  { %3510 = vmatpush3.bf16.msra.mxu1 %v4325_v46 }
0x22a8   :  { %3535 = vmatprep.subr.bf16.mxu1 %v3831_v4 }
0x22ad   :  { %v3752_v50 = vpop.eup %3751 }
0x22ae   :  { %2143 = vrot.lane.b32.xlu0 %v3752_v50, %s3835_s14 }
0x2320   :  { %v2144_v59 = vpop.permute.xlu0 %2143 }
0x2321   :  { %v2146_v60 = vmul.f32 %v2144_v59, %v2141_v55 }
0x2323   :  { %v4536_v61 = vadd.f32 %v2147_v53, %v2146_v60 }
0x2325   :  { %v2233_v63 = vsel %vm282_vm3, %v2231_v62, %v4536_v61 }
0x2326   :  { %v2234_v54 = vpack.c.bf16 %v2233_v63, %v2233_v63 }
0x2328   :  { %3492 = vmatmul.mubr.msk.bf16.vlgmr.msra.gmra.mxu0 %vm386_vm4, %v2234_v54 }
0x2329   :  { %3516 = vmatpush3.bf16.msra.mxu0 %v4246_v51  ;;  %3519 = vmatprep.mubr.msk.bf16.mxu0 %vm3833_vm1, %v3831_v4 }
0x232a   :  { %3517 = vmatprep.subr.bf16.mxu0 %v3831_v4 }
0x232d   :  { %3518 = vmatpush3.bf16.msra.mxu0 %v4255_v52 }
0x232e   :  { %3523 = vmatprep.subr.bf16.mxu0 %v3831_v4 }
0x235a   :  { %v2350_v0 = vpop.f32.mrf.mxu1 }
0x235b   :  { %v2357_v38 = vadd.f32 %v2350_v0, %v3967_v36  ;;  %v2356_v5 = vadd.f32 %v2350_v0, %v2308_v1 }
0x235c   :  { %v3501_v3 = vpop.f32.mrf.mxu1 }
0x235d   :  { %2365 = vrot.lane.b32.xlu0 %v2357_v38, %s3832_s28  ;;  %v3048_v51 = vmul.f32 -1.442695, %v2356_v5 }
0x235e   :  { %v2353_v8 = vpop.f32.mrf.mxu1 }
0x235f   :  { %3753 = vpow2.f32 %v3048_v51 }
0x2360   :  { %v3502_v57 = vpop.f32.mrf.mxu1 }
0x236c   :  { %v3754_v6 = vpop.eup %3753 }
0x236d   :  { %v2361_v7 = vadd.f32 1.0, %v3754_v6  ;;  %v2462_v6 = vld [vmem:[#allocation2 + $0x70] sm:$0xff] }
0x236f   :  { %3755 = vrcp.f32 %v2361_v7 }
0x237c   :  { %v3756_v11 = vpop.eup %3755 }
0x237d   :  { %v2375_v37 = vsub.f32 1.0, %v3756_v11  ;;  %v2381_v41 = vmul.f32 %v3756_v11, %v4515_v40 }
0x23cf   :  { %v2366_v10 = vpop.permute.xlu0 %2365 }
0x23d0   :  { %v2368_v52 = vmul.f32 %v3756_v11, %v2366_v10 }
0x23d2   :  { %2370 = vrot.lane.b32.xlu1 %v2368_v52, %s3832_s28 }
0x23e8   :  { %v2272_v14 = vpop.f32.mrf.mxu0 }
0x23e9   :  { %v2273_v15 = vadd.f32 %v4371_v39, %v2272_v14 }
0x23ea   :  { %v3493_v17 = vpop.f32.mrf.mxu0 }
0x23eb   :  { %2285 = vrot.lane.b32.xlu1 %v2273_v15, %s3836_s18  ;;  %v3046_v13 = vmul.f32 -1.442695, %v2273_v15 }
0x23ec   :  { %v2275_v19 = vpop.f32.mrf.mxu0 }
0x23ed   :  { %3757 = vpow2.f32 %v3046_v13 }
0x23ee   :  { %v3494_v20 = vpop.f32.mrf.mxu0 }
0x23fa   :  { %v3758_v26 = vpop.eup %3757 }
0x23fb   :  { %v2281_v30 = vadd.f32 1.0, %v3758_v26 }
0x2444   :  { %v2371_v21 = vpop.permute.xlu1 %2370 }
0x2445   :  { %v2373_v23 = vadd.f32 %v2371_v21, %v2308_v1 }
0x2447   :  { %3759 = vtanh.f32 %v2373_v23 }
0x2448   :  { %3761 = vrcp.f32 %v2281_v30 }
0x2454   :  { %v3760_v31 = vpop.eup %3759 }
0x2455   :  { %2377 = vrot.lane.b32.xlu0 %v3760_v31, %s3835_s14  ;;  %v3762_v29 = vpop.eup %3761 }
0x2456   :  { %v2295_v40 = vsub.f32 1.0, %v3762_v29  ;;  %v2301_v59 = vmul.f32 %v3762_v29, %v4536_v61 }
0x245d   :  { %v2286_v32 = vpop.permute.xlu1 %2285 }
0x245e   :  { %v2288_v35 = vmul.f32 %v3762_v29, %v2286_v32 }
0x2460   :  { %2290 = vrot.lane.b32.xlu1 %v2288_v35, %s3832_s28 }
0x24c7   :  { %v2378_v25 = vpop.permute.xlu0 %2377 }
0x24c8   :  { %v2380_v12 = vmul.f32 %v2378_v25, %v2375_v37 }
0x24ca   :  { %v4555_v47 = vadd.f32 %v2381_v41, %v2380_v12 }
0x24cc   :  { %v2463_v27 = vpack.c.bf16 %v4555_v47, %v4555_v47  ;;  %2384 = vrot.lane.b32.xlu1 %v4555_v47, %s3835_s14 }
0x24ce   :  { %2465 = vrot.lane.b32.xlu0 %v2463_v27, %s3835_s14 }
0x24d2   :  { %v2291_v48 = vpop.permute.xlu1 %2290 }
0x24d3   :  { %v2293_v33 = vadd.f32 %v2291_v48, %v2273_v15 }
0x24d5   :  { %3763 = vtanh.f32 %v2293_v33 }
0x24e2   :  { %v3764_v49 = vpop.eup %3763 }
0x24e3   :  { %2297 = vrot.lane.b32.xlu0 %v3764_v49, %s3835_s14 }
0x253e   :  { %v2385_v60 = vpop.permute.xlu1 %2384 }
0x2540   :  { %v2466_v50 = vpop.permute.xlu0 %2465 }
0x2541   :  { %3520 = vmatmul.mubr.msk.bf16.vlgmr.msra.gmra.mxu0 %vm282_vm3, %v2466_v50 }
0x2542   :  { %3524 = vmatpush3.bf16.msra.mxu0 %v4302_v42  ;;  %3531 = vmatprep.mubr.msk.bf16.mxu0 %vm3833_vm1, %v3831_v4 }
0x2543   :  { %3525 = vmatprep.subr.bf16.mxu0 %v3831_v4 }
0x2546   :  { %3526 = vmatpush3.bf16.msra.mxu0 %v4311_v43 }
0x2547   :  { %3527 = vmatprep.subr.bf16.mxu0 %v3831_v4 }
0x254a   :  { %3528 = vmatpush3.bf16.msra.mxu0 %v4318_v44  ;;  %v3802_v44 = vld [vmem:[%s4721_s2 + $0x8] sm:$0xff]  }
0x254b   :  { %3529 = vmatprep.subr.bf16.mxu0 %v3831_v4 }
0x254e   :  { %3530 = vmatpush3.bf16.msra.mxu0 %v4325_v46  ;;  %v3803_v46 = vld [vmem:[%s4721_s2] sm:$0xff]  }
0x2555   :  { %v2298_v55 = vpop.permute.xlu0 %2297 }
0x2556   :  { %v2300_v42 = vmul.f32 %v2298_v55, %v2295_v40 }
0x2558   :  { %v4574_v53 = vadd.f32 %v2301_v59, %v2300_v42 }
0x255a   :  { %v2387_v62 = vsel %vm282_vm3, %v2385_v60, %v4574_v53 }
0x255b   :  { %v2388_v43 = vpack.c.bf16 %v2387_v62, %v2387_v62 }
0x255d   :  { %3512 = vmatmul.mubr.msk.bf16.vlgmr.msra.gmra.mxu1 %vm386_vm4, %v2388_v43 }
0x255e   :  { %3536 = vmatpush3.bf16.msra.mxu1 %v3802_v44  ;;  %3539 = vmatprep.mubr.msk.bf16.mxu1 %vm3833_vm1, %v3831_v4  ;;  %v3805_v44 = vld [vmem:[%s4724_s5 + $0x10] sm:$0xff]  }
0x255f   :  { %3537 = vmatprep.subr.bf16.mxu1 %v3831_v4 }
0x2562   :  { %3538 = vmatpush3.bf16.msra.mxu1 %v3803_v46  ;;  %v3806_v46 = vld [vmem:[%s4724_s5 + $0x8] sm:$0xff]  }
0x2563   :  { %3543 = vmatprep.subr.bf16.mxu1 %v3831_v4 }
0x2601   :  { %v2504_v63 = vpop.f32.mrf.mxu0 }
0x2602   :  { %v2511_v54 = vadd.f32 %v2504_v63, %v3967_v36  ;;  %v2510_v7 = vadd.f32 %v2504_v63, %v2462_v6  ;;  %v3807_v63 = vld [vmem:[%s4724_s5] sm:$0xff]  }
0x2603   :  { %v3521_v0 = vpop.f32.mrf.mxu0 }
0x2604   :  { %2519 = vrot.lane.b32.xlu0 %v2511_v54, %s3832_s28  ;;  %v3052_v11 = vmul.f32 -1.442695, %v2510_v7 }
0x2605   :  { %v2507_v38 = vpop.f32.mrf.mxu0 }
0x2606   :  { %3765 = vpow2.f32 %v3052_v11 }
0x2607   :  { %v3522_v3 = vpop.f32.mrf.mxu0 }
0x2613   :  { %v3766_v10 = vpop.eup %3765 }
0x2614   :  { %v2515_v52 = vadd.f32 1.0, %v3766_v10 }
0x2616   :  { %3767 = vrcp.f32 %v2515_v52 }
0x261d   :  { %v2426_v8 = vpop.f32.mrf.mxu1 }
0x261e   :  { %v2427_v57 = vadd.f32 %v4371_v39, %v2426_v8 }
0x261f   :  { %v3513_v1 = vpop.f32.mrf.mxu1 }
0x2620   :  { %2439 = vrot.lane.b32.xlu0 %v2427_v57, %s3836_s18  ;;  %v3050_v14 = vmul.f32 -1.442695, %v2427_v57 }
0x2621   :  { %v2429_v5 = vpop.f32.mrf.mxu1 }
0x2622   :  { %3769 = vpow2.f32 %v3050_v14 }
0x2623   :  { %v3514_v51 = vpop.f32.mrf.mxu1  ;;  %v3768_v15 = vpop.eup %3767 }
0x2624   :  { %v2529_v25 = vsub.f32 1.0, %v3768_v15  ;;  %v2535_v12 = vmul.f32 %v3768_v15, %v4555_v47  ;;  %v3804_v47 = vld [vmem:[%s4724_s5 + $0x18] sm:$0xff]  }
0x262f   :  { %v3770_v20 = vpop.eup %3769 }
0x2630   :  { %v2435_v13 = vadd.f32 1.0, %v3770_v20 }
0x2632   :  { %3771 = vrcp.f32 %v2435_v13 }
0x263f   :  { %v3772_v21 = vpop.eup %3771 }
0x2640   :  { %v2449_v50 = vsub.f32 1.0, %v3772_v21  ;;  %v2455_v59 = vmul.f32 %v3772_v21, %v4574_v53 }
0x2676   :  { %v2520_v17 = vpop.permute.xlu0 %2519 }
0x2677   :  { %v2522_v19 = vmul.f32 %v3768_v15, %v2520_v17 }
0x2679   :  { %2524 = vrot.lane.b32.xlu1 %v2522_v19, %s3832_s28 }
0x2692   :  { %v2440_v23 = vpop.permute.xlu0 %2439 }
0x2693   :  { %v2442_v26 = vmul.f32 %v3772_v21, %v2440_v23 }
0x2695   :  { %2444 = vrot.lane.b32.xlu0 %v2442_v26, %s3832_s28 }
0x26eb   :  { %v2525_v30 = vpop.permute.xlu1 %2524 }
0x26ec   :  { %v2527_v31 = vadd.f32 %v2525_v30, %v2462_v6  ;;  %v2616_v6 = vld [vmem:[#allocation2 + $0x78] sm:$0xff] }
0x26ee   :  { %3773 = vtanh.f32 %v2527_v31 }
0x26fb   :  { %v3774_v29 = vpop.eup %3773 }
0x26fc   :  { %2531 = vrot.lane.b32.xlu1 %v3774_v29, %s3835_s14 }
0x2707   :  { %v2445_v32 = vpop.permute.xlu0 %2444 }
0x2708   :  { %v2447_v35 = vadd.f32 %v2445_v32, %v2427_v57 }
0x270a   :  { %3775 = vtanh.f32 %v2447_v35 }
0x2717   :  { %v3776_v37 = vpop.eup %3775 }
0x2718   :  { %2451 = vrot.lane.b32.xlu0 %v3776_v37, %s3835_s14 }
0x276e   :  { %v2532_v41 = vpop.permute.xlu1 %2531 }
0x276f   :  { %v2534_v27 = vmul.f32 %v2532_v41, %v2529_v25 }
0x2771   :  { %v4598_v48 = vadd.f32 %v2535_v12, %v2534_v27 }
0x2773   :  { %v2617_v33 = vpack.c.bf16 %v4598_v48, %v4598_v48 }
0x2775   :  { %2619 = vrot.lane.b32.xlu1 %v2617_v33, %s3835_s14 }
0x2779   :  { %2538 = vrot.lane.b32.xlu1 %v4598_v48, %s3835_s14 }
0x278a   :  { %v2452_v49 = vpop.permute.xlu0 %2451 }
0x278b   :  { %v2454_v40 = vmul.f32 %v2452_v49, %v2449_v50 }
0x278d   :  { %v4612_v42 = vadd.f32 %v2455_v59, %v2454_v40 }
0x27e7   :  { %v2620_v55 = vpop.permute.xlu1 %2619 }
0x27e8   :  { %3540 = vmatmul.mubr.msk.bf16.vlgmr.msra.gmra.mxu1 %vm282_vm3, %v2620_v55 }
0x27e9   :  { %3544 = vmatpush3.bf16.msra.mxu1 %v3804_v47  ;;  %3551 = vmatprep.mubr.msk.bf16.mxu1 %vm3833_vm1, %v3831_v4 }
0x27ea   :  { %3545 = vmatprep.subr.bf16.mxu1 %v3831_v4 }
0x27eb   :  { %v2539_v60 = vpop.permute.xlu1 %2538 }
0x27ec   :  { %v2541_v62 = vsel %vm282_vm3, %v2539_v60, %v4612_v42 }
0x27ed   :  { %v2542_v43 = vpack.c.bf16 %v2541_v62, %v2541_v62  ;;  %3546 = vmatpush3.bf16.msra.mxu1 %v3805_v44 }
0x27ee   :  { %3547 = vmatprep.subr.bf16.mxu1 %v3831_v4 }
0x27ef   :  { %3532 = vmatmul.mubr.msk.bf16.vlgmr.msra.gmra.mxu0 %vm386_vm4, %v2542_v43 }
0x27f1   :  { %3548 = vmatpush3.bf16.msra.mxu1 %v3806_v46 }
0x27f2   :  { %3549 = vmatprep.subr.bf16.mxu1 %v3831_v4 }
0x27f5   :  { %3550 = vmatpush3.bf16.msra.mxu1 %v3807_v63 }
0x28a8   :  { %v2658_v54 = vpop.f32.mrf.mxu1 }
0x28a9   :  { %v2665_v0 = vadd.f32 %v2658_v54, %v3967_v36  ;;  %v2664_v7 = vadd.f32 %v2658_v54, %v2616_v6 }
0x28aa   :  { %v3541_v38 = vpop.f32.mrf.mxu1 }
0x28ab   :  { %2673 = vrot.lane.b32.xlu0 %v2665_v0, %s3832_s28  ;;  %v3056_v11 = vmul.f32 -1.442695, %v2664_v7 }
0x28ac   :  { %v2661_v3 = vpop.f32.mrf.mxu1 }
0x28ad   :  { %3777 = vpow2.f32 %v3056_v11 }
0x28ae   :  { %v3542_v8 = vpop.f32.mrf.mxu1 }
0x28af   :  { %v2580_v57 = vpop.f32.mrf.mxu0 }
0x28b0   :  { %v2581_v1 = vadd.f32 %v4371_v39, %v2580_v57 }
0x28b1   :  { %v3533_v5 = vpop.f32.mrf.mxu0 }
0x28b2   :  { %2593 = vrot.lane.b32.xlu1 %v2581_v1, %s3836_s18  ;;  %v3054_v10 = vmul.f32 -1.442695, %v2581_v1 }
0x28b3   :  { %v2583_v4 = vpop.f32.mrf.mxu0 }
0x28b4   :  { %3779 = vpow2.f32 %v3054_v10 }
0x28b5   :  { %v3534_v51 = vpop.f32.mrf.mxu0 }
0x28ba   :  { %v3778_v36 = vpop.eup %3777 }
0x28bb   :  { %v2669_v52 = vadd.f32 1.0, %v3778_v36 }
0x28bd   :  { %3781 = vrcp.f32 %v2669_v52 }
0x28c1   :  { %v3780_v14 = vpop.eup %3779 }
0x28c2   :  { %v2589_v15 = vadd.f32 1.0, %v3780_v14 }
0x28c4   :  { %3783 = vrcp.f32 %v2589_v15 }
0x28ca   :  { %v3782_v17 = vpop.eup %3781 }
0x28cb   :  { %v2683_v35 = vsub.f32 1.0, %v3782_v17  ;;  %v2689_v25 = vmul.f32 %v3782_v17, %v4598_v48  ;;  %v3808_v48 = vld [vmem:[%s4725_s6] ss:$0 sm:$0xff] }
0x28d1   :  { %v3784_v20 = vpop.eup %3783 }
0x28d2   :  { %v2603_v33 = vsub.f32 1.0, %v3784_v20  ;;  %v2609_v50 = vmul.f32 %v3784_v20, %v4612_v42 }
0x291d   :  { %v2674_v19 = vpop.permute.xlu0 %2673 }
0x291e   :  { %v2676_v39 = vmul.f32 %v3782_v17, %v2674_v19 }
0x2920   :  { %2678 = vrot.lane.b32.xlu0 %v2676_v39, %s3832_s28 }
0x2924   :  { %v2594_v13 = vpop.permute.xlu1 %2593 }
0x2925   :  { %v2596_v21 = vmul.f32 %v3784_v20, %v2594_v13 }
0x2927   :  { %2598 = vrot.lane.b32.xlu1 %v2596_v21, %s3832_s28 }
0x2992   :  { %v2679_v23 = vpop.permute.xlu0 %2678 }
0x2993   :  { %v2681_v26 = vadd.f32 %v2679_v23, %v2616_v6 }
0x2995   :  { %3785 = vtanh.f32 %v2681_v26 }
0x2999   :  { %v2599_v30 = vpop.permute.xlu1 %2598 }
0x299a   :  { %v2601_v31 = vadd.f32 %v2599_v30, %v2581_v1  ;;  %v3602_v1 = vld [vmem:[%s4726_s7] sm:$0xff]  }
0x299c   :  { %3787 = vtanh.f32 %v2601_v31 }
0x29a2   :  { %v3786_v29 = vpop.eup %3785 }
0x29a3   :  { %2685 = vrot.lane.b32.xlu0 %v3786_v29, %s3835_s14 }
0x29a9   :  { %v3788_v32 = vpop.eup %3787 }
0x29aa   :  { %2605 = vrot.lane.b32.xlu1 %v3788_v32, %s3835_s14 }
0x2a15   :  { %v2686_v37 = vpop.permute.xlu0 %2685 }
0x2a16   :  { %v2688_v41 = vmul.f32 %v2686_v37, %v2683_v35 }
0x2a18   :  { %v2690_v12 = vadd.f32 %v2689_v25, %v2688_v41 }
0x2a1a   :  { %2692 = vrot.lane.b32.xlu0 %v2690_v12, %s3835_s14 }
0x2a1c   :  { %v2606_v27 = vpop.permute.xlu1 %2605 }
0x2a1d   :  { %v2608_v49 = vmul.f32 %v2606_v27, %v2603_v33 }
0x2a1f   :  { %v4640_v40 = vadd.f32 %v2609_v50, %v2608_v49 }
0x2a8c   :  { %v2693_v55 = vpop.permute.xlu0 %2692 }
0x2a8d   :  { %v2695_v59 = vsel %vm282_vm3, %v2693_v55, %v4640_v40 }
0x2a8e   :  { %v2696_v47 = vpack.c.bf16 %v2695_v59, %v2695_v59  ;;  %v3059_v59 = vld [vmem:[%s4727_s8] ss:$0 sm:$0xff]  ;;  %s3837_s8 = smov [#allocation4]  }
0x2a8f   :  { %s2959_s27 = sshll.u32 %s3837_s8, 4  ;;  %s2960_s27 = int_to_ptr.vmem [resolvable:$true] %s2959_s27 }
0x2a90   :  { %3552 = vmatmul.mubr.msk.bf16.vlgmr.msra.gmra.mxu1 %vm386_vm4, %v2696_v47  ;;  %s3809_s4 = scalar_lea.vmem %s2960_s27, 2048  ;;  %p3814_p1 = scmp.lt.s32.totalorder %s2960_s27, %s2960_s27 }
0x2a91   :  { %p3810_p0 = scmp.ne.s32.totalorder %s2960_s27, %s3809_s4  ;;  %p3815_p2 = scmp.lt.s32.totalorder %s3809_s4, %s3809_s4 }
0x2a93   :  { %p3816_p3 = por %p3815_p2, %p3814_p1 }
0x2a95   :  { %p3817_p4 = pnand %p3816_p3, %p3810_p0 }
0x2b50   :  { %v2734_v60 = vpop.f32.mrf.mxu1 }
0x2b51   :  { %v2735_v62 = vadd.f32 %v3808_v48, %v2734_v60 }
0x2b52   :  { %v3553_v43 = vpop.f32.mrf.mxu1 }
0x2b53   :  { %2747 = vrot.lane.b32.xlu1 %v2735_v62, %s3836_s18  ;;  %v3058_v63 = vmul.f32 -1.442695, %v2735_v62 }
0x2b54   :  { %v2737_v44 = vpop.f32.mrf.mxu1 }
0x2b55   :  { %3789 = vpow2.f32 %v3058_v63 }
0x2b56   :  { %v3554_v46 = vpop.f32.mrf.mxu1 }
0x2b62   :  { %v3790_v54 = vpop.eup %3789 }
0x2b63   :  { %v2743_v0 = vadd.f32 1.0, %v3790_v54 }
0x2b65   :  { %3791 = vrcp.f32 %v2743_v0 }
0x2b72   :  { %v3792_v38 = vpop.eup %3791 }
0x2b73   :  { %v2763_v7 = vmul.f32 %v3792_v38, %v4640_v40 }
0x2bc5   :  { %v2748_v3 = vpop.permute.xlu1 %2747 }
0x2bc6   :  { %v2750_v8 = vmul.f32 %v3792_v38, %v2748_v3 }
0x2bc8   :  { %2752 = vrot.lane.b32.xlu0 %v2750_v8, %s3832_s28 }
0x2bcc   :  { %456 = vrot.lane.b32.xlu0 %v4076_v22, %s3835_s14 }
0x2bd0   :  { %764 = vrot.lane.b32.xlu0 %v4155_v2, %s3835_s14 }
0x2bd4   :  { %1072 = vrot.lane.b32.xlu0 %v4233_v45, %s3835_s14 }
0x2bd8   :  { %1380 = vrot.lane.b32.xlu0 %v4341_v28, %s3835_s14 }
0x2bdc   :  { %1688 = vrot.lane.b32.xlu0 %v4423_v16, %s3835_s14  ;;  %v3601_v16 = vld [vmem:[%s4726_s7 + $0x8] sm:$0xff]  }
0x2bdd   :  { %3555 = vmatprep.subr.bf16.mxu0 %v3601_v16 }
0x2bde   :  { %3556 = vmatpush3.bf16.msra.mxu0 %v3601_v16 }
0x2bdf   :  { %3557 = vmatprep.subr.bf16.mxu0 %v3602_v1 }
0x2be0   :  { %1996 = vrot.lane.b32.xlu0 %v4499_v56, %s3835_s14 }
0x2be2   :  { %3558 = vmatpush3.bf16.msra.mxu0 %v3602_v1 }
0x2be4   :  { %2304 = vrot.lane.b32.xlu0 %v4574_v53, %s3835_s14 }
0x2be8   :  { %2612 = vrot.lane.b32.xlu0 %v4640_v40, %s3835_s14 }
0x2c3a   :  { %v2753_v22 = vpop.permute.xlu0 %2752 }
0x2c3b   :  { %v2755_v2 = vadd.f32 %v2753_v22, %v2735_v62 }
0x2c3d   :  { %3793 = vtanh.f32 %v2755_v2 }
0x2c3e   :  { %v457_v57 = vpop.permute.xlu0 %456 }
0x2c3f   :  { %459 = vst.msk [vmem:[#allocation3] sm:$0xff] %vm282_vm3, %v457_v57 }
0x2c42   :  { %v765_v45 = vpop.permute.xlu0 %764 }
0x2c43   :  { %767 = vst.msk [vmem:[#allocation3 + $0x10] sm:$0xff] %vm282_vm3, %v765_v45 }
0x2c46   :  { %v1073_v28 = vpop.permute.xlu0 %1072  ;;  %v2770_v36 = vld [vmem:[#allocation3] sm:$0xff] }
0x2c47   :  { %1075 = vst.msk [vmem:[#allocation3 + $0x20] sm:$0xff] %vm282_vm3, %v1073_v28 }
0x2c4a   :  { %v3794_v56 = vpop.eup %3793  ;;  %v1381_v53 = vpop.permute.xlu0 %1380  ;;  %v2772_v14 = vld [vmem:[#allocation3 + $0x10] sm:$0xff] }
0x2c4b   :  { %1383 = vst.msk [vmem:[#allocation3 + $0x30] sm:$0xff] %vm282_vm3, %v1381_v53  ;;  %2759 = vrot.lane.b32.xlu1 %v3794_v56, %s3835_s14 }
0x2c4e   :  { %v1689_v5 = vpop.permute.xlu0 %1688  ;;  %v2774_v39 = vld [vmem:[#allocation3 + $0x20] sm:$0xff] }
0x2c4f   :  { %1691 = vst.msk [vmem:[#allocation3 + $0x40] sm:$0xff] %vm282_vm3, %v1689_v5  ;;  %610 = vrot.lane.b32.xlu1 %v4121_v18, %s3835_s14  ;;  %v2757_v18 = vsub.f32 1.0, %v3792_v38 }
0x2c52   :  { %v1997_v4 = vpop.permute.xlu0 %1996  ;;  %v2776_v23 = vld [vmem:[#allocation3 + $0x30] sm:$0xff] }
0x2c53   :  { %1999 = vst.msk [vmem:[#allocation3 + $0x50] sm:$0xff] %vm282_vm3, %v1997_v4  ;;  %918 = vrot.lane.b32.xlu1 %v4194_v58, %s3835_s14 }
0x2c56   :  { %v2305_v51 = vpop.permute.xlu0 %2304  ;;  %v2778_v29 = vld [vmem:[#allocation3 + $0x40] sm:$0xff] }
0x2c57   :  { %2307 = vst.msk [vmem:[#allocation3 + $0x60] sm:$0xff] %vm282_vm3, %v2305_v51  ;;  %1226 = vrot.lane.b32.xlu1 %v4282_v34, %s3835_s14 }
0x2c5a   :  { %v2613_v6 = vpop.permute.xlu0 %2612  ;;  %v2780_v37 = vld [vmem:[#allocation3 + $0x50] sm:$0xff] }
0x2c5b   :  { %2615 = vst.msk [vmem:[#allocation3 + $0x70] sm:$0xff] %vm282_vm3, %v2613_v6  ;;  %1534 = vrot.lane.b32.xlu1 %v4385_v24, %s3835_s14 }
0x2c5e   :  { %v2782_v12 = vld [vmem:[#allocation3 + $0x60] sm:$0xff] }
0x2c5f   :  { %1842 = vrot.lane.b32.xlu1 %v4461_v9, %s3835_s14 }
0x2c62   :  { %v2784_v50 = vld [vmem:[#allocation3 + $0x70] sm:$0xff] }
0x2c63   :  { %2150 = vrot.lane.b32.xlu1 %v4536_v61, %s3835_s14 }
0x2c67   :  { %2458 = vrot.lane.b32.xlu1 %v4612_v42, %s3835_s14 }
0x2cbd   :  { %v2760_v58 = vpop.permute.xlu1 %2759 }
0x2cbe   :  { %v2762_v34 = vmul.f32 %v2760_v58, %v2757_v18 }
0x2cc0   :  { %v2764_v11 = vadd.f32 %v2763_v7, %v2762_v34 }
0x2cc1   :  { %v611_v10 = vpop.permute.xlu1 %610 }
0x2cc2   :  { %613 = vst.msk [vmem:[#allocation3 + $0x8] sm:$0xff] %vm282_vm3, %v611_v10  ;;  %2766 = vrot.lane.b32.xlu1 %v2764_v11, %s3835_s14 }
0x2cc5   :  { %v919_v24 = vpop.permute.xlu1 %918 }
0x2cc6   :  { %921 = vst.msk [vmem:[#allocation3 + $0x18] sm:$0xff] %vm282_vm3, %v919_v24 }
0x2cc9   :  { %v1227_v9 = vpop.permute.xlu1 %1226  ;;  %v2771_v61 = vld [vmem:[#allocation3 + $0x8] sm:$0xff] }
0x2cca   :  { %1229 = vst.msk [vmem:[#allocation3 + $0x28] sm:$0xff] %vm282_vm3, %v1227_v9  ;;  %v2786_v42 = vpack.c.bf16 %v2771_v61, %v2770_v36 }
0x2ccc   :  { %3559 = vmatprep.mubr.msk.bf16.mxu0 %vm282_vm3, %v2786_v42 }
0x2ccd   :  { %v1535_v52 = vpop.permute.xlu1 %1534  ;;  %v2773_v15 = vld [vmem:[#allocation3 + $0x18] sm:$0xff] }
0x2cce   :  { %1537 = vst.msk [vmem:[#allocation3 + $0x38] sm:$0xff] %vm282_vm3, %v1535_v52  ;;  %v2787_v17 = vpack.c.bf16 %v2773_v15, %v2772_v14 }
0x2cd0   :  { %3560 = vmatmul.mubr.msk.bf16.vlgmr.msra.gmra.mxu0 %vm282_vm3, %v2787_v17 }
0x2cd1   :  { %v1843_v19 = vpop.permute.xlu1 %1842  ;;  %v2775_v20 = vld [vmem:[#allocation3 + $0x28] sm:$0xff] }
0x2cd2   :  { %1845 = vst.msk [vmem:[#allocation3 + $0x48] sm:$0xff] %vm282_vm3, %v1843_v19  ;;  %v2788_v13 = vpack.c.bf16 %v2775_v20, %v2774_v39 }
0x2cd4   :  { %3563 = vmatprep.mubr.msk.bf16.mxu0 %vm282_vm3, %v2788_v13 }
0x2cd5   :  { %v2151_v21 = vpop.permute.xlu1 %2150  ;;  %v2777_v26 = vld [vmem:[#allocation3 + $0x38] sm:$0xff] }
0x2cd6   :  { %2153 = vst.msk [vmem:[#allocation3 + $0x58] sm:$0xff] %vm282_vm3, %v2151_v21  ;;  %v2789_v30 = vpack.c.bf16 %v2777_v26, %v2776_v23 }
0x2cd8   :  { %3564 = vmatmul.mubr.msk.bf16.gmra.mxu0 %vm282_vm3, %v2789_v30 }
0x2cd9   :  { %v2459_v31 = vpop.permute.xlu1 %2458  ;;  %v2779_v32 = vld [vmem:[#allocation3 + $0x48] sm:$0xff] }
0x2cda   :  { %2461 = vst.msk [vmem:[#allocation3 + $0x68] sm:$0xff] %vm282_vm3, %v2459_v31  ;;  %v2790_v35 = vpack.c.bf16 %v2779_v32, %v2778_v29 }
0x2cdc   :  { %3567 = vmatprep.mubr.msk.bf16.mxu0 %vm282_vm3, %v2790_v35 }
0x2cdd   :  { %v2781_v25 = vld [vmem:[#allocation3 + $0x58] sm:$0xff] }
0x2cde   :  { %v2791_v41 = vpack.c.bf16 %v2781_v25, %v2780_v37 }
0x2ce0   :  { %3568 = vmatmul.mubr.msk.bf16.gmra.mxu0 %vm282_vm3, %v2791_v41 }
0x2ce1   :  { %v2783_v27 = vld [vmem:[#allocation3 + $0x68] sm:$0xff] }
0x2ce2   :  { %v2792_v33 = vpack.c.bf16 %v2783_v27, %v2782_v12 }
0x2ce4   :  { %3571 = vmatprep.mubr.msk.bf16.mxu0 %vm282_vm3, %v2792_v33 }
0x2d34   :  { %v2767_v49 = vpop.permute.xlu1 %2766 }
0x2d35   :  { %2769 = vst.msk [vmem:[#allocation3 + $0x78] sm:$0xff] %vm282_vm3, %v2767_v49 }
0x2d3c   :  { %v2785_v40 = vld [vmem:[#allocation3 + $0x78] sm:$0xff] }
0x2d3d   :  { %v2793_v55 = vpack.c.bf16 %v2785_v40, %v2784_v50 }
0x2d3f   :  { %3572 = vmatmul.mubr.msk.bf16.gmra.mxu0 %vm282_vm3, %v2793_v55 }
0x2d90   :  { %v3561_v47 = vpop.f32.mrf.mxu0 }
0x2d91   :  { %v2884_v60 = vadd.f32 %v3561_v47, %v3059_v59 }
0x2d92   :  { %v2875_v48 = vpop.f32.mrf.mxu0 }
0x2d93   :  { %2940 = vst [vmem:[#allocation4 + $0x10] sm:$0xff] %v2884_v60  ;;  %v2876_v62 = vadd.f32 %v3059_v59, %v2875_v48 }
0x2d94   :  { %v3562_v43 = vpop.f32.mrf.mxu0 }
0x2d95   :  { %2938 = vst [vmem:[#allocation4] sm:$0xff] %v2876_v62  ;;  %v2887_v44 = vadd.f32 %v3562_v43, %v3059_v59 }
0x2d96   :  { %v2878_v46 = vpop.f32.mrf.mxu0 }
0x2d97   :  { %2941 = vst [vmem:[#allocation4 + $0x18] sm:$0xff] %v2887_v44  ;;  %v2879_v63 = vadd.f32 %v3059_v59, %v2878_v46 }
0x2d98   :  { %v3565_v54 = vpop.f32.mrf.mxu0 }
0x2d99   :  { %2939 = vst [vmem:[#allocation4 + $0x8] sm:$0xff] %v2879_v63  ;;  %v2900_v0 = vadd.f32 %v3565_v54, %v3059_v59 }
0x2d9a   :  { %v2891_v38 = vpop.f32.mrf.mxu0 }
0x2d9b   :  { %2944 = vst [vmem:[#allocation4 + $0x30] sm:$0xff] %v2900_v0  ;;  %v2892_v3 = vadd.f32 %v3059_v59, %v2891_v38 }
0x2d9c   :  { %v3566_v8 = vpop.f32.mrf.mxu0 }
0x2d9d   :  { %2942 = vst [vmem:[#allocation4 + $0x20] sm:$0xff] %v2892_v3  ;;  %v2903_v22 = vadd.f32 %v3566_v8, %v3059_v59 }
0x2d9e   :  { %v2894_v2 = vpop.f32.mrf.mxu0 }
0x2d9f   :  { %2945 = vst [vmem:[#allocation4 + $0x38] sm:$0xff] %v2903_v22  ;;  %v2895_v57 = vadd.f32 %v3059_v59, %v2894_v2 }
0x2da0   :  { %v3569_v45 = vpop.f32.mrf.mxu0 }
0x2da1   :  { %2943 = vst [vmem:[#allocation4 + $0x28] sm:$0xff] %v2895_v57  ;;  %v2916_v28 = vadd.f32 %v3569_v45, %v3059_v59 }
0x2da2   :  { %v2907_v16 = vpop.f32.mrf.mxu0 }
0x2da3   :  { %2948 = vst [vmem:[#allocation4 + $0x50] sm:$0xff] %v2916_v28  ;;  %v2908_v56 = vadd.f32 %v3059_v59, %v2907_v16 }
0x2da4   :  { %v3570_v53 = vpop.f32.mrf.mxu0 }
0x2da5   :  { %2946 = vst [vmem:[#allocation4 + $0x40] sm:$0xff] %v2908_v56  ;;  %v2919_v1 = vadd.f32 %v3570_v53, %v3059_v59 }
0x2da6   :  { %v2910_v5 = vpop.f32.mrf.mxu0 }
0x2da7   :  { %2949 = vst [vmem:[#allocation4 + $0x58] sm:$0xff] %v2919_v1  ;;  %v2911_v4 = vadd.f32 %v3059_v59, %v2910_v5 }
0x2da9   :  { %2947 = vst [vmem:[#allocation4 + $0x48] sm:$0xff] %v2911_v4 }
0x2dff   :  { %v3573_v51 = vpop.f32.mrf.mxu0 }
0x2e00   :  { %v2932_v6 = vadd.f32 %v3573_v51, %v3059_v59 }
0x2e01   :  { %v2923_v18 = vpop.f32.mrf.mxu0 }
0x2e02   :  { %2952 = vst [vmem:[#allocation4 + $0x70] sm:$0xff] %v2932_v6  ;;  %v2924_v58 = vadd.f32 %v3059_v59, %v2923_v18 }
0x2e03   :  { %v3574_v7 = vpop.f32.mrf.mxu0 }
0x2e04   :  { %2950 = vst [vmem:[#allocation4 + $0x60] sm:$0xff] %v2924_v58  ;;  %v2935_v34 = vadd.f32 %v3574_v7, %v3059_v59 }
0x2e05   :  { %v2926_v11 = vpop.f32.mrf.mxu0 }
0x2e06   :  { %2953 = vst [vmem:[#allocation4 + $0x78] sm:$0xff] %v2935_v34  ;;  %v2927_v10 = vadd.f32 %v3059_v59, %v2926_v11 }
0x2e08   :  { %2951 = vst [vmem:[#allocation4 + $0x68] sm:$0xff] %v2927_v10 }
0x2e09   :  { %3820 = shalt.err (!%p3817_p4)
}
0x2e0a   :  { %s3838_s29 = smov 128   ;;  %s3839_s3 = smov 8  }
0x2e0b   :  { %2965 = dma.vmem_to_hbm [thread:$0]  %s2960_s27, 2048, %s4728_s9, [#allocation5], %s3838_s29, %s3838_s29, %s3839_s3  }
0x2e0c   :  { %3829 = dma.done.wait [#allocation5], 2048  }
0x2e0d   :  { %3830 = vsyncadd [#allocation5], 4294965248 }
0x2e0e   :  { %2969 = vsyncpa [#allocation5], 1 }

</bundles_post_ra>
